<compile_context>
chip_gen: v6e
topology: v6e:2x2x1
jax: 0.10.0
libtpu: 0.0.40
codegen_flags: <defaults>
</compile_context>

<pallas_src>
import functools
import math

import jax
import jax.numpy as jnp
from jax.experimental import pallas as pl
from jax.experimental.pallas import tpu as pltpu

NEG_SLOPE = 0.1

# Below this element count, a standalone Pallas custom-call launch + DMA setup
# costs more than the whole memory-bound op; use fused XLA jnp.where instead.
_MIN_PALLAS_ELEMS = 256 * 1024


def _round_up(x, m):
    return ((x + m - 1) // m) * m


def _leaky_relu_bwd_kernel(grad_ref, x_ref, out_ref, *, negative_slope):
    g = grad_ref[...]
    x = x_ref[...]
    # aten semantics (self_is_result=False): strictly `input > 0` keeps grad;
    # input == 0 takes the negative-slope branch.
    out_ref[...] = jnp.where(x > 0, g, g * jnp.asarray(negative_slope, g.dtype))


def _run_pallas_2d(grad2, x2, tm, tn, negative_slope):
    """Tile a 2-D array in place (no padded copies); ragged edges are masked."""
    M, N = grad2.shape
    itemsize = jnp.dtype(grad2.dtype).itemsize

    # Each block dim is either a multiple of (8, 128) or the full array extent
    # (both legal Mosaic layouts); ragged edge blocks are masked by Pallas.
    tn_eff = tn if N >= tn else N
    tm_eff = tm if M >= tm else M

    grid_m = pl.cdiv(M, tm_eff)
    grid_n = pl.cdiv(N, tn_eff)

    # v7x has 2 TensorCores sharing HBM: guarantee >= 2 grid steps for
    # mid-size inputs so neither core idles (no-op for v5e/v6e).
    if grid_m * grid_n < 2 and M >= 16:
        tm_eff = min(tm_eff, _round_up(pl.cdiv(M, 2), 8))
        grid_m = pl.cdiv(M, tm_eff)

    total = M * N
    return pl.pallas_call(
        functools.partial(_leaky_relu_bwd_kernel, negative_slope=negative_slope),
        out_shape=jax.ShapeDtypeStruct((M, N), grad2.dtype),
        grid=(grid_m, grid_n),
        in_specs=[
            pl.BlockSpec((tm_eff, tn_eff), lambda i, j: (i, j)),
            pl.BlockSpec((tm_eff, tn_eff), lambda i, j: (i, j)),
        ],
        out_specs=pl.BlockSpec((tm_eff, tn_eff), lambda i, j: (i, j)),
        compiler_params=pltpu.CompilerParams(
            dimension_semantics=("parallel", "parallel"),
            # v5e default scoped VMEM is 16 MiB (too tight for the
            # double-buffered tiles); 32 MiB is free headroom on v5e/v6e
            # (128 MiB physical) and leaves Mosaic scratch room on v7x (64 MiB).
            vmem_limit_bytes=32 * 1024 * 1024,
        ),
        cost_estimate=pl.CostEstimate(
            flops=total, transcendentals=0, bytes_accessed=3 * total * itemsize
        ),
    )(grad2, x2)


def leaky_relu_backward(grad, x, negative_slope=NEG_SLOPE, *, tm=1024, tn=1024):
    """out = grad where x > 0 else grad * negative_slope (elementwise)."""
    assert grad.shape == x.shape, "grad / input shape mismatch"
    assert grad.dtype == x.dtype and jnp.issubdtype(grad.dtype, jnp.floating)

    orig_shape = grad.shape
    total = math.prod(orig_shape) if orig_shape else 1

    if total < _MIN_PALLAS_ELEMS:
        # Small tensors: fused XLA elementwise is already bandwidth-optimal.
        return jnp.where(x > 0, grad, grad * jnp.asarray(negative_slope, grad.dtype))

    # Main path: the module's 2-D f32 inputs with a lane-friendly last dim.
    # Tile the original array directly -- no padded input copies, no output
    # slice, Pallas masks the ragged edge blocks.
    if grad.ndim == 2 and orig_shape[-1] >= 128:
        return _run_pallas_2d(grad, x, tm, tn, negative_slope)

    # Fallback (last dim < 128 or non-2D): flatten to a lane-dense (rows, 512)
    # slab so stores are unmasked full-lane vst. Pad only up to the lane width
    # (< 512 extra elements); the partial final row-block is handled by the
    # ragged grid, not by over-padding to a multiple of tm.
    tn_f = 512
    rows = pl.cdiv(total, tn_f)
    pad = rows * tn_f - total
    g2 = jnp.pad(grad.reshape(-1), (0, pad)).reshape(rows, tn_f)
    x2 = jnp.pad(x.reshape(-1), (0, pad)).reshape(rows, tn_f)
    out2 = _run_pallas_2d(g2, x2, tm, tn_f, negative_slope)
    return out2.reshape(-1)[:total].reshape(orig_shape)


def _reference(grad, x, negative_slope=NEG_SLOPE):
    return jnp.where(x > 0, grad, grad * jnp.asarray(negative_slope, grad.dtype))


if __name__ == "__main__":
    key = jax.random.PRNGKey(0)
    k1, k2, k3, k4, k5, k6 = jax.random.split(key, 6)

    # Module spec is ([-1, -1], float32) x2.
    # 1) Main aligned case: exercises the 2-step "parallel" 2-D grid.
    shape_a = (1024, 1024)
    grad_a = jax.random.normal(k1, shape_a, dtype=jnp.float32)
    x_a = jax.random.normal(k2, shape_a, dtype=jnp.float32)
    out_a = jax.block_until_ready(leaky_relu_backward(grad_a, x_a))
    ref_a = _reference(grad_a, x_a)
    assert out_a.shape == ref_a.shape and out_a.dtype == ref_a.dtype
    assert jnp.allclose(out_a, ref_a), "mismatch vs reference (aligned case)"

    # 2) Ragged / non-128-multiple case: exercises masked edge blocks (no pad copies).
    shape_b = (1000, 520)
    grad_b = jax.random.normal(k3, shape_b, dtype=jnp.float32)
    x_b = jax.random.normal(k4, shape_b, dtype=jnp.float32)
    out_b = jax.block_until_ready(leaky_relu_backward(grad_b, x_b))
    ref_b = _reference(grad_b, x_b)
    assert jnp.allclose(out_b, ref_b), "mismatch vs reference (ragged case)"

    # 3) Tiny case: exercises the fused-XLA fallback path.
    shape_c = (16, 48)
    grad_c = jax.random.normal(k5, shape_c, dtype=jnp.float32)
    x_c = jax.random.normal(k6, shape_c, dtype=jnp.float32)
    out_c = jax.block_until_ready(leaky_relu_backward(grad_c, x_c))
    ref_c = _reference(grad_c, x_c)
    assert jnp.allclose(out_c, ref_c), "mismatch vs reference (small fallback)"

    print("KERNEL_OK")
</pallas_src>

<mosaic_0001>
module attributes {stable_mosaic.version = 11 : i64} {
  func.func @_leaky_relu_bwd_kernel(%arg0: i32, %arg1: i32, %arg2: memref<512x1024xf32, #tpu.memory_space<vmem>>, %arg3: memref<512x1024xf32, #tpu.memory_space<vmem>>, %arg4: memref<512x1024xf32, #tpu.memory_space<vmem>>) attributes {dimension_semantics = [#tpu.dimension_semantics<parallel>, #tpu.dimension_semantics<parallel>], iteration_bounds = array<i64: 2, 1>, scalar_prefetch = 0 : i64, scratch_operands = 0 : i64, tpu.core_type = #tpu.core_type<tc>, window_params = [{transform_indices = @transform_0, window_bounds = array<i64: 512, 1024>}, {transform_indices = @transform_1, window_bounds = array<i64: 512, 1024>}, {transform_indices = @transform_2, window_bounds = array<i64: 512, 1024>}]} {
    %c0 = arith.constant 0 : index
    %c0_0 = arith.constant 0 : index
    %0 = vector.load %arg2[%c0, %c0_0] : memref<512x1024xf32, #tpu.memory_space<vmem>>, vector<512x1024xf32>
    %c0_1 = arith.constant 0 : index
    %c0_2 = arith.constant 0 : index
    %1 = vector.load %arg3[%c0_1, %c0_2] : memref<512x1024xf32, #tpu.memory_space<vmem>>, vector<512x1024xf32>
    %cst = arith.constant 0.000000e+00 : f32
    %2 = vector.broadcast %cst : f32 to vector<512x1024xf32>
    %3 = arith.cmpf ogt, %1, %2 : vector<512x1024xf32>
    %cst_3 = arith.constant 1.000000e-01 : f32
    %4 = vector.broadcast %cst_3 : f32 to vector<512x1024xf32>
    %5 = arith.mulf %0, %4 : vector<512x1024xf32>
    %6 = arith.select %3, %0, %5 : vector<512x1024xi1>, vector<512x1024xf32>
    %c0_4 = arith.constant 0 : index
    %c0_5 = arith.constant 0 : index
    %7 = vector.load %arg4[%c0_4, %c0_5] : memref<512x1024xf32, #tpu.memory_space<vmem>>, vector<512x1024xf32>
    tpu.vector_store %arg4[%c0_4, %c0_5], %6 {strides = array<i32>} : memref<512x1024xf32, #tpu.memory_space<vmem>>, vector<512x1024xf32>,
    return
  }
  func.func @transform_0(%arg0: i32, %arg1: i32) -> (i32, i32) {
    %c0_i32 = arith.constant 0 : i32
    return %arg0, %arg1 : i32, i32
  }
  func.func @transform_1(%arg0: i32, %arg1: i32) -> (i32, i32) {
    %c0_i32 = arith.constant 0 : i32
    return %arg0, %arg1 : i32, i32
  }
  func.func @transform_2(%arg0: i32, %arg1: i32) -> (i32, i32) {
    %c0_i32 = arith.constant 0 : i32
    return %arg0, %arg1 : i32, i32
  }
}

</mosaic_0001>

<bundles_post_ra>
// kernel: tpu_custom_call.1
= control target key start
LH: loop header
LB: loop body
LE: loop exit
PB: predicated region body
PF: predicated region fallthrough
CT: control target
= control target key end

     0   :  { %7 = vsyncpa [#allocation3], 0  ;;  %s5423_s0 = inlined_call_operand.hbm [shape: f32[1024,1024], index: 0, kind: input, shape index: {}]   ;;  %s5424_s1 = inlined_call_operand.hbm [shape: f32[1024,1024], index: 1, kind: input, shape index: {}]   ;;  %s5425_s2 = inlined_call_operand.hbm [shape: f32[1024,1024], index: 2, kind: output, shape index: {}]  }
   0x1   :  { %9 = vsyncpa [#allocation3 + $0x1], 0 }
   0x2   :  { %10 = vsyncpa [#allocation6], 0 }
   0x3   :  { %12 = vsyncpa [#allocation6 + $0x1], 0 }
   0x4   :  { %13 = vsyncpa [#allocation4], 0 }
   0x5   :  { %15 = vsyncpa [#allocation4 + $0x1], 0  ;;  %s3697_s9 = smov 0   ;;  %s3699_s10 = smov 0  }
   0x6   :  { %s3701_s11 = smov 0   ;;  %s3703_s12 = smov 0  }
   0x7   :  { %s3705_s13 = smov 0   ;;  %s3707_s14 = smov 0  }
   0x8 LB: > { %s3434_s15 = sadd.s32 4294967295, %s3673_s14   ;;  %s3435_s16 = sadd.s32 4294967294, %s3673_s14   ;;  %s3673_s14 = sphi %s3707_s14, %s21_s14   ;;  %s3669_s13 = sphi %s3705_s13, %s5436_s13   ;;  %s3665_s12 = sphi %s3703_s12, %s5435_s12   ;;  %s3661_s11 = sphi %s3701_s11, %s5434_s11   ;;  %s3657_s10 = sphi %s3699_s10, %s5433_s10   ;;  %s3653_s9 = sphi %s3697_s9, %s5432_s9  }
   0x9   : > { %s33_s17 = sadd.s32 1, %s3669_s13  ;;  %s42_s18 = sadd.s32 1, %s3661_s11 }
   0xa   : > { %p35_p0 = scmp.ge.s32.totalorder %s33_s17, 2  ;;  %p49_p1 = scmp.ne.s32.totalorder %s3661_s11, %s3657_s10 }
   0xb   : > { %p50_p2 = scmp.eq.s32.totalorder %s3673_s14, 0  ;;  %p55_p3 = scmp.ne.s32.totalorder %s3657_s10, %s3653_s9 }
   0xc   : > { %s5438_s17 = smov (%p35_p0, %s33_s17), 0  ;;  %p56_p5 = scmp.eq.s32.totalorder %s3434_s15, 0 }
   0xd   : > { %p3738_p4 = por %p50_p2, %p49_p1  ;;  %s37_s20 = ssub.s32 %s3669_s13, %s5438_s17 }
   0xe   : > { %p109_p6 = scmp.eq.s32.totalorder %s3434_s15, 1  ;;  %p40_p7 = scmp.eq.s32.totalorder %s37_s20, 0 }
   0xf   : > { %p3744_p8 = por %p56_p5, %p55_p3  ;;  %p115_p10 = scmp.eq.s32.totalorder %s3435_s16, 1 }
  0x10   : > { %p3748_p9 = por %p109_p6, %p49_p1  ;;  %p3437_p12 = scmp.ge.s32.totalorder %s3673_s14, 2 }
  0x11   : > { %s3753_s23 = scalar_select %p40_p7, %s3661_s11, %s42_s18  }
  0x12   : > { %p3755_p11 = por %p115_p10, %p55_p3  ;;  %p3479_p13 = scmp.lt.s32.totalorder %s3673_s14, 2 }
  0x13   : > { %s3762_s25 = sand.u32 1, %s3661_s11   ;;  %s3457_s27 = sshll.u32 %s3669_s13, 16 }
  0x14   : > { %s3438_s26 = sshll.u32 %s3762_s25, 12  ;;  %s148_s30 = scalar_lea.hbm %s5423_s0, %s3457_s27 }
  0x15   : > { %s139_s3 = scalar_lea.vmem [#allocation2], %s3438_s26  ;;  %p3775_p0 = pnand %p3479_p13, %p3738_p4 }
  0x16   : > { %s149_s4 = sshll.u32 %s139_s3, 4  ;;  %p3446_p1 = scmp.ge.s32.totalorder %s3673_s14, 1  ;;  %s150_s4 = int_to_ptr.vmem [resolvable:$true] %s149_s4 }
  0x17   : > { %s136_s6 = scalar_lea.sflag [#allocation3], %s3762_s25  ;;  %p3535_p2 = pneg %p3775_p0 }
  0x18   : > { %s3546_s7 = scalar_lea.vmem %s150_s4, 65536  ;;  %s3675_s8 = smov [#allocation2]  }
  0x19   : > { %p3547_p3 = scmp.ne.s32.totalorder %s150_s4, %s3546_s7  ;;  %s3551_s15 = sshll.u32 %s3675_s8, 4  ;;  %s3552_s15 = int_to_ptr.vmem [resolvable:$false] %s3551_s15 }
  0x1a   : > { %s3553_s16 = scalar_lea.vmem %s3552_s15, 131072  ;;  %p3554_p4 = scmp.lt.s32.totalorder %s150_s4, %s3552_s15 }
  0x1b   : > { %p3549_p5 = pnand %p3547_p3, %p3535_p2  ;;  %p3555_p7 = scmp.lt.s32.totalorder %s3553_s16, %s3546_s7 }
  0x1d   : > { %p3550_p6 = pneg %p3549_p5  ;;  %p3556_p10 = por %p3555_p7, %p3554_p4 }
  0x1f   : > { %p3557_p13 = pnand %p3556_p10, %p3550_p6 }
  0x21   : > { %3560 = shalt.err (!%p3557_p13)
}
  0x22   : > { %s3676_s18 = smov 1024   ;;  %s3677_s19 = smov 64  }
  0x23   : > { %3471 = dma.hbm_to_vmem [thread:$0]  (!%p3775_p0), %s148_s30, 65536, %s150_s4, %s136_s6, %s3676_s18, %s3676_s18, %s3677_s19  }
  0x24   : > { %p181_p3 = scmp.lt.s32.totalorder %s3673_s14, 3  ;;  %s172_s29 = scalar_lea.hbm %s5424_s1, %s3457_s27 }
  0x25   : > { %s163_s7 = scalar_lea.vmem [#allocation5], %s3438_s26  ;;  %s160_s15 = scalar_lea.sflag [#allocation6], %s3762_s25 }
  0x26   : > { %p3796_p5 = pnand %p3446_p1, %p181_p3  ;;  %s173_s8 = sshll.u32 %s163_s7, 4  ;;  %s174_s8 = int_to_ptr.vmem [resolvable:$true] %s173_s8 }
  0x27   : > { %s3574_s16 = scalar_lea.vmem %s174_s8, 65536  ;;  %s3678_s30 = smov [#allocation5]  }
  0x28   : > { %p3575_p6 = scmp.ne.s32.totalorder %s174_s8, %s3574_s16  ;;  %s3579_s4 = sshll.u32 %s3678_s30, 4  ;;  %s3580_s4 = int_to_ptr.vmem [resolvable:$false] %s3579_s4 }
  0x29   : > { %s3581_s27 = scalar_lea.vmem %s3580_s4, 131072  ;;  %p3582_p10 = scmp.lt.s32.totalorder %s174_s8, %s3580_s4 }
  0x2a   : > { %p3577_p4 = pnand %p3575_p6, %p3535_p2  ;;  %p3583_p1 = scmp.lt.s32.totalorder %s3581_s27, %s3574_s16 }
  0x2c   : > { %p3578_p7 = pneg %p3577_p4  ;;  %p3584_p13 = por %p3583_p1, %p3582_p10 }
  0x2e   : > { %p3585_p3 = pnand %p3584_p13, %p3578_p7 }
  0x30   : > { %3588 = shalt.err (!%p3585_p3)
}
  0x31   : > { %3474 = dma.hbm_to_vmem [thread:$0]  (!%p3775_p0), %s172_s29, 65536, %s174_s8, %s160_s15, %s3676_s18, %s3676_s18, %s3677_s19  }
  0x32   : > { %185 = sbr.rel (%p3796_p5) target bundleno = 591 (0x24f), region = 28  ;;  %s3811_s25 = sand.u32 (!%p3796_p5), 1, %s3657_s10  }
  0x33   : > { %s3447_s26 = sshll.u32 (!%p3796_p5), %s3811_s25, 12  ;;  %s188_s6 = scalar_lea.sflag (!%p3796_p5), [#allocation3], %s3811_s25 }
  0x34   : > { %s3815_s20 = scalar_lea.vmem (!%p3796_p5), [#allocation2], %s3447_s26 }
  0x37   : > { %3640 = dma.done.wait (%p3744_p8), %s188_s6, 65536  }
  0x38   : > { %3642 = vsyncadd (%p3744_p8), %s188_s6, 4294901760  ;;  %s197_s5 = scalar_lea.sflag [#allocation6], %s3811_s25  ;;  %s3822_s18 = scalar_lea.vmem [#allocation5], %s3447_s26 }
  0x39   : > { %3644 = dma.done.wait (%p3744_p8), %s197_s5, 65536  }
  0x3a   : > { %3646 = vsyncadd (%p3744_p8), %s197_s5, 4294901760  ;;  %v232_v0 = vld [vmem:[%s3815_s20] sm:$0xff]  ;;  %v233_v2 = vld [vmem:[%s3815_s20 + $0x8] sm:$0xff]  ;;  %s3838_s21 = scalar_lea.vmem [#allocation7], %s3447_s26  ;;  %s3461_s19 = sshll.u32 %s3665_s12, 16 }
  0x3b   : > { %v744_v1 = vld [vmem:[%s3822_s18] sm:$0xff]  ;;  %v1768_v3 = vmul.f32 0.1, %v232_v0  ;;  %v745_v4 = vld [vmem:[%s3822_s18 + $0x8] sm:$0xff]  ;;  %v1769_v5 = vmul.f32 0.1, %v233_v2  ;;  %s5370_s7 = scalar_lea.hbm %s5425_s2, %s3461_s19 }
  0x3c   : > { %vm1256_vm0 = vcmp.gt.f32.partialorder %v744_v1, 0.0  ;;  %vm1257_vm1 = vcmp.gt.f32.partialorder %v745_v4, 0.0  ;;  %v234_v6 = vld [vmem:[%s3815_s20 + $0x10] sm:$0xff]  ;;  %v235_v8 = vld [vmem:[%s3815_s20 + $0x18] sm:$0xff]  ;;  %v236_v13 = vld [vmem:[%s3815_s20 + $0x20] sm:$0xff]  ;;  %s3321_s28 = sshll.u32 %s3838_s21, 4  ;;  %s5372_s28 = int_to_ptr.vmem [resolvable:$true] %s3321_s28 }
  0x3d   : > { %v746_v7 = vld [vmem:[%s3822_s18 + $0x10] sm:$0xff]  ;;  %v2280_v9 = vsel %vm1256_vm0, %v232_v0, %v1768_v3  ;;  %v2281_v10 = vsel %vm1257_vm1, %v233_v2, %v1769_v5  ;;  %v1770_v11 = vmul.f32 0.1, %v234_v6  ;;  %v747_v12 = vld [vmem:[%s3822_s18 + $0x18] sm:$0xff]  ;;  %v748_v14 = vld [vmem:[%s3822_s18 + $0x20] sm:$0xff]  ;;  %s3305_s8 = scalar_lea.sflag [#allocation4], %s3811_s25 }
  0x3e   : > { %vm1258_vm2 = vcmp.gt.f32.partialorder %v746_v7, 0.0  ;;  %2792 = vst [vmem:[%s3838_s21] sm:$0xff] %v2280_v9  ;;  %2793 = vst [vmem:[%s3838_s21 + $0x8] sm:$0xff] %v2281_v10  ;;  %vm1259_vm3 = vcmp.gt.f32.partialorder %v747_v12, 0.0  ;;  %v1771_v15 = vmul.f32 0.1, %v235_v8  ;;  %vm1260_vm4 = vcmp.gt.f32.partialorder %v748_v14, 0.0 }
  0x3f   : > { %v1772_v16 = vmul.f32 0.1, %v236_v13  ;;  %v2282_v17 = vsel %vm1258_vm2, %v234_v6, %v1770_v11  ;;  %v237_v18 = vld [vmem:[%s3815_s20 + $0x28] sm:$0xff]  ;;  %v238_v20 = vld [vmem:[%s3815_s20 + $0x30] sm:$0xff]  ;;  %v239_v25 = vld [vmem:[%s3815_s20 + $0x38] sm:$0xff]  ;;  %s3589_s15 = scalar_lea.vmem %s5372_s28, 65536 }
  0x40   : > { %v749_v19 = vld [vmem:[%s3822_s18 + $0x28] sm:$0xff]  ;;  %2794 = vst [vmem:[%s3838_s21 + $0x10] sm:$0xff] %v2282_v17  ;;  %v2283_v21 = vsel %vm1259_vm3, %v235_v8, %v1771_v15  ;;  %v1773_v23 = vmul.f32 0.1, %v237_v18  ;;  %v750_v24 = vld [vmem:[%s3822_s18 + $0x30] sm:$0xff]  ;;  %v751_v26 = vld [vmem:[%s3822_s18 + $0x38] sm:$0xff]  ;;  %p3590_p8 = scmp.ne.s32.totalorder %s5372_s28, %s3589_s15 }
  0x41   : > { %v2284_v22 = vsel %vm1260_vm4, %v236_v13, %v1772_v16  ;;  %vm1261_vm5 = vcmp.gt.f32.partialorder %v749_v19, 0.0  ;;  %2795 = vst [vmem:[%s3838_s21 + $0x18] sm:$0xff] %v2283_v21  ;;  %vm1262_vm6 = vcmp.gt.f32.partialorder %v750_v24, 0.0  ;;  %v1774_v27 = vmul.f32 0.1, %v238_v20  ;;  %v240_v30 = vld [vmem:[%s3815_s20 + $0x40] sm:$0xff] }
  0x42   : > { %2796 = vst [vmem:[%s3838_s21 + $0x20] sm:$0xff] %v2284_v22  ;;  %vm1263_vm7 = vcmp.gt.f32.partialorder %v751_v26, 0.0  ;;  %v1775_v28 = vmul.f32 0.1, %v239_v25  ;;  %v2285_v29 = vsel %vm1261_vm5, %v237_v18, %v1773_v23  ;;  %v752_v31 = vld [vmem:[%s3822_s18 + $0x40] sm:$0xff]  ;;  %v241_v32 = vld [vmem:[%s3815_s20 + $0x48] sm:$0xff]  ;;  %p3591_p0 = pnand %p3590_p8, %p3748_p9 }
  0x43   : > { %2797 = vst [vmem:[%s3838_s21 + $0x28] sm:$0xff] %v2285_v29  ;;  %v2286_v33 = vsel %vm1262_vm6, %v238_v20, %v1774_v27  ;;  %vm1264_vm8 = vcmp.gt.f32.partialorder %v752_v31, 0.0  ;;  %v1776_v35 = vmul.f32 0.1, %v240_v30  ;;  %v753_v36 = vld [vmem:[%s3822_s18 + $0x48] sm:$0xff]  ;;  %v242_v37 = vld [vmem:[%s3815_s20 + $0x50] sm:$0xff] }
  0x44   : > { %v2287_v34 = vsel %vm1263_vm7, %v239_v25, %v1775_v28  ;;  %v754_v38 = vld [vmem:[%s3822_s18 + $0x50] sm:$0xff]  ;;  %2798 = vst [vmem:[%s3838_s21 + $0x30] sm:$0xff] %v2286_v33  ;;  %vm1265_vm9 = vcmp.gt.f32.partialorder %v753_v36, 0.0  ;;  %v1777_v39 = vmul.f32 0.1, %v241_v32  ;;  %v243_v42 = vld [vmem:[%s3815_s20 + $0x58] sm:$0xff]  ;;  %p3592_p2 = pneg %p3591_p0 }
  0x45   : > { %2799 = vst [vmem:[%s3838_s21 + $0x38] sm:$0xff] %v2287_v34  ;;  %vm1266_vm10 = vcmp.gt.f32.partialorder %v754_v38, 0.0  ;;  %v1778_v40 = vmul.f32 0.1, %v242_v37  ;;  %v2288_v41 = vsel %vm1264_vm8, %v240_v30, %v1776_v35  ;;  %v755_v43 = vld [vmem:[%s3822_s18 + $0x58] sm:$0xff]  ;;  %v244_v44 = vld [vmem:[%s3815_s20 + $0x60] sm:$0xff] }
  0x46   : > { %2800 = vst [vmem:[%s3838_s21 + $0x40] sm:$0xff] %v2288_v41  ;;  %v2289_v45 = vsel %vm1265_vm9, %v241_v32, %v1777_v39  ;;  %vm1267_vm11 = vcmp.gt.f32.partialorder %v755_v43, 0.0  ;;  %v1779_v47 = vmul.f32 0.1, %v243_v42  ;;  %v756_v48 = vld [vmem:[%s3822_s18 + $0x60] sm:$0xff]  ;;  %v245_v49 = vld [vmem:[%s3815_s20 + $0x68] sm:$0xff] }
  0x47   : > { %v2290_v46 = vsel %vm1266_vm10, %v242_v37, %v1778_v40  ;;  %v757_v50 = vld [vmem:[%s3822_s18 + $0x68] sm:$0xff]  ;;  %2801 = vst [vmem:[%s3838_s21 + $0x48] sm:$0xff] %v2289_v45  ;;  %vm1268_vm12 = vcmp.gt.f32.partialorder %v756_v48, 0.0  ;;  %v1780_v51 = vmul.f32 0.1, %v244_v44  ;;  %v246_v54 = vld [vmem:[%s3815_s20 + $0x70] sm:$0xff] }
  0x48   : > { %2802 = vst [vmem:[%s3838_s21 + $0x50] sm:$0xff] %v2290_v46  ;;  %vm1269_vm13 = vcmp.gt.f32.partialorder %v757_v50, 0.0  ;;  %v1781_v52 = vmul.f32 0.1, %v245_v49  ;;  %v2291_v53 = vsel %vm1267_vm11, %v243_v42, %v1779_v47  ;;  %v758_v55 = vld [vmem:[%s3822_s18 + $0x70] sm:$0xff]  ;;  %v247_v56 = vld [vmem:[%s3815_s20 + $0x78] sm:$0xff] }
  0x49   : > { %2803 = vst [vmem:[%s3838_s21 + $0x58] sm:$0xff] %v2291_v53  ;;  %v2292_v57 = vsel %vm1268_vm12, %v244_v44, %v1780_v51  ;;  %vm1270_vm14 = vcmp.gt.f32.partialorder %v758_v55, 0.0  ;;  %v1782_v59 = vmul.f32 0.1, %v246_v54  ;;  %v759_v60 = vld [vmem:[%s3822_s18 + $0x78] sm:$0xff]  ;;  %v248_v61 = vld [vmem:[%s3815_s20 + $0x80] sm:$0xff] }
  0x4a   : > { %v2293_v58 = vsel %vm1269_vm13, %v245_v49, %v1781_v52  ;;  %v760_v62 = vld [vmem:[%s3822_s18 + $0x80] sm:$0xff]  ;;  %2804 = vst [vmem:[%s3838_s21 + $0x60] sm:$0xff] %v2292_v57  ;;  %vm1271_vm15 = vcmp.gt.f32.partialorder %v759_v60, 0.0  ;;  %v1783_v63 = vmul.f32 0.1, %v247_v56  ;;  %v249_v2 = vld [vmem:[%s3815_s20 + $0x88] sm:$0xff] }
  0x4b   : > { %2805 = vst [vmem:[%s3838_s21 + $0x68] sm:$0xff] %v2293_v58  ;;  %vm1272_vm0 = vcmp.gt.f32.partialorder %v760_v62, 0.0  ;;  %v1784_v0 = vmul.f32 0.1, %v248_v61  ;;  %v2294_v1 = vsel %vm1270_vm14, %v246_v54, %v1782_v59  ;;  %v761_v3 = vld [vmem:[%s3822_s18 + $0x88] sm:$0xff]  ;;  %v250_v4 = vld [vmem:[%s3815_s20 + $0x90] sm:$0xff] }
  0x4c   : > { %2806 = vst [vmem:[%s3838_s21 + $0x70] sm:$0xff] %v2294_v1  ;;  %v2295_v5 = vsel %vm1271_vm15, %v247_v56, %v1783_v63  ;;  %vm1273_vm1 = vcmp.gt.f32.partialorder %v761_v3, 0.0  ;;  %v1785_v7 = vmul.f32 0.1, %v249_v2  ;;  %v762_v8 = vld [vmem:[%s3822_s18 + $0x90] sm:$0xff]  ;;  %v251_v9 = vld [vmem:[%s3815_s20 + $0x98] sm:$0xff] }
  0x4d   : > { %v2296_v6 = vsel %vm1272_vm0, %v248_v61, %v1784_v0  ;;  %v763_v10 = vld [vmem:[%s3822_s18 + $0x98] sm:$0xff]  ;;  %2807 = vst [vmem:[%s3838_s21 + $0x78] sm:$0xff] %v2295_v5  ;;  %vm1274_vm2 = vcmp.gt.f32.partialorder %v762_v8, 0.0  ;;  %v1786_v11 = vmul.f32 0.1, %v250_v4  ;;  %v252_v14 = vld [vmem:[%s3815_s20 + $0xa0] sm:$0xff] }
  0x4e   : > { %2808 = vst [vmem:[%s3838_s21 + $0x80] sm:$0xff] %v2296_v6  ;;  %vm1275_vm3 = vcmp.gt.f32.partialorder %v763_v10, 0.0  ;;  %v1787_v12 = vmul.f32 0.1, %v251_v9  ;;  %v2297_v13 = vsel %vm1273_vm1, %v249_v2, %v1785_v7  ;;  %v764_v15 = vld [vmem:[%s3822_s18 + $0xa0] sm:$0xff]  ;;  %v253_v16 = vld [vmem:[%s3815_s20 + $0xa8] sm:$0xff] }
  0x4f   : > { %2809 = vst [vmem:[%s3838_s21 + $0x88] sm:$0xff] %v2297_v13  ;;  %v2298_v17 = vsel %vm1274_vm2, %v250_v4, %v1786_v11  ;;  %vm1276_vm4 = vcmp.gt.f32.partialorder %v764_v15, 0.0  ;;  %v1788_v19 = vmul.f32 0.1, %v252_v14  ;;  %v765_v20 = vld [vmem:[%s3822_s18 + $0xa8] sm:$0xff]  ;;  %v254_v21 = vld [vmem:[%s3815_s20 + $0xb0] sm:$0xff] }
  0x50   : > { %v2299_v18 = vsel %vm1275_vm3, %v251_v9, %v1787_v12  ;;  %v766_v22 = vld [vmem:[%s3822_s18 + $0xb0] sm:$0xff]  ;;  %2810 = vst [vmem:[%s3838_s21 + $0x90] sm:$0xff] %v2298_v17  ;;  %vm1277_vm5 = vcmp.gt.f32.partialorder %v765_v20, 0.0  ;;  %v1789_v23 = vmul.f32 0.1, %v253_v16  ;;  %v255_v26 = vld [vmem:[%s3815_s20 + $0xb8] sm:$0xff] }
  0x51   : > { %2811 = vst [vmem:[%s3838_s21 + $0x98] sm:$0xff] %v2299_v18  ;;  %vm1278_vm6 = vcmp.gt.f32.partialorder %v766_v22, 0.0  ;;  %v1790_v24 = vmul.f32 0.1, %v254_v21  ;;  %v2300_v25 = vsel %vm1276_vm4, %v252_v14, %v1788_v19  ;;  %v767_v27 = vld [vmem:[%s3822_s18 + $0xb8] sm:$0xff]  ;;  %v256_v28 = vld [vmem:[%s3815_s20 + $0xc0] sm:$0xff] }
  0x52   : > { %2812 = vst [vmem:[%s3838_s21 + $0xa0] sm:$0xff] %v2300_v25  ;;  %v2301_v29 = vsel %vm1277_vm5, %v253_v16, %v1789_v23  ;;  %vm1279_vm7 = vcmp.gt.f32.partialorder %v767_v27, 0.0  ;;  %v1791_v31 = vmul.f32 0.1, %v255_v26  ;;  %v768_v32 = vld [vmem:[%s3822_s18 + $0xc0] sm:$0xff]  ;;  %v257_v33 = vld [vmem:[%s3815_s20 + $0xc8] sm:$0xff] }
  0x53   : > { %v2302_v30 = vsel %vm1278_vm6, %v254_v21, %v1790_v24  ;;  %v769_v34 = vld [vmem:[%s3822_s18 + $0xc8] sm:$0xff]  ;;  %2813 = vst [vmem:[%s3838_s21 + $0xa8] sm:$0xff] %v2301_v29  ;;  %vm1280_vm8 = vcmp.gt.f32.partialorder %v768_v32, 0.0  ;;  %v1792_v35 = vmul.f32 0.1, %v256_v28  ;;  %v258_v38 = vld [vmem:[%s3815_s20 + $0xd0] sm:$0xff] }
  0x54   : > { %2814 = vst [vmem:[%s3838_s21 + $0xb0] sm:$0xff] %v2302_v30  ;;  %vm1281_vm9 = vcmp.gt.f32.partialorder %v769_v34, 0.0  ;;  %v1793_v36 = vmul.f32 0.1, %v257_v33  ;;  %v2303_v37 = vsel %vm1279_vm7, %v255_v26, %v1791_v31  ;;  %v770_v39 = vld [vmem:[%s3822_s18 + $0xd0] sm:$0xff]  ;;  %v259_v40 = vld [vmem:[%s3815_s20 + $0xd8] sm:$0xff] }
  0x55   : > { %2815 = vst [vmem:[%s3838_s21 + $0xb8] sm:$0xff] %v2303_v37  ;;  %v2304_v41 = vsel %vm1280_vm8, %v256_v28, %v1792_v35  ;;  %vm1282_vm10 = vcmp.gt.f32.partialorder %v770_v39, 0.0  ;;  %v1794_v43 = vmul.f32 0.1, %v258_v38  ;;  %v771_v44 = vld [vmem:[%s3822_s18 + $0xd8] sm:$0xff]  ;;  %v260_v45 = vld [vmem:[%s3815_s20 + $0xe0] sm:$0xff] }
  0x56   : > { %v2305_v42 = vsel %vm1281_vm9, %v257_v33, %v1793_v36  ;;  %v772_v46 = vld [vmem:[%s3822_s18 + $0xe0] sm:$0xff]  ;;  %2816 = vst [vmem:[%s3838_s21 + $0xc0] sm:$0xff] %v2304_v41  ;;  %vm1283_vm11 = vcmp.gt.f32.partialorder %v771_v44, 0.0  ;;  %v1795_v47 = vmul.f32 0.1, %v259_v40  ;;  %v261_v50 = vld [vmem:[%s3815_s20 + $0xe8] sm:$0xff] }
  0x57   : > { %2817 = vst [vmem:[%s3838_s21 + $0xc8] sm:$0xff] %v2305_v42  ;;  %vm1284_vm12 = vcmp.gt.f32.partialorder %v772_v46, 0.0  ;;  %v1796_v48 = vmul.f32 0.1, %v260_v45  ;;  %v2306_v49 = vsel %vm1282_vm10, %v258_v38, %v1794_v43  ;;  %v773_v51 = vld [vmem:[%s3822_s18 + $0xe8] sm:$0xff]  ;;  %v262_v52 = vld [vmem:[%s3815_s20 + $0xf0] sm:$0xff] }
  0x58   : > { %2818 = vst [vmem:[%s3838_s21 + $0xd0] sm:$0xff] %v2306_v49  ;;  %v2307_v53 = vsel %vm1283_vm11, %v259_v40, %v1795_v47  ;;  %vm1285_vm13 = vcmp.gt.f32.partialorder %v773_v51, 0.0  ;;  %v1797_v55 = vmul.f32 0.1, %v261_v50  ;;  %v774_v56 = vld [vmem:[%s3822_s18 + $0xf0] sm:$0xff]  ;;  %v263_v57 = vld [vmem:[%s3815_s20 + $0xf8] sm:$0xff] }
  0x59   : > { %v2308_v54 = vsel %vm1284_vm12, %v260_v45, %v1796_v48  ;;  %v775_v58 = vld [vmem:[%s3822_s18 + $0xf8] sm:$0xff]  ;;  %2819 = vst [vmem:[%s3838_s21 + $0xd8] sm:$0xff] %v2307_v53  ;;  %vm1286_vm14 = vcmp.gt.f32.partialorder %v774_v56, 0.0  ;;  %v1798_v59 = vmul.f32 0.1, %v262_v52  ;;  %v264_v62 = vld [vmem:[%s3815_s20 + $0x100] sm:$0xff] }
  0x5a   : > { %2820 = vst [vmem:[%s3838_s21 + $0xe0] sm:$0xff] %v2308_v54  ;;  %vm1287_vm15 = vcmp.gt.f32.partialorder %v775_v58, 0.0  ;;  %v1799_v60 = vmul.f32 0.1, %v263_v57  ;;  %v2309_v61 = vsel %vm1285_vm13, %v261_v50, %v1797_v55  ;;  %v776_v63 = vld [vmem:[%s3822_s18 + $0x100] sm:$0xff]  ;;  %v265_v0 = vld [vmem:[%s3815_s20 + $0x108] sm:$0xff] }
  0x5b   : > { %2821 = vst [vmem:[%s3838_s21 + $0xe8] sm:$0xff] %v2309_v61  ;;  %v2310_v1 = vsel %vm1286_vm14, %v262_v52, %v1798_v59  ;;  %vm1288_vm0 = vcmp.gt.f32.partialorder %v776_v63, 0.0  ;;  %v1800_v3 = vmul.f32 0.1, %v264_v62  ;;  %v777_v4 = vld [vmem:[%s3822_s18 + $0x108] sm:$0xff]  ;;  %v266_v5 = vld [vmem:[%s3815_s20 + $0x110] sm:$0xff] }
  0x5c   : > { %v2311_v2 = vsel %vm1287_vm15, %v263_v57, %v1799_v60  ;;  %v778_v6 = vld [vmem:[%s3822_s18 + $0x110] sm:$0xff]  ;;  %2822 = vst [vmem:[%s3838_s21 + $0xf0] sm:$0xff] %v2310_v1  ;;  %vm1289_vm1 = vcmp.gt.f32.partialorder %v777_v4, 0.0  ;;  %v1801_v7 = vmul.f32 0.1, %v265_v0  ;;  %v267_v10 = vld [vmem:[%s3815_s20 + $0x118] sm:$0xff] }
  0x5d   : > { %2823 = vst [vmem:[%s3838_s21 + $0xf8] sm:$0xff] %v2311_v2  ;;  %vm1290_vm2 = vcmp.gt.f32.partialorder %v778_v6, 0.0  ;;  %v1802_v8 = vmul.f32 0.1, %v266_v5  ;;  %v2312_v9 = vsel %vm1288_vm0, %v264_v62, %v1800_v3  ;;  %v779_v11 = vld [vmem:[%s3822_s18 + $0x118] sm:$0xff]  ;;  %v268_v12 = vld [vmem:[%s3815_s20 + $0x120] sm:$0xff] }
  0x5e   : > { %2824 = vst [vmem:[%s3838_s21 + $0x100] sm:$0xff] %v2312_v9  ;;  %v2313_v13 = vsel %vm1289_vm1, %v265_v0, %v1801_v7  ;;  %vm1291_vm3 = vcmp.gt.f32.partialorder %v779_v11, 0.0  ;;  %v1803_v15 = vmul.f32 0.1, %v267_v10  ;;  %v780_v16 = vld [vmem:[%s3822_s18 + $0x120] sm:$0xff]  ;;  %v269_v17 = vld [vmem:[%s3815_s20 + $0x128] sm:$0xff] }
  0x5f   : > { %v2314_v14 = vsel %vm1290_vm2, %v266_v5, %v1802_v8  ;;  %v781_v18 = vld [vmem:[%s3822_s18 + $0x128] sm:$0xff]  ;;  %2825 = vst [vmem:[%s3838_s21 + $0x108] sm:$0xff] %v2313_v13  ;;  %vm1292_vm4 = vcmp.gt.f32.partialorder %v780_v16, 0.0  ;;  %v1804_v19 = vmul.f32 0.1, %v268_v12  ;;  %v270_v22 = vld [vmem:[%s3815_s20 + $0x130] sm:$0xff] }
  0x60   : > { %2826 = vst [vmem:[%s3838_s21 + $0x110] sm:$0xff] %v2314_v14  ;;  %vm1293_vm5 = vcmp.gt.f32.partialorder %v781_v18, 0.0  ;;  %v1805_v20 = vmul.f32 0.1, %v269_v17  ;;  %v2315_v21 = vsel %vm1291_vm3, %v267_v10, %v1803_v15  ;;  %v782_v23 = vld [vmem:[%s3822_s18 + $0x130] sm:$0xff]  ;;  %v271_v24 = vld [vmem:[%s3815_s20 + $0x138] sm:$0xff] }
  0x61   : > { %2827 = vst [vmem:[%s3838_s21 + $0x118] sm:$0xff] %v2315_v21  ;;  %v2316_v25 = vsel %vm1292_vm4, %v268_v12, %v1804_v19  ;;  %vm1294_vm6 = vcmp.gt.f32.partialorder %v782_v23, 0.0  ;;  %v1806_v27 = vmul.f32 0.1, %v270_v22  ;;  %v783_v28 = vld [vmem:[%s3822_s18 + $0x138] sm:$0xff]  ;;  %v272_v29 = vld [vmem:[%s3815_s20 + $0x140] sm:$0xff] }
  0x62   : > { %v2317_v26 = vsel %vm1293_vm5, %v269_v17, %v1805_v20  ;;  %v784_v30 = vld [vmem:[%s3822_s18 + $0x140] sm:$0xff]  ;;  %2828 = vst [vmem:[%s3838_s21 + $0x120] sm:$0xff] %v2316_v25  ;;  %vm1295_vm7 = vcmp.gt.f32.partialorder %v783_v28, 0.0  ;;  %v1807_v31 = vmul.f32 0.1, %v271_v24  ;;  %v273_v34 = vld [vmem:[%s3815_s20 + $0x148] sm:$0xff] }
  0x63   : > { %2829 = vst [vmem:[%s3838_s21 + $0x128] sm:$0xff] %v2317_v26  ;;  %vm1296_vm8 = vcmp.gt.f32.partialorder %v784_v30, 0.0  ;;  %v1808_v32 = vmul.f32 0.1, %v272_v29  ;;  %v2318_v33 = vsel %vm1294_vm6, %v270_v22, %v1806_v27  ;;  %v785_v35 = vld [vmem:[%s3822_s18 + $0x148] sm:$0xff]  ;;  %v274_v36 = vld [vmem:[%s3815_s20 + $0x150] sm:$0xff] }
  0x64   : > { %2830 = vst [vmem:[%s3838_s21 + $0x130] sm:$0xff] %v2318_v33  ;;  %v2319_v37 = vsel %vm1295_vm7, %v271_v24, %v1807_v31  ;;  %vm1297_vm9 = vcmp.gt.f32.partialorder %v785_v35, 0.0  ;;  %v1809_v39 = vmul.f32 0.1, %v273_v34  ;;  %v786_v40 = vld [vmem:[%s3822_s18 + $0x150] sm:$0xff]  ;;  %v275_v41 = vld [vmem:[%s3815_s20 + $0x158] sm:$0xff] }
  0x65   : > { %v2320_v38 = vsel %vm1296_vm8, %v272_v29, %v1808_v32  ;;  %v787_v42 = vld [vmem:[%s3822_s18 + $0x158] sm:$0xff]  ;;  %2831 = vst [vmem:[%s3838_s21 + $0x138] sm:$0xff] %v2319_v37  ;;  %vm1298_vm10 = vcmp.gt.f32.partialorder %v786_v40, 0.0  ;;  %v1810_v43 = vmul.f32 0.1, %v274_v36  ;;  %v276_v46 = vld [vmem:[%s3815_s20 + $0x160] sm:$0xff] }
  0x66   : > { %2832 = vst [vmem:[%s3838_s21 + $0x140] sm:$0xff] %v2320_v38  ;;  %vm1299_vm11 = vcmp.gt.f32.partialorder %v787_v42, 0.0  ;;  %v1811_v44 = vmul.f32 0.1, %v275_v41  ;;  %v2321_v45 = vsel %vm1297_vm9, %v273_v34, %v1809_v39  ;;  %v788_v47 = vld [vmem:[%s3822_s18 + $0x160] sm:$0xff]  ;;  %v277_v48 = vld [vmem:[%s3815_s20 + $0x168] sm:$0xff] }
  0x67   : > { %2833 = vst [vmem:[%s3838_s21 + $0x148] sm:$0xff] %v2321_v45  ;;  %v2322_v49 = vsel %vm1298_vm10, %v274_v36, %v1810_v43  ;;  %vm1300_vm12 = vcmp.gt.f32.partialorder %v788_v47, 0.0  ;;  %v1812_v51 = vmul.f32 0.1, %v276_v46  ;;  %v789_v52 = vld [vmem:[%s3822_s18 + $0x168] sm:$0xff]  ;;  %v278_v53 = vld [vmem:[%s3815_s20 + $0x170] sm:$0xff] }
  0x68   : > { %v2323_v50 = vsel %vm1299_vm11, %v275_v41, %v1811_v44  ;;  %v790_v54 = vld [vmem:[%s3822_s18 + $0x170] sm:$0xff]  ;;  %2834 = vst [vmem:[%s3838_s21 + $0x150] sm:$0xff] %v2322_v49  ;;  %vm1301_vm13 = vcmp.gt.f32.partialorder %v789_v52, 0.0  ;;  %v1813_v55 = vmul.f32 0.1, %v277_v48  ;;  %v279_v58 = vld [vmem:[%s3815_s20 + $0x178] sm:$0xff] }
  0x69   : > { %2835 = vst [vmem:[%s3838_s21 + $0x158] sm:$0xff] %v2323_v50  ;;  %vm1302_vm14 = vcmp.gt.f32.partialorder %v790_v54, 0.0  ;;  %v1814_v56 = vmul.f32 0.1, %v278_v53  ;;  %v2324_v57 = vsel %vm1300_vm12, %v276_v46, %v1812_v51  ;;  %v791_v59 = vld [vmem:[%s3822_s18 + $0x178] sm:$0xff]  ;;  %v280_v60 = vld [vmem:[%s3815_s20 + $0x180] sm:$0xff] }
  0x6a   : > { %2836 = vst [vmem:[%s3838_s21 + $0x160] sm:$0xff] %v2324_v57  ;;  %v2325_v61 = vsel %vm1301_vm13, %v277_v48, %v1813_v55  ;;  %vm1303_vm15 = vcmp.gt.f32.partialorder %v791_v59, 0.0  ;;  %v1815_v63 = vmul.f32 0.1, %v279_v58  ;;  %v792_v0 = vld [vmem:[%s3822_s18 + $0x180] sm:$0xff]  ;;  %v281_v1 = vld [vmem:[%s3815_s20 + $0x188] sm:$0xff] }
  0x6b   : > { %v2326_v62 = vsel %vm1302_vm14, %v278_v53, %v1814_v56  ;;  %v793_v2 = vld [vmem:[%s3822_s18 + $0x188] sm:$0xff]  ;;  %2837 = vst [vmem:[%s3838_s21 + $0x168] sm:$0xff] %v2325_v61  ;;  %vm1304_vm0 = vcmp.gt.f32.partialorder %v792_v0, 0.0  ;;  %v1816_v3 = vmul.f32 0.1, %v280_v60  ;;  %v282_v6 = vld [vmem:[%s3815_s20 + $0x190] sm:$0xff] }
  0x6c   : > { %2838 = vst [vmem:[%s3838_s21 + $0x170] sm:$0xff] %v2326_v62  ;;  %vm1305_vm1 = vcmp.gt.f32.partialorder %v793_v2, 0.0  ;;  %v1817_v4 = vmul.f32 0.1, %v281_v1  ;;  %v2327_v5 = vsel %vm1303_vm15, %v279_v58, %v1815_v63  ;;  %v794_v7 = vld [vmem:[%s3822_s18 + $0x190] sm:$0xff]  ;;  %v283_v8 = vld [vmem:[%s3815_s20 + $0x198] sm:$0xff] }
  0x6d   : > { %2839 = vst [vmem:[%s3838_s21 + $0x178] sm:$0xff] %v2327_v5  ;;  %v2328_v9 = vsel %vm1304_vm0, %v280_v60, %v1816_v3  ;;  %vm1306_vm2 = vcmp.gt.f32.partialorder %v794_v7, 0.0  ;;  %v1818_v11 = vmul.f32 0.1, %v282_v6  ;;  %v795_v12 = vld [vmem:[%s3822_s18 + $0x198] sm:$0xff]  ;;  %v284_v13 = vld [vmem:[%s3815_s20 + $0x1a0] sm:$0xff] }
  0x6e   : > { %v2329_v10 = vsel %vm1305_vm1, %v281_v1, %v1817_v4  ;;  %v796_v14 = vld [vmem:[%s3822_s18 + $0x1a0] sm:$0xff]  ;;  %2840 = vst [vmem:[%s3838_s21 + $0x180] sm:$0xff] %v2328_v9  ;;  %vm1307_vm3 = vcmp.gt.f32.partialorder %v795_v12, 0.0  ;;  %v1819_v15 = vmul.f32 0.1, %v283_v8  ;;  %v285_v18 = vld [vmem:[%s3815_s20 + $0x1a8] sm:$0xff] }
  0x6f   : > { %2841 = vst [vmem:[%s3838_s21 + $0x188] sm:$0xff] %v2329_v10  ;;  %vm1308_vm4 = vcmp.gt.f32.partialorder %v796_v14, 0.0  ;;  %v1820_v16 = vmul.f32 0.1, %v284_v13  ;;  %v2330_v17 = vsel %vm1306_vm2, %v282_v6, %v1818_v11  ;;  %v797_v19 = vld [vmem:[%s3822_s18 + $0x1a8] sm:$0xff]  ;;  %v286_v20 = vld [vmem:[%s3815_s20 + $0x1b0] sm:$0xff] }
  0x70   : > { %2842 = vst [vmem:[%s3838_s21 + $0x190] sm:$0xff] %v2330_v17  ;;  %v2331_v21 = vsel %vm1307_vm3, %v283_v8, %v1819_v15  ;;  %vm1309_vm5 = vcmp.gt.f32.partialorder %v797_v19, 0.0  ;;  %v1821_v23 = vmul.f32 0.1, %v285_v18  ;;  %v798_v24 = vld [vmem:[%s3822_s18 + $0x1b0] sm:$0xff]  ;;  %v287_v25 = vld [vmem:[%s3815_s20 + $0x1b8] sm:$0xff] }
  0x71   : > { %v2332_v22 = vsel %vm1308_vm4, %v284_v13, %v1820_v16  ;;  %v799_v26 = vld [vmem:[%s3822_s18 + $0x1b8] sm:$0xff]  ;;  %2843 = vst [vmem:[%s3838_s21 + $0x198] sm:$0xff] %v2331_v21  ;;  %vm1310_vm6 = vcmp.gt.f32.partialorder %v798_v24, 0.0  ;;  %v1822_v27 = vmul.f32 0.1, %v286_v20  ;;  %v288_v30 = vld [vmem:[%s3815_s20 + $0x1c0] sm:$0xff] }
  0x72   : > { %2844 = vst [vmem:[%s3838_s21 + $0x1a0] sm:$0xff] %v2332_v22  ;;  %vm1311_vm7 = vcmp.gt.f32.partialorder %v799_v26, 0.0  ;;  %v1823_v28 = vmul.f32 0.1, %v287_v25  ;;  %v2333_v29 = vsel %vm1309_vm5, %v285_v18, %v1821_v23  ;;  %v800_v31 = vld [vmem:[%s3822_s18 + $0x1c0] sm:$0xff]  ;;  %v289_v32 = vld [vmem:[%s3815_s20 + $0x1c8] sm:$0xff] }
  0x73   : > { %2845 = vst [vmem:[%s3838_s21 + $0x1a8] sm:$0xff] %v2333_v29  ;;  %v2334_v33 = vsel %vm1310_vm6, %v286_v20, %v1822_v27  ;;  %vm1312_vm8 = vcmp.gt.f32.partialorder %v800_v31, 0.0  ;;  %v1824_v35 = vmul.f32 0.1, %v288_v30  ;;  %v801_v36 = vld [vmem:[%s3822_s18 + $0x1c8] sm:$0xff]  ;;  %v290_v37 = vld [vmem:[%s3815_s20 + $0x1d0] sm:$0xff] }
  0x74   : > { %v2335_v34 = vsel %vm1311_vm7, %v287_v25, %v1823_v28  ;;  %v802_v38 = vld [vmem:[%s3822_s18 + $0x1d0] sm:$0xff]  ;;  %2846 = vst [vmem:[%s3838_s21 + $0x1b0] sm:$0xff] %v2334_v33  ;;  %vm1313_vm9 = vcmp.gt.f32.partialorder %v801_v36, 0.0  ;;  %v1825_v39 = vmul.f32 0.1, %v289_v32  ;;  %v291_v42 = vld [vmem:[%s3815_s20 + $0x1d8] sm:$0xff] }
  0x75   : > { %2847 = vst [vmem:[%s3838_s21 + $0x1b8] sm:$0xff] %v2335_v34  ;;  %vm1314_vm10 = vcmp.gt.f32.partialorder %v802_v38, 0.0  ;;  %v1826_v40 = vmul.f32 0.1, %v290_v37  ;;  %v2336_v41 = vsel %vm1312_vm8, %v288_v30, %v1824_v35  ;;  %v803_v43 = vld [vmem:[%s3822_s18 + $0x1d8] sm:$0xff]  ;;  %v292_v44 = vld [vmem:[%s3815_s20 + $0x1e0] sm:$0xff] }
  0x76   : > { %2848 = vst [vmem:[%s3838_s21 + $0x1c0] sm:$0xff] %v2336_v41  ;;  %v2337_v45 = vsel %vm1313_vm9, %v289_v32, %v1825_v39  ;;  %vm1315_vm11 = vcmp.gt.f32.partialorder %v803_v43, 0.0  ;;  %v1827_v47 = vmul.f32 0.1, %v291_v42  ;;  %v804_v48 = vld [vmem:[%s3822_s18 + $0x1e0] sm:$0xff]  ;;  %v293_v49 = vld [vmem:[%s3815_s20 + $0x1e8] sm:$0xff] }
  0x77   : > { %v2338_v46 = vsel %vm1314_vm10, %v290_v37, %v1826_v40  ;;  %v805_v50 = vld [vmem:[%s3822_s18 + $0x1e8] sm:$0xff]  ;;  %2849 = vst [vmem:[%s3838_s21 + $0x1c8] sm:$0xff] %v2337_v45  ;;  %vm1316_vm12 = vcmp.gt.f32.partialorder %v804_v48, 0.0  ;;  %v1828_v51 = vmul.f32 0.1, %v292_v44  ;;  %v294_v54 = vld [vmem:[%s3815_s20 + $0x1f0] sm:$0xff] }
  0x78   : > { %2850 = vst [vmem:[%s3838_s21 + $0x1d0] sm:$0xff] %v2338_v46  ;;  %vm1317_vm13 = vcmp.gt.f32.partialorder %v805_v50, 0.0  ;;  %v1829_v52 = vmul.f32 0.1, %v293_v49  ;;  %v2339_v53 = vsel %vm1315_vm11, %v291_v42, %v1827_v47  ;;  %v806_v55 = vld [vmem:[%s3822_s18 + $0x1f0] sm:$0xff]  ;;  %v295_v56 = vld [vmem:[%s3815_s20 + $0x1f8] sm:$0xff] }
  0x79   : > { %2851 = vst [vmem:[%s3838_s21 + $0x1d8] sm:$0xff] %v2339_v53  ;;  %v2340_v57 = vsel %vm1316_vm12, %v292_v44, %v1828_v51  ;;  %vm1318_vm14 = vcmp.gt.f32.partialorder %v806_v55, 0.0  ;;  %v1830_v59 = vmul.f32 0.1, %v294_v54  ;;  %v807_v60 = vld [vmem:[%s3822_s18 + $0x1f8] sm:$0xff]  ;;  %v296_v61 = vld [vmem:[%s3815_s20 + $0x200] sm:$0xff] }
  0x7a   : > { %v2341_v58 = vsel %vm1317_vm13, %v293_v49, %v1829_v52  ;;  %v808_v62 = vld [vmem:[%s3822_s18 + $0x200] sm:$0xff]  ;;  %2852 = vst [vmem:[%s3838_s21 + $0x1e0] sm:$0xff] %v2340_v57  ;;  %vm1319_vm15 = vcmp.gt.f32.partialorder %v807_v60, 0.0  ;;  %v1831_v63 = vmul.f32 0.1, %v295_v56  ;;  %v297_v2 = vld [vmem:[%s3815_s20 + $0x208] sm:$0xff] }
  0x7b   : > { %2853 = vst [vmem:[%s3838_s21 + $0x1e8] sm:$0xff] %v2341_v58  ;;  %vm1320_vm0 = vcmp.gt.f32.partialorder %v808_v62, 0.0  ;;  %v1832_v0 = vmul.f32 0.1, %v296_v61  ;;  %v2342_v1 = vsel %vm1318_vm14, %v294_v54, %v1830_v59  ;;  %v809_v3 = vld [vmem:[%s3822_s18 + $0x208] sm:$0xff]  ;;  %v298_v4 = vld [vmem:[%s3815_s20 + $0x210] sm:$0xff] }
  0x7c   : > { %2854 = vst [vmem:[%s3838_s21 + $0x1f0] sm:$0xff] %v2342_v1  ;;  %v2343_v5 = vsel %vm1319_vm15, %v295_v56, %v1831_v63  ;;  %vm1321_vm1 = vcmp.gt.f32.partialorder %v809_v3, 0.0  ;;  %v1833_v7 = vmul.f32 0.1, %v297_v2  ;;  %v810_v8 = vld [vmem:[%s3822_s18 + $0x210] sm:$0xff]  ;;  %v299_v9 = vld [vmem:[%s3815_s20 + $0x218] sm:$0xff] }
  0x7d   : > { %v2344_v6 = vsel %vm1320_vm0, %v296_v61, %v1832_v0  ;;  %v811_v10 = vld [vmem:[%s3822_s18 + $0x218] sm:$0xff]  ;;  %2855 = vst [vmem:[%s3838_s21 + $0x1f8] sm:$0xff] %v2343_v5  ;;  %vm1322_vm2 = vcmp.gt.f32.partialorder %v810_v8, 0.0  ;;  %v1834_v11 = vmul.f32 0.1, %v298_v4  ;;  %v300_v14 = vld [vmem:[%s3815_s20 + $0x220] sm:$0xff] }
  0x7e   : > { %2856 = vst [vmem:[%s3838_s21 + $0x200] sm:$0xff] %v2344_v6  ;;  %vm1323_vm3 = vcmp.gt.f32.partialorder %v811_v10, 0.0  ;;  %v1835_v12 = vmul.f32 0.1, %v299_v9  ;;  %v2345_v13 = vsel %vm1321_vm1, %v297_v2, %v1833_v7  ;;  %v812_v15 = vld [vmem:[%s3822_s18 + $0x220] sm:$0xff]  ;;  %v301_v16 = vld [vmem:[%s3815_s20 + $0x228] sm:$0xff] }
  0x7f   : > { %2857 = vst [vmem:[%s3838_s21 + $0x208] sm:$0xff] %v2345_v13  ;;  %v2346_v17 = vsel %vm1322_vm2, %v298_v4, %v1834_v11  ;;  %vm1324_vm4 = vcmp.gt.f32.partialorder %v812_v15, 0.0  ;;  %v1836_v19 = vmul.f32 0.1, %v300_v14  ;;  %v813_v20 = vld [vmem:[%s3822_s18 + $0x228] sm:$0xff]  ;;  %v302_v21 = vld [vmem:[%s3815_s20 + $0x230] sm:$0xff] }
  0x80   : > { %v2347_v18 = vsel %vm1323_vm3, %v299_v9, %v1835_v12  ;;  %v814_v22 = vld [vmem:[%s3822_s18 + $0x230] sm:$0xff]  ;;  %2858 = vst [vmem:[%s3838_s21 + $0x210] sm:$0xff] %v2346_v17  ;;  %vm1325_vm5 = vcmp.gt.f32.partialorder %v813_v20, 0.0  ;;  %v1837_v23 = vmul.f32 0.1, %v301_v16  ;;  %v303_v26 = vld [vmem:[%s3815_s20 + $0x238] sm:$0xff] }
  0x81   : > { %2859 = vst [vmem:[%s3838_s21 + $0x218] sm:$0xff] %v2347_v18  ;;  %vm1326_vm6 = vcmp.gt.f32.partialorder %v814_v22, 0.0  ;;  %v1838_v24 = vmul.f32 0.1, %v302_v21  ;;  %v2348_v25 = vsel %vm1324_vm4, %v300_v14, %v1836_v19  ;;  %v815_v27 = vld [vmem:[%s3822_s18 + $0x238] sm:$0xff]  ;;  %v304_v28 = vld [vmem:[%s3815_s20 + $0x240] sm:$0xff] }
  0x82   : > { %2860 = vst [vmem:[%s3838_s21 + $0x220] sm:$0xff] %v2348_v25  ;;  %v2349_v29 = vsel %vm1325_vm5, %v301_v16, %v1837_v23  ;;  %vm1327_vm7 = vcmp.gt.f32.partialorder %v815_v27, 0.0  ;;  %v1839_v31 = vmul.f32 0.1, %v303_v26  ;;  %v816_v32 = vld [vmem:[%s3822_s18 + $0x240] sm:$0xff]  ;;  %v305_v33 = vld [vmem:[%s3815_s20 + $0x248] sm:$0xff] }
  0x83   : > { %v2350_v30 = vsel %vm1326_vm6, %v302_v21, %v1838_v24  ;;  %v817_v34 = vld [vmem:[%s3822_s18 + $0x248] sm:$0xff]  ;;  %2861 = vst [vmem:[%s3838_s21 + $0x228] sm:$0xff] %v2349_v29  ;;  %vm1328_vm8 = vcmp.gt.f32.partialorder %v816_v32, 0.0  ;;  %v1840_v35 = vmul.f32 0.1, %v304_v28  ;;  %v306_v38 = vld [vmem:[%s3815_s20 + $0x250] sm:$0xff] }
  0x84   : > { %2862 = vst [vmem:[%s3838_s21 + $0x230] sm:$0xff] %v2350_v30  ;;  %vm1329_vm9 = vcmp.gt.f32.partialorder %v817_v34, 0.0  ;;  %v1841_v36 = vmul.f32 0.1, %v305_v33  ;;  %v2351_v37 = vsel %vm1327_vm7, %v303_v26, %v1839_v31  ;;  %v818_v39 = vld [vmem:[%s3822_s18 + $0x250] sm:$0xff]  ;;  %v307_v40 = vld [vmem:[%s3815_s20 + $0x258] sm:$0xff] }
  0x85   : > { %2863 = vst [vmem:[%s3838_s21 + $0x238] sm:$0xff] %v2351_v37  ;;  %v2352_v41 = vsel %vm1328_vm8, %v304_v28, %v1840_v35  ;;  %vm1330_vm10 = vcmp.gt.f32.partialorder %v818_v39, 0.0  ;;  %v1842_v43 = vmul.f32 0.1, %v306_v38  ;;  %v819_v44 = vld [vmem:[%s3822_s18 + $0x258] sm:$0xff]  ;;  %v308_v45 = vld [vmem:[%s3815_s20 + $0x260] sm:$0xff] }
  0x86   : > { %v2353_v42 = vsel %vm1329_vm9, %v305_v33, %v1841_v36  ;;  %v820_v46 = vld [vmem:[%s3822_s18 + $0x260] sm:$0xff]  ;;  %2864 = vst [vmem:[%s3838_s21 + $0x240] sm:$0xff] %v2352_v41  ;;  %vm1331_vm11 = vcmp.gt.f32.partialorder %v819_v44, 0.0  ;;  %v1843_v47 = vmul.f32 0.1, %v307_v40  ;;  %v309_v50 = vld [vmem:[%s3815_s20 + $0x268] sm:$0xff] }
  0x87   : > { %2865 = vst [vmem:[%s3838_s21 + $0x248] sm:$0xff] %v2353_v42  ;;  %vm1332_vm12 = vcmp.gt.f32.partialorder %v820_v46, 0.0  ;;  %v1844_v48 = vmul.f32 0.1, %v308_v45  ;;  %v2354_v49 = vsel %vm1330_vm10, %v306_v38, %v1842_v43  ;;  %v821_v51 = vld [vmem:[%s3822_s18 + $0x268] sm:$0xff]  ;;  %v310_v52 = vld [vmem:[%s3815_s20 + $0x270] sm:$0xff] }
  0x88   : > { %2866 = vst [vmem:[%s3838_s21 + $0x250] sm:$0xff] %v2354_v49  ;;  %v2355_v53 = vsel %vm1331_vm11, %v307_v40, %v1843_v47  ;;  %vm1333_vm13 = vcmp.gt.f32.partialorder %v821_v51, 0.0  ;;  %v1845_v55 = vmul.f32 0.1, %v309_v50  ;;  %v822_v56 = vld [vmem:[%s3822_s18 + $0x270] sm:$0xff]  ;;  %v311_v57 = vld [vmem:[%s3815_s20 + $0x278] sm:$0xff] }
  0x89   : > { %v2356_v54 = vsel %vm1332_vm12, %v308_v45, %v1844_v48  ;;  %v823_v58 = vld [vmem:[%s3822_s18 + $0x278] sm:$0xff]  ;;  %2867 = vst [vmem:[%s3838_s21 + $0x258] sm:$0xff] %v2355_v53  ;;  %vm1334_vm14 = vcmp.gt.f32.partialorder %v822_v56, 0.0  ;;  %v1846_v59 = vmul.f32 0.1, %v310_v52  ;;  %v312_v62 = vld [vmem:[%s3815_s20 + $0x280] sm:$0xff] }
  0x8a   : > { %2868 = vst [vmem:[%s3838_s21 + $0x260] sm:$0xff] %v2356_v54  ;;  %vm1335_vm15 = vcmp.gt.f32.partialorder %v823_v58, 0.0  ;;  %v1847_v60 = vmul.f32 0.1, %v311_v57  ;;  %v2357_v61 = vsel %vm1333_vm13, %v309_v50, %v1845_v55  ;;  %v824_v63 = vld [vmem:[%s3822_s18 + $0x280] sm:$0xff]  ;;  %v313_v0 = vld [vmem:[%s3815_s20 + $0x288] sm:$0xff] }
  0x8b   : > { %2869 = vst [vmem:[%s3838_s21 + $0x268] sm:$0xff] %v2357_v61  ;;  %v2358_v1 = vsel %vm1334_vm14, %v310_v52, %v1846_v59  ;;  %vm1336_vm0 = vcmp.gt.f32.partialorder %v824_v63, 0.0  ;;  %v1848_v3 = vmul.f32 0.1, %v312_v62  ;;  %v825_v4 = vld [vmem:[%s3822_s18 + $0x288] sm:$0xff]  ;;  %v314_v5 = vld [vmem:[%s3815_s20 + $0x290] sm:$0xff] }
  0x8c   : > { %v2359_v2 = vsel %vm1335_vm15, %v311_v57, %v1847_v60  ;;  %v826_v6 = vld [vmem:[%s3822_s18 + $0x290] sm:$0xff]  ;;  %2870 = vst [vmem:[%s3838_s21 + $0x270] sm:$0xff] %v2358_v1  ;;  %vm1337_vm1 = vcmp.gt.f32.partialorder %v825_v4, 0.0  ;;  %v1849_v7 = vmul.f32 0.1, %v313_v0  ;;  %v315_v10 = vld [vmem:[%s3815_s20 + $0x298] sm:$0xff] }
  0x8d   : > { %2871 = vst [vmem:[%s3838_s21 + $0x278] sm:$0xff] %v2359_v2  ;;  %vm1338_vm2 = vcmp.gt.f32.partialorder %v826_v6, 0.0  ;;  %v1850_v8 = vmul.f32 0.1, %v314_v5  ;;  %v2360_v9 = vsel %vm1336_vm0, %v312_v62, %v1848_v3  ;;  %v827_v11 = vld [vmem:[%s3822_s18 + $0x298] sm:$0xff]  ;;  %v316_v12 = vld [vmem:[%s3815_s20 + $0x2a0] sm:$0xff] }
  0x8e   : > { %2872 = vst [vmem:[%s3838_s21 + $0x280] sm:$0xff] %v2360_v9  ;;  %v2361_v13 = vsel %vm1337_vm1, %v313_v0, %v1849_v7  ;;  %vm1339_vm3 = vcmp.gt.f32.partialorder %v827_v11, 0.0  ;;  %v1851_v15 = vmul.f32 0.1, %v315_v10  ;;  %v828_v16 = vld [vmem:[%s3822_s18 + $0x2a0] sm:$0xff]  ;;  %v317_v17 = vld [vmem:[%s3815_s20 + $0x2a8] sm:$0xff] }
  0x8f   : > { %v2362_v14 = vsel %vm1338_vm2, %v314_v5, %v1850_v8  ;;  %v829_v18 = vld [vmem:[%s3822_s18 + $0x2a8] sm:$0xff]  ;;  %2873 = vst [vmem:[%s3838_s21 + $0x288] sm:$0xff] %v2361_v13  ;;  %vm1340_vm4 = vcmp.gt.f32.partialorder %v828_v16, 0.0  ;;  %v1852_v19 = vmul.f32 0.1, %v316_v12  ;;  %v318_v22 = vld [vmem:[%s3815_s20 + $0x2b0] sm:$0xff] }
  0x90   : > { %2874 = vst [vmem:[%s3838_s21 + $0x290] sm:$0xff] %v2362_v14  ;;  %vm1341_vm5 = vcmp.gt.f32.partialorder %v829_v18, 0.0  ;;  %v1853_v20 = vmul.f32 0.1, %v317_v17  ;;  %v2363_v21 = vsel %vm1339_vm3, %v315_v10, %v1851_v15  ;;  %v830_v23 = vld [vmem:[%s3822_s18 + $0x2b0] sm:$0xff]  ;;  %v319_v24 = vld [vmem:[%s3815_s20 + $0x2b8] sm:$0xff] }
  0x91   : > { %2875 = vst [vmem:[%s3838_s21 + $0x298] sm:$0xff] %v2363_v21  ;;  %v2364_v25 = vsel %vm1340_vm4, %v316_v12, %v1852_v19  ;;  %vm1342_vm6 = vcmp.gt.f32.partialorder %v830_v23, 0.0  ;;  %v1854_v27 = vmul.f32 0.1, %v318_v22  ;;  %v831_v28 = vld [vmem:[%s3822_s18 + $0x2b8] sm:$0xff]  ;;  %v320_v29 = vld [vmem:[%s3815_s20 + $0x2c0] sm:$0xff] }
  0x92   : > { %v2365_v26 = vsel %vm1341_vm5, %v317_v17, %v1853_v20  ;;  %v832_v30 = vld [vmem:[%s3822_s18 + $0x2c0] sm:$0xff]  ;;  %2876 = vst [vmem:[%s3838_s21 + $0x2a0] sm:$0xff] %v2364_v25  ;;  %vm1343_vm7 = vcmp.gt.f32.partialorder %v831_v28, 0.0  ;;  %v1855_v31 = vmul.f32 0.1, %v319_v24  ;;  %v321_v34 = vld [vmem:[%s3815_s20 + $0x2c8] sm:$0xff] }
  0x93   : > { %2877 = vst [vmem:[%s3838_s21 + $0x2a8] sm:$0xff] %v2365_v26  ;;  %vm1344_vm8 = vcmp.gt.f32.partialorder %v832_v30, 0.0  ;;  %v1856_v32 = vmul.f32 0.1, %v320_v29  ;;  %v2366_v33 = vsel %vm1342_vm6, %v318_v22, %v1854_v27  ;;  %v833_v35 = vld [vmem:[%s3822_s18 + $0x2c8] sm:$0xff]  ;;  %v322_v36 = vld [vmem:[%s3815_s20 + $0x2d0] sm:$0xff] }
  0x94   : > { %2878 = vst [vmem:[%s3838_s21 + $0x2b0] sm:$0xff] %v2366_v33  ;;  %v2367_v37 = vsel %vm1343_vm7, %v319_v24, %v1855_v31  ;;  %vm1345_vm9 = vcmp.gt.f32.partialorder %v833_v35, 0.0  ;;  %v1857_v39 = vmul.f32 0.1, %v321_v34  ;;  %v834_v40 = vld [vmem:[%s3822_s18 + $0x2d0] sm:$0xff]  ;;  %v323_v41 = vld [vmem:[%s3815_s20 + $0x2d8] sm:$0xff] }
  0x95   : > { %v2368_v38 = vsel %vm1344_vm8, %v320_v29, %v1856_v32  ;;  %v835_v42 = vld [vmem:[%s3822_s18 + $0x2d8] sm:$0xff]  ;;  %2879 = vst [vmem:[%s3838_s21 + $0x2b8] sm:$0xff] %v2367_v37  ;;  %vm1346_vm10 = vcmp.gt.f32.partialorder %v834_v40, 0.0  ;;  %v1858_v43 = vmul.f32 0.1, %v322_v36  ;;  %v324_v46 = vld [vmem:[%s3815_s20 + $0x2e0] sm:$0xff] }
  0x96   : > { %2880 = vst [vmem:[%s3838_s21 + $0x2c0] sm:$0xff] %v2368_v38  ;;  %vm1347_vm11 = vcmp.gt.f32.partialorder %v835_v42, 0.0  ;;  %v1859_v44 = vmul.f32 0.1, %v323_v41  ;;  %v2369_v45 = vsel %vm1345_vm9, %v321_v34, %v1857_v39  ;;  %v836_v47 = vld [vmem:[%s3822_s18 + $0x2e0] sm:$0xff]  ;;  %v325_v48 = vld [vmem:[%s3815_s20 + $0x2e8] sm:$0xff] }
  0x97   : > { %2881 = vst [vmem:[%s3838_s21 + $0x2c8] sm:$0xff] %v2369_v45  ;;  %v2370_v49 = vsel %vm1346_vm10, %v322_v36, %v1858_v43  ;;  %vm1348_vm12 = vcmp.gt.f32.partialorder %v836_v47, 0.0  ;;  %v1860_v51 = vmul.f32 0.1, %v324_v46  ;;  %v837_v52 = vld [vmem:[%s3822_s18 + $0x2e8] sm:$0xff]  ;;  %v326_v53 = vld [vmem:[%s3815_s20 + $0x2f0] sm:$0xff] }
  0x98   : > { %v2371_v50 = vsel %vm1347_vm11, %v323_v41, %v1859_v44  ;;  %v838_v54 = vld [vmem:[%s3822_s18 + $0x2f0] sm:$0xff]  ;;  %2882 = vst [vmem:[%s3838_s21 + $0x2d0] sm:$0xff] %v2370_v49  ;;  %vm1349_vm13 = vcmp.gt.f32.partialorder %v837_v52, 0.0  ;;  %v1861_v55 = vmul.f32 0.1, %v325_v48  ;;  %v327_v58 = vld [vmem:[%s3815_s20 + $0x2f8] sm:$0xff] }
  0x99   : > { %2883 = vst [vmem:[%s3838_s21 + $0x2d8] sm:$0xff] %v2371_v50  ;;  %vm1350_vm14 = vcmp.gt.f32.partialorder %v838_v54, 0.0  ;;  %v1862_v56 = vmul.f32 0.1, %v326_v53  ;;  %v2372_v57 = vsel %vm1348_vm12, %v324_v46, %v1860_v51  ;;  %v839_v59 = vld [vmem:[%s3822_s18 + $0x2f8] sm:$0xff]  ;;  %v328_v60 = vld [vmem:[%s3815_s20 + $0x300] sm:$0xff] }
  0x9a   : > { %2884 = vst [vmem:[%s3838_s21 + $0x2e0] sm:$0xff] %v2372_v57  ;;  %v2373_v61 = vsel %vm1349_vm13, %v325_v48, %v1861_v55  ;;  %vm1351_vm15 = vcmp.gt.f32.partialorder %v839_v59, 0.0  ;;  %v1863_v63 = vmul.f32 0.1, %v327_v58  ;;  %v840_v0 = vld [vmem:[%s3822_s18 + $0x300] sm:$0xff]  ;;  %v329_v1 = vld [vmem:[%s3815_s20 + $0x308] sm:$0xff] }
  0x9b   : > { %v2374_v62 = vsel %vm1350_vm14, %v326_v53, %v1862_v56  ;;  %v841_v2 = vld [vmem:[%s3822_s18 + $0x308] sm:$0xff]  ;;  %2885 = vst [vmem:[%s3838_s21 + $0x2e8] sm:$0xff] %v2373_v61  ;;  %vm1352_vm0 = vcmp.gt.f32.partialorder %v840_v0, 0.0  ;;  %v1864_v3 = vmul.f32 0.1, %v328_v60  ;;  %v330_v6 = vld [vmem:[%s3815_s20 + $0x310] sm:$0xff] }
  0x9c   : > { %2886 = vst [vmem:[%s3838_s21 + $0x2f0] sm:$0xff] %v2374_v62  ;;  %vm1353_vm1 = vcmp.gt.f32.partialorder %v841_v2, 0.0  ;;  %v1865_v4 = vmul.f32 0.1, %v329_v1  ;;  %v2375_v5 = vsel %vm1351_vm15, %v327_v58, %v1863_v63  ;;  %v842_v7 = vld [vmem:[%s3822_s18 + $0x310] sm:$0xff]  ;;  %v331_v8 = vld [vmem:[%s3815_s20 + $0x318] sm:$0xff] }
  0x9d   : > { %2887 = vst [vmem:[%s3838_s21 + $0x2f8] sm:$0xff] %v2375_v5  ;;  %v2376_v9 = vsel %vm1352_vm0, %v328_v60, %v1864_v3  ;;  %vm1354_vm2 = vcmp.gt.f32.partialorder %v842_v7, 0.0  ;;  %v1866_v11 = vmul.f32 0.1, %v330_v6  ;;  %v843_v12 = vld [vmem:[%s3822_s18 + $0x318] sm:$0xff]  ;;  %v332_v13 = vld [vmem:[%s3815_s20 + $0x320] sm:$0xff] }
  0x9e   : > { %v2377_v10 = vsel %vm1353_vm1, %v329_v1, %v1865_v4  ;;  %v844_v14 = vld [vmem:[%s3822_s18 + $0x320] sm:$0xff]  ;;  %2888 = vst [vmem:[%s3838_s21 + $0x300] sm:$0xff] %v2376_v9  ;;  %vm1355_vm3 = vcmp.gt.f32.partialorder %v843_v12, 0.0  ;;  %v1867_v15 = vmul.f32 0.1, %v331_v8  ;;  %v333_v18 = vld [vmem:[%s3815_s20 + $0x328] sm:$0xff] }
  0x9f   : > { %2889 = vst [vmem:[%s3838_s21 + $0x308] sm:$0xff] %v2377_v10  ;;  %vm1356_vm4 = vcmp.gt.f32.partialorder %v844_v14, 0.0  ;;  %v1868_v16 = vmul.f32 0.1, %v332_v13  ;;  %v2378_v17 = vsel %vm1354_vm2, %v330_v6, %v1866_v11  ;;  %v845_v19 = vld [vmem:[%s3822_s18 + $0x328] sm:$0xff]  ;;  %v334_v20 = vld [vmem:[%s3815_s20 + $0x330] sm:$0xff] }
  0xa0   : > { %2890 = vst [vmem:[%s3838_s21 + $0x310] sm:$0xff] %v2378_v17  ;;  %v2379_v21 = vsel %vm1355_vm3, %v331_v8, %v1867_v15  ;;  %vm1357_vm5 = vcmp.gt.f32.partialorder %v845_v19, 0.0  ;;  %v1869_v23 = vmul.f32 0.1, %v333_v18  ;;  %v846_v24 = vld [vmem:[%s3822_s18 + $0x330] sm:$0xff]  ;;  %v335_v25 = vld [vmem:[%s3815_s20 + $0x338] sm:$0xff] }
  0xa1   : > { %v2380_v22 = vsel %vm1356_vm4, %v332_v13, %v1868_v16  ;;  %v847_v26 = vld [vmem:[%s3822_s18 + $0x338] sm:$0xff]  ;;  %2891 = vst [vmem:[%s3838_s21 + $0x318] sm:$0xff] %v2379_v21  ;;  %vm1358_vm6 = vcmp.gt.f32.partialorder %v846_v24, 0.0  ;;  %v1870_v27 = vmul.f32 0.1, %v334_v20  ;;  %v336_v30 = vld [vmem:[%s3815_s20 + $0x340] sm:$0xff] }
  0xa2   : > { %2892 = vst [vmem:[%s3838_s21 + $0x320] sm:$0xff] %v2380_v22  ;;  %vm1359_vm7 = vcmp.gt.f32.partialorder %v847_v26, 0.0  ;;  %v1871_v28 = vmul.f32 0.1, %v335_v25  ;;  %v2381_v29 = vsel %vm1357_vm5, %v333_v18, %v1869_v23  ;;  %v848_v31 = vld [vmem:[%s3822_s18 + $0x340] sm:$0xff]  ;;  %v337_v32 = vld [vmem:[%s3815_s20 + $0x348] sm:$0xff] }
  0xa3   : > { %2893 = vst [vmem:[%s3838_s21 + $0x328] sm:$0xff] %v2381_v29  ;;  %v2382_v33 = vsel %vm1358_vm6, %v334_v20, %v1870_v27  ;;  %vm1360_vm8 = vcmp.gt.f32.partialorder %v848_v31, 0.0  ;;  %v1872_v35 = vmul.f32 0.1, %v336_v30  ;;  %v849_v36 = vld [vmem:[%s3822_s18 + $0x348] sm:$0xff]  ;;  %v338_v37 = vld [vmem:[%s3815_s20 + $0x350] sm:$0xff] }
  0xa4   : > { %v2383_v34 = vsel %vm1359_vm7, %v335_v25, %v1871_v28  ;;  %v850_v38 = vld [vmem:[%s3822_s18 + $0x350] sm:$0xff]  ;;  %2894 = vst [vmem:[%s3838_s21 + $0x330] sm:$0xff] %v2382_v33  ;;  %vm1361_vm9 = vcmp.gt.f32.partialorder %v849_v36, 0.0  ;;  %v1873_v39 = vmul.f32 0.1, %v337_v32  ;;  %v339_v42 = vld [vmem:[%s3815_s20 + $0x358] sm:$0xff] }
  0xa5   : > { %2895 = vst [vmem:[%s3838_s21 + $0x338] sm:$0xff] %v2383_v34  ;;  %vm1362_vm10 = vcmp.gt.f32.partialorder %v850_v38, 0.0  ;;  %v1874_v40 = vmul.f32 0.1, %v338_v37  ;;  %v2384_v41 = vsel %vm1360_vm8, %v336_v30, %v1872_v35  ;;  %v851_v43 = vld [vmem:[%s3822_s18 + $0x358] sm:$0xff]  ;;  %v340_v44 = vld [vmem:[%s3815_s20 + $0x360] sm:$0xff] }
  0xa6   : > { %2896 = vst [vmem:[%s3838_s21 + $0x340] sm:$0xff] %v2384_v41  ;;  %v2385_v45 = vsel %vm1361_vm9, %v337_v32, %v1873_v39  ;;  %vm1363_vm11 = vcmp.gt.f32.partialorder %v851_v43, 0.0  ;;  %v1875_v47 = vmul.f32 0.1, %v339_v42  ;;  %v852_v48 = vld [vmem:[%s3822_s18 + $0x360] sm:$0xff]  ;;  %v341_v49 = vld [vmem:[%s3815_s20 + $0x368] sm:$0xff] }
  0xa7   : > { %v2386_v46 = vsel %vm1362_vm10, %v338_v37, %v1874_v40  ;;  %v853_v50 = vld [vmem:[%s3822_s18 + $0x368] sm:$0xff]  ;;  %2897 = vst [vmem:[%s3838_s21 + $0x348] sm:$0xff] %v2385_v45  ;;  %vm1364_vm12 = vcmp.gt.f32.partialorder %v852_v48, 0.0  ;;  %v1876_v51 = vmul.f32 0.1, %v340_v44  ;;  %v342_v54 = vld [vmem:[%s3815_s20 + $0x370] sm:$0xff] }
  0xa8   : > { %2898 = vst [vmem:[%s3838_s21 + $0x350] sm:$0xff] %v2386_v46  ;;  %vm1365_vm13 = vcmp.gt.f32.partialorder %v853_v50, 0.0  ;;  %v1877_v52 = vmul.f32 0.1, %v341_v49  ;;  %v2387_v53 = vsel %vm1363_vm11, %v339_v42, %v1875_v47  ;;  %v854_v55 = vld [vmem:[%s3822_s18 + $0x370] sm:$0xff]  ;;  %v343_v56 = vld [vmem:[%s3815_s20 + $0x378] sm:$0xff] }
  0xa9   : > { %2899 = vst [vmem:[%s3838_s21 + $0x358] sm:$0xff] %v2387_v53  ;;  %v2388_v57 = vsel %vm1364_vm12, %v340_v44, %v1876_v51  ;;  %vm1366_vm14 = vcmp.gt.f32.partialorder %v854_v55, 0.0  ;;  %v1878_v59 = vmul.f32 0.1, %v342_v54  ;;  %v855_v60 = vld [vmem:[%s3822_s18 + $0x378] sm:$0xff]  ;;  %v344_v61 = vld [vmem:[%s3815_s20 + $0x380] sm:$0xff] }
  0xaa   : > { %v2389_v58 = vsel %vm1365_vm13, %v341_v49, %v1877_v52  ;;  %v856_v62 = vld [vmem:[%s3822_s18 + $0x380] sm:$0xff]  ;;  %2900 = vst [vmem:[%s3838_s21 + $0x360] sm:$0xff] %v2388_v57  ;;  %vm1367_vm15 = vcmp.gt.f32.partialorder %v855_v60, 0.0  ;;  %v1879_v63 = vmul.f32 0.1, %v343_v56  ;;  %v345_v2 = vld [vmem:[%s3815_s20 + $0x388] sm:$0xff] }
  0xab   : > { %2901 = vst [vmem:[%s3838_s21 + $0x368] sm:$0xff] %v2389_v58  ;;  %vm1368_vm0 = vcmp.gt.f32.partialorder %v856_v62, 0.0  ;;  %v1880_v0 = vmul.f32 0.1, %v344_v61  ;;  %v2390_v1 = vsel %vm1366_vm14, %v342_v54, %v1878_v59  ;;  %v857_v3 = vld [vmem:[%s3822_s18 + $0x388] sm:$0xff]  ;;  %v346_v4 = vld [vmem:[%s3815_s20 + $0x390] sm:$0xff] }
  0xac   : > { %2902 = vst [vmem:[%s3838_s21 + $0x370] sm:$0xff] %v2390_v1  ;;  %v2391_v5 = vsel %vm1367_vm15, %v343_v56, %v1879_v63  ;;  %vm1369_vm1 = vcmp.gt.f32.partialorder %v857_v3, 0.0  ;;  %v1881_v7 = vmul.f32 0.1, %v345_v2  ;;  %v858_v8 = vld [vmem:[%s3822_s18 + $0x390] sm:$0xff]  ;;  %v347_v9 = vld [vmem:[%s3815_s20 + $0x398] sm:$0xff] }
  0xad   : > { %v2392_v6 = vsel %vm1368_vm0, %v344_v61, %v1880_v0  ;;  %v859_v10 = vld [vmem:[%s3822_s18 + $0x398] sm:$0xff]  ;;  %2903 = vst [vmem:[%s3838_s21 + $0x378] sm:$0xff] %v2391_v5  ;;  %vm1370_vm2 = vcmp.gt.f32.partialorder %v858_v8, 0.0  ;;  %v1882_v11 = vmul.f32 0.1, %v346_v4  ;;  %v348_v14 = vld [vmem:[%s3815_s20 + $0x3a0] sm:$0xff] }
  0xae   : > { %2904 = vst [vmem:[%s3838_s21 + $0x380] sm:$0xff] %v2392_v6  ;;  %vm1371_vm3 = vcmp.gt.f32.partialorder %v859_v10, 0.0  ;;  %v1883_v12 = vmul.f32 0.1, %v347_v9  ;;  %v2393_v13 = vsel %vm1369_vm1, %v345_v2, %v1881_v7  ;;  %v860_v15 = vld [vmem:[%s3822_s18 + $0x3a0] sm:$0xff]  ;;  %v349_v16 = vld [vmem:[%s3815_s20 + $0x3a8] sm:$0xff] }
  0xaf   : > { %2905 = vst [vmem:[%s3838_s21 + $0x388] sm:$0xff] %v2393_v13  ;;  %v2394_v17 = vsel %vm1370_vm2, %v346_v4, %v1882_v11  ;;  %vm1372_vm4 = vcmp.gt.f32.partialorder %v860_v15, 0.0  ;;  %v1884_v19 = vmul.f32 0.1, %v348_v14  ;;  %v861_v20 = vld [vmem:[%s3822_s18 + $0x3a8] sm:$0xff]  ;;  %v350_v21 = vld [vmem:[%s3815_s20 + $0x3b0] sm:$0xff] }
  0xb0   : > { %v2395_v18 = vsel %vm1371_vm3, %v347_v9, %v1883_v12  ;;  %v862_v22 = vld [vmem:[%s3822_s18 + $0x3b0] sm:$0xff]  ;;  %2906 = vst [vmem:[%s3838_s21 + $0x390] sm:$0xff] %v2394_v17  ;;  %vm1373_vm5 = vcmp.gt.f32.partialorder %v861_v20, 0.0  ;;  %v1885_v23 = vmul.f32 0.1, %v349_v16  ;;  %v351_v26 = vld [vmem:[%s3815_s20 + $0x3b8] sm:$0xff] }
  0xb1   : > { %2907 = vst [vmem:[%s3838_s21 + $0x398] sm:$0xff] %v2395_v18  ;;  %vm1374_vm6 = vcmp.gt.f32.partialorder %v862_v22, 0.0  ;;  %v1886_v24 = vmul.f32 0.1, %v350_v21  ;;  %v2396_v25 = vsel %vm1372_vm4, %v348_v14, %v1884_v19  ;;  %v863_v27 = vld [vmem:[%s3822_s18 + $0x3b8] sm:$0xff]  ;;  %v352_v28 = vld [vmem:[%s3815_s20 + $0x3c0] sm:$0xff] }
  0xb2   : > { %2908 = vst [vmem:[%s3838_s21 + $0x3a0] sm:$0xff] %v2396_v25  ;;  %v2397_v29 = vsel %vm1373_vm5, %v349_v16, %v1885_v23  ;;  %vm1375_vm7 = vcmp.gt.f32.partialorder %v863_v27, 0.0  ;;  %v1887_v31 = vmul.f32 0.1, %v351_v26  ;;  %v864_v32 = vld [vmem:[%s3822_s18 + $0x3c0] sm:$0xff]  ;;  %v353_v33 = vld [vmem:[%s3815_s20 + $0x3c8] sm:$0xff] }
  0xb3   : > { %v2398_v30 = vsel %vm1374_vm6, %v350_v21, %v1886_v24  ;;  %v865_v34 = vld [vmem:[%s3822_s18 + $0x3c8] sm:$0xff]  ;;  %2909 = vst [vmem:[%s3838_s21 + $0x3a8] sm:$0xff] %v2397_v29  ;;  %vm1376_vm8 = vcmp.gt.f32.partialorder %v864_v32, 0.0  ;;  %v1888_v35 = vmul.f32 0.1, %v352_v28  ;;  %v354_v38 = vld [vmem:[%s3815_s20 + $0x3d0] sm:$0xff] }
  0xb4   : > { %2910 = vst [vmem:[%s3838_s21 + $0x3b0] sm:$0xff] %v2398_v30  ;;  %vm1377_vm9 = vcmp.gt.f32.partialorder %v865_v34, 0.0  ;;  %v1889_v36 = vmul.f32 0.1, %v353_v33  ;;  %v2399_v37 = vsel %vm1375_vm7, %v351_v26, %v1887_v31  ;;  %v866_v39 = vld [vmem:[%s3822_s18 + $0x3d0] sm:$0xff]  ;;  %v355_v40 = vld [vmem:[%s3815_s20 + $0x3d8] sm:$0xff] }
  0xb5   : > { %2911 = vst [vmem:[%s3838_s21 + $0x3b8] sm:$0xff] %v2399_v37  ;;  %v2400_v41 = vsel %vm1376_vm8, %v352_v28, %v1888_v35  ;;  %vm1378_vm10 = vcmp.gt.f32.partialorder %v866_v39, 0.0  ;;  %v1890_v43 = vmul.f32 0.1, %v354_v38  ;;  %v867_v44 = vld [vmem:[%s3822_s18 + $0x3d8] sm:$0xff]  ;;  %v356_v45 = vld [vmem:[%s3815_s20 + $0x3e0] sm:$0xff] }
  0xb6   : > { %v2401_v42 = vsel %vm1377_vm9, %v353_v33, %v1889_v36  ;;  %v868_v46 = vld [vmem:[%s3822_s18 + $0x3e0] sm:$0xff]  ;;  %2912 = vst [vmem:[%s3838_s21 + $0x3c0] sm:$0xff] %v2400_v41  ;;  %vm1379_vm11 = vcmp.gt.f32.partialorder %v867_v44, 0.0  ;;  %v1891_v47 = vmul.f32 0.1, %v355_v40  ;;  %v357_v50 = vld [vmem:[%s3815_s20 + $0x3e8] sm:$0xff] }
  0xb7   : > { %2913 = vst [vmem:[%s3838_s21 + $0x3c8] sm:$0xff] %v2401_v42  ;;  %vm1380_vm12 = vcmp.gt.f32.partialorder %v868_v46, 0.0  ;;  %v1892_v48 = vmul.f32 0.1, %v356_v45  ;;  %v2402_v49 = vsel %vm1378_vm10, %v354_v38, %v1890_v43  ;;  %v869_v51 = vld [vmem:[%s3822_s18 + $0x3e8] sm:$0xff]  ;;  %v358_v52 = vld [vmem:[%s3815_s20 + $0x3f0] sm:$0xff] }
  0xb8   : > { %2914 = vst [vmem:[%s3838_s21 + $0x3d0] sm:$0xff] %v2402_v49  ;;  %v2403_v53 = vsel %vm1379_vm11, %v355_v40, %v1891_v47  ;;  %vm1381_vm13 = vcmp.gt.f32.partialorder %v869_v51, 0.0  ;;  %v1893_v55 = vmul.f32 0.1, %v357_v50  ;;  %v870_v56 = vld [vmem:[%s3822_s18 + $0x3f0] sm:$0xff]  ;;  %v359_v57 = vld [vmem:[%s3815_s20 + $0x3f8] sm:$0xff] }
  0xb9   : > { %v2404_v54 = vsel %vm1380_vm12, %v356_v45, %v1892_v48  ;;  %v871_v58 = vld [vmem:[%s3822_s18 + $0x3f8] sm:$0xff]  ;;  %2915 = vst [vmem:[%s3838_s21 + $0x3d8] sm:$0xff] %v2403_v53  ;;  %vm1382_vm14 = vcmp.gt.f32.partialorder %v870_v56, 0.0  ;;  %v1894_v59 = vmul.f32 0.1, %v358_v52  ;;  %v360_v62 = vld [vmem:[%s3815_s20 + $0x400] sm:$0xff] }
  0xba   : > { %2916 = vst [vmem:[%s3838_s21 + $0x3e0] sm:$0xff] %v2404_v54  ;;  %vm1383_vm15 = vcmp.gt.f32.partialorder %v871_v58, 0.0  ;;  %v1895_v60 = vmul.f32 0.1, %v359_v57  ;;  %v2405_v61 = vsel %vm1381_vm13, %v357_v50, %v1893_v55  ;;  %v872_v63 = vld [vmem:[%s3822_s18 + $0x400] sm:$0xff]  ;;  %v361_v0 = vld [vmem:[%s3815_s20 + $0x408] sm:$0xff] }
  0xbb   : > { %2917 = vst [vmem:[%s3838_s21 + $0x3e8] sm:$0xff] %v2405_v61  ;;  %v2406_v1 = vsel %vm1382_vm14, %v358_v52, %v1894_v59  ;;  %vm1384_vm0 = vcmp.gt.f32.partialorder %v872_v63, 0.0  ;;  %v1896_v3 = vmul.f32 0.1, %v360_v62  ;;  %v873_v4 = vld [vmem:[%s3822_s18 + $0x408] sm:$0xff]  ;;  %v362_v5 = vld [vmem:[%s3815_s20 + $0x410] sm:$0xff] }
  0xbc   : > { %v2407_v2 = vsel %vm1383_vm15, %v359_v57, %v1895_v60  ;;  %v874_v6 = vld [vmem:[%s3822_s18 + $0x410] sm:$0xff]  ;;  %2918 = vst [vmem:[%s3838_s21 + $0x3f0] sm:$0xff] %v2406_v1  ;;  %vm1385_vm1 = vcmp.gt.f32.partialorder %v873_v4, 0.0  ;;  %v1897_v7 = vmul.f32 0.1, %v361_v0  ;;  %v363_v10 = vld [vmem:[%s3815_s20 + $0x418] sm:$0xff] }
  0xbd   : > { %2919 = vst [vmem:[%s3838_s21 + $0x3f8] sm:$0xff] %v2407_v2  ;;  %vm1386_vm2 = vcmp.gt.f32.partialorder %v874_v6, 0.0  ;;  %v1898_v8 = vmul.f32 0.1, %v362_v5  ;;  %v2408_v9 = vsel %vm1384_vm0, %v360_v62, %v1896_v3  ;;  %v875_v11 = vld [vmem:[%s3822_s18 + $0x418] sm:$0xff]  ;;  %v364_v12 = vld [vmem:[%s3815_s20 + $0x420] sm:$0xff] }
  0xbe   : > { %2920 = vst [vmem:[%s3838_s21 + $0x400] sm:$0xff] %v2408_v9  ;;  %v2409_v13 = vsel %vm1385_vm1, %v361_v0, %v1897_v7  ;;  %vm1387_vm3 = vcmp.gt.f32.partialorder %v875_v11, 0.0  ;;  %v1899_v15 = vmul.f32 0.1, %v363_v10  ;;  %v876_v16 = vld [vmem:[%s3822_s18 + $0x420] sm:$0xff]  ;;  %v365_v17 = vld [vmem:[%s3815_s20 + $0x428] sm:$0xff] }
  0xbf   : > { %v2410_v14 = vsel %vm1386_vm2, %v362_v5, %v1898_v8  ;;  %v877_v18 = vld [vmem:[%s3822_s18 + $0x428] sm:$0xff]  ;;  %2921 = vst [vmem:[%s3838_s21 + $0x408] sm:$0xff] %v2409_v13  ;;  %vm1388_vm4 = vcmp.gt.f32.partialorder %v876_v16, 0.0  ;;  %v1900_v19 = vmul.f32 0.1, %v364_v12  ;;  %v366_v22 = vld [vmem:[%s3815_s20 + $0x430] sm:$0xff] }
  0xc0   : > { %2922 = vst [vmem:[%s3838_s21 + $0x410] sm:$0xff] %v2410_v14  ;;  %vm1389_vm5 = vcmp.gt.f32.partialorder %v877_v18, 0.0  ;;  %v1901_v20 = vmul.f32 0.1, %v365_v17  ;;  %v2411_v21 = vsel %vm1387_vm3, %v363_v10, %v1899_v15  ;;  %v878_v23 = vld [vmem:[%s3822_s18 + $0x430] sm:$0xff]  ;;  %v367_v24 = vld [vmem:[%s3815_s20 + $0x438] sm:$0xff] }
  0xc1   : > { %2923 = vst [vmem:[%s3838_s21 + $0x418] sm:$0xff] %v2411_v21  ;;  %v2412_v25 = vsel %vm1388_vm4, %v364_v12, %v1900_v19  ;;  %vm1390_vm6 = vcmp.gt.f32.partialorder %v878_v23, 0.0  ;;  %v1902_v27 = vmul.f32 0.1, %v366_v22  ;;  %v879_v28 = vld [vmem:[%s3822_s18 + $0x438] sm:$0xff]  ;;  %v368_v29 = vld [vmem:[%s3815_s20 + $0x440] sm:$0xff] }
  0xc2   : > { %v2413_v26 = vsel %vm1389_vm5, %v365_v17, %v1901_v20  ;;  %v880_v30 = vld [vmem:[%s3822_s18 + $0x440] sm:$0xff]  ;;  %2924 = vst [vmem:[%s3838_s21 + $0x420] sm:$0xff] %v2412_v25  ;;  %vm1391_vm7 = vcmp.gt.f32.partialorder %v879_v28, 0.0  ;;  %v1903_v31 = vmul.f32 0.1, %v367_v24  ;;  %v369_v34 = vld [vmem:[%s3815_s20 + $0x448] sm:$0xff] }
  0xc3   : > { %2925 = vst [vmem:[%s3838_s21 + $0x428] sm:$0xff] %v2413_v26  ;;  %vm1392_vm8 = vcmp.gt.f32.partialorder %v880_v30, 0.0  ;;  %v1904_v32 = vmul.f32 0.1, %v368_v29  ;;  %v2414_v33 = vsel %vm1390_vm6, %v366_v22, %v1902_v27  ;;  %v881_v35 = vld [vmem:[%s3822_s18 + $0x448] sm:$0xff]  ;;  %v370_v36 = vld [vmem:[%s3815_s20 + $0x450] sm:$0xff] }
  0xc4   : > { %2926 = vst [vmem:[%s3838_s21 + $0x430] sm:$0xff] %v2414_v33  ;;  %v2415_v37 = vsel %vm1391_vm7, %v367_v24, %v1903_v31  ;;  %vm1393_vm9 = vcmp.gt.f32.partialorder %v881_v35, 0.0  ;;  %v1905_v39 = vmul.f32 0.1, %v369_v34  ;;  %v882_v40 = vld [vmem:[%s3822_s18 + $0x450] sm:$0xff]  ;;  %v371_v41 = vld [vmem:[%s3815_s20 + $0x458] sm:$0xff] }
  0xc5   : > { %v2416_v38 = vsel %vm1392_vm8, %v368_v29, %v1904_v32  ;;  %v883_v42 = vld [vmem:[%s3822_s18 + $0x458] sm:$0xff]  ;;  %2927 = vst [vmem:[%s3838_s21 + $0x438] sm:$0xff] %v2415_v37  ;;  %vm1394_vm10 = vcmp.gt.f32.partialorder %v882_v40, 0.0  ;;  %v1906_v43 = vmul.f32 0.1, %v370_v36  ;;  %v372_v46 = vld [vmem:[%s3815_s20 + $0x460] sm:$0xff] }
  0xc6   : > { %2928 = vst [vmem:[%s3838_s21 + $0x440] sm:$0xff] %v2416_v38  ;;  %vm1395_vm11 = vcmp.gt.f32.partialorder %v883_v42, 0.0  ;;  %v1907_v44 = vmul.f32 0.1, %v371_v41  ;;  %v2417_v45 = vsel %vm1393_vm9, %v369_v34, %v1905_v39  ;;  %v884_v47 = vld [vmem:[%s3822_s18 + $0x460] sm:$0xff]  ;;  %v373_v48 = vld [vmem:[%s3815_s20 + $0x468] sm:$0xff] }
  0xc7   : > { %2929 = vst [vmem:[%s3838_s21 + $0x448] sm:$0xff] %v2417_v45  ;;  %v2418_v49 = vsel %vm1394_vm10, %v370_v36, %v1906_v43  ;;  %vm1396_vm12 = vcmp.gt.f32.partialorder %v884_v47, 0.0  ;;  %v1908_v51 = vmul.f32 0.1, %v372_v46  ;;  %v885_v52 = vld [vmem:[%s3822_s18 + $0x468] sm:$0xff]  ;;  %v374_v53 = vld [vmem:[%s3815_s20 + $0x470] sm:$0xff] }
  0xc8   : > { %v2419_v50 = vsel %vm1395_vm11, %v371_v41, %v1907_v44  ;;  %v886_v54 = vld [vmem:[%s3822_s18 + $0x470] sm:$0xff]  ;;  %2930 = vst [vmem:[%s3838_s21 + $0x450] sm:$0xff] %v2418_v49  ;;  %vm1397_vm13 = vcmp.gt.f32.partialorder %v885_v52, 0.0  ;;  %v1909_v55 = vmul.f32 0.1, %v373_v48  ;;  %v375_v58 = vld [vmem:[%s3815_s20 + $0x478] sm:$0xff] }
  0xc9   : > { %2931 = vst [vmem:[%s3838_s21 + $0x458] sm:$0xff] %v2419_v50  ;;  %vm1398_vm14 = vcmp.gt.f32.partialorder %v886_v54, 0.0  ;;  %v1910_v56 = vmul.f32 0.1, %v374_v53  ;;  %v2420_v57 = vsel %vm1396_vm12, %v372_v46, %v1908_v51  ;;  %v887_v59 = vld [vmem:[%s3822_s18 + $0x478] sm:$0xff]  ;;  %v376_v60 = vld [vmem:[%s3815_s20 + $0x480] sm:$0xff] }
  0xca   : > { %2932 = vst [vmem:[%s3838_s21 + $0x460] sm:$0xff] %v2420_v57  ;;  %v2421_v61 = vsel %vm1397_vm13, %v373_v48, %v1909_v55  ;;  %vm1399_vm15 = vcmp.gt.f32.partialorder %v887_v59, 0.0  ;;  %v1911_v63 = vmul.f32 0.1, %v375_v58  ;;  %v888_v0 = vld [vmem:[%s3822_s18 + $0x480] sm:$0xff]  ;;  %v377_v1 = vld [vmem:[%s3815_s20 + $0x488] sm:$0xff] }
  0xcb   : > { %v2422_v62 = vsel %vm1398_vm14, %v374_v53, %v1910_v56  ;;  %v889_v2 = vld [vmem:[%s3822_s18 + $0x488] sm:$0xff]  ;;  %2933 = vst [vmem:[%s3838_s21 + $0x468] sm:$0xff] %v2421_v61  ;;  %vm1400_vm0 = vcmp.gt.f32.partialorder %v888_v0, 0.0  ;;  %v1912_v3 = vmul.f32 0.1, %v376_v60  ;;  %v378_v6 = vld [vmem:[%s3815_s20 + $0x490] sm:$0xff] }
  0xcc   : > { %2934 = vst [vmem:[%s3838_s21 + $0x470] sm:$0xff] %v2422_v62  ;;  %vm1401_vm1 = vcmp.gt.f32.partialorder %v889_v2, 0.0  ;;  %v1913_v4 = vmul.f32 0.1, %v377_v1  ;;  %v2423_v5 = vsel %vm1399_vm15, %v375_v58, %v1911_v63  ;;  %v890_v7 = vld [vmem:[%s3822_s18 + $0x490] sm:$0xff]  ;;  %v379_v8 = vld [vmem:[%s3815_s20 + $0x498] sm:$0xff] }
  0xcd   : > { %2935 = vst [vmem:[%s3838_s21 + $0x478] sm:$0xff] %v2423_v5  ;;  %v2424_v9 = vsel %vm1400_vm0, %v376_v60, %v1912_v3  ;;  %vm1402_vm2 = vcmp.gt.f32.partialorder %v890_v7, 0.0  ;;  %v1914_v11 = vmul.f32 0.1, %v378_v6  ;;  %v891_v12 = vld [vmem:[%s3822_s18 + $0x498] sm:$0xff]  ;;  %v380_v13 = vld [vmem:[%s3815_s20 + $0x4a0] sm:$0xff] }
  0xce   : > { %v2425_v10 = vsel %vm1401_vm1, %v377_v1, %v1913_v4  ;;  %v892_v14 = vld [vmem:[%s3822_s18 + $0x4a0] sm:$0xff]  ;;  %2936 = vst [vmem:[%s3838_s21 + $0x480] sm:$0xff] %v2424_v9  ;;  %vm1403_vm3 = vcmp.gt.f32.partialorder %v891_v12, 0.0  ;;  %v1915_v15 = vmul.f32 0.1, %v379_v8  ;;  %v381_v18 = vld [vmem:[%s3815_s20 + $0x4a8] sm:$0xff] }
  0xcf   : > { %2937 = vst [vmem:[%s3838_s21 + $0x488] sm:$0xff] %v2425_v10  ;;  %vm1404_vm4 = vcmp.gt.f32.partialorder %v892_v14, 0.0  ;;  %v1916_v16 = vmul.f32 0.1, %v380_v13  ;;  %v2426_v17 = vsel %vm1402_vm2, %v378_v6, %v1914_v11  ;;  %v893_v19 = vld [vmem:[%s3822_s18 + $0x4a8] sm:$0xff]  ;;  %v382_v20 = vld [vmem:[%s3815_s20 + $0x4b0] sm:$0xff] }
  0xd0   : > { %2938 = vst [vmem:[%s3838_s21 + $0x490] sm:$0xff] %v2426_v17  ;;  %v2427_v21 = vsel %vm1403_vm3, %v379_v8, %v1915_v15  ;;  %vm1405_vm5 = vcmp.gt.f32.partialorder %v893_v19, 0.0  ;;  %v1917_v23 = vmul.f32 0.1, %v381_v18  ;;  %v894_v24 = vld [vmem:[%s3822_s18 + $0x4b0] sm:$0xff]  ;;  %v383_v25 = vld [vmem:[%s3815_s20 + $0x4b8] sm:$0xff] }
  0xd1   : > { %v2428_v22 = vsel %vm1404_vm4, %v380_v13, %v1916_v16  ;;  %v895_v26 = vld [vmem:[%s3822_s18 + $0x4b8] sm:$0xff]  ;;  %2939 = vst [vmem:[%s3838_s21 + $0x498] sm:$0xff] %v2427_v21  ;;  %vm1406_vm6 = vcmp.gt.f32.partialorder %v894_v24, 0.0  ;;  %v1918_v27 = vmul.f32 0.1, %v382_v20  ;;  %v384_v30 = vld [vmem:[%s3815_s20 + $0x4c0] sm:$0xff] }
  0xd2   : > { %2940 = vst [vmem:[%s3838_s21 + $0x4a0] sm:$0xff] %v2428_v22  ;;  %vm1407_vm7 = vcmp.gt.f32.partialorder %v895_v26, 0.0  ;;  %v1919_v28 = vmul.f32 0.1, %v383_v25  ;;  %v2429_v29 = vsel %vm1405_vm5, %v381_v18, %v1917_v23  ;;  %v896_v31 = vld [vmem:[%s3822_s18 + $0x4c0] sm:$0xff]  ;;  %v385_v32 = vld [vmem:[%s3815_s20 + $0x4c8] sm:$0xff] }
  0xd3   : > { %2941 = vst [vmem:[%s3838_s21 + $0x4a8] sm:$0xff] %v2429_v29  ;;  %v2430_v33 = vsel %vm1406_vm6, %v382_v20, %v1918_v27  ;;  %vm1408_vm8 = vcmp.gt.f32.partialorder %v896_v31, 0.0  ;;  %v1920_v35 = vmul.f32 0.1, %v384_v30  ;;  %v897_v36 = vld [vmem:[%s3822_s18 + $0x4c8] sm:$0xff]  ;;  %v386_v37 = vld [vmem:[%s3815_s20 + $0x4d0] sm:$0xff] }
  0xd4   : > { %v2431_v34 = vsel %vm1407_vm7, %v383_v25, %v1919_v28  ;;  %v898_v38 = vld [vmem:[%s3822_s18 + $0x4d0] sm:$0xff]  ;;  %2942 = vst [vmem:[%s3838_s21 + $0x4b0] sm:$0xff] %v2430_v33  ;;  %vm1409_vm9 = vcmp.gt.f32.partialorder %v897_v36, 0.0  ;;  %v1921_v39 = vmul.f32 0.1, %v385_v32  ;;  %v387_v42 = vld [vmem:[%s3815_s20 + $0x4d8] sm:$0xff] }
  0xd5   : > { %2943 = vst [vmem:[%s3838_s21 + $0x4b8] sm:$0xff] %v2431_v34  ;;  %vm1410_vm10 = vcmp.gt.f32.partialorder %v898_v38, 0.0  ;;  %v1922_v40 = vmul.f32 0.1, %v386_v37  ;;  %v2432_v41 = vsel %vm1408_vm8, %v384_v30, %v1920_v35  ;;  %v899_v43 = vld [vmem:[%s3822_s18 + $0x4d8] sm:$0xff]  ;;  %v388_v44 = vld [vmem:[%s3815_s20 + $0x4e0] sm:$0xff] }
  0xd6   : > { %2944 = vst [vmem:[%s3838_s21 + $0x4c0] sm:$0xff] %v2432_v41  ;;  %v2433_v45 = vsel %vm1409_vm9, %v385_v32, %v1921_v39  ;;  %vm1411_vm11 = vcmp.gt.f32.partialorder %v899_v43, 0.0  ;;  %v1923_v47 = vmul.f32 0.1, %v387_v42  ;;  %v900_v48 = vld [vmem:[%s3822_s18 + $0x4e0] sm:$0xff]  ;;  %v389_v49 = vld [vmem:[%s3815_s20 + $0x4e8] sm:$0xff] }
  0xd7   : > { %v2434_v46 = vsel %vm1410_vm10, %v386_v37, %v1922_v40  ;;  %v901_v50 = vld [vmem:[%s3822_s18 + $0x4e8] sm:$0xff]  ;;  %2945 = vst [vmem:[%s3838_s21 + $0x4c8] sm:$0xff] %v2433_v45  ;;  %vm1412_vm12 = vcmp.gt.f32.partialorder %v900_v48, 0.0  ;;  %v1924_v51 = vmul.f32 0.1, %v388_v44  ;;  %v390_v54 = vld [vmem:[%s3815_s20 + $0x4f0] sm:$0xff] }
  0xd8   : > { %2946 = vst [vmem:[%s3838_s21 + $0x4d0] sm:$0xff] %v2434_v46  ;;  %vm1413_vm13 = vcmp.gt.f32.partialorder %v901_v50, 0.0  ;;  %v1925_v52 = vmul.f32 0.1, %v389_v49  ;;  %v2435_v53 = vsel %vm1411_vm11, %v387_v42, %v1923_v47  ;;  %v902_v55 = vld [vmem:[%s3822_s18 + $0x4f0] sm:$0xff]  ;;  %v391_v56 = vld [vmem:[%s3815_s20 + $0x4f8] sm:$0xff] }
  0xd9   : > { %2947 = vst [vmem:[%s3838_s21 + $0x4d8] sm:$0xff] %v2435_v53  ;;  %v2436_v57 = vsel %vm1412_vm12, %v388_v44, %v1924_v51  ;;  %vm1414_vm14 = vcmp.gt.f32.partialorder %v902_v55, 0.0  ;;  %v1926_v59 = vmul.f32 0.1, %v390_v54  ;;  %v903_v60 = vld [vmem:[%s3822_s18 + $0x4f8] sm:$0xff]  ;;  %v392_v61 = vld [vmem:[%s3815_s20 + $0x500] sm:$0xff] }
  0xda   : > { %v2437_v58 = vsel %vm1413_vm13, %v389_v49, %v1925_v52  ;;  %v904_v62 = vld [vmem:[%s3822_s18 + $0x500] sm:$0xff]  ;;  %2948 = vst [vmem:[%s3838_s21 + $0x4e0] sm:$0xff] %v2436_v57  ;;  %vm1415_vm15 = vcmp.gt.f32.partialorder %v903_v60, 0.0  ;;  %v1927_v63 = vmul.f32 0.1, %v391_v56  ;;  %v393_v2 = vld [vmem:[%s3815_s20 + $0x508] sm:$0xff] }
  0xdb   : > { %2949 = vst [vmem:[%s3838_s21 + $0x4e8] sm:$0xff] %v2437_v58  ;;  %vm1416_vm0 = vcmp.gt.f32.partialorder %v904_v62, 0.0  ;;  %v1928_v0 = vmul.f32 0.1, %v392_v61  ;;  %v2438_v1 = vsel %vm1414_vm14, %v390_v54, %v1926_v59  ;;  %v905_v3 = vld [vmem:[%s3822_s18 + $0x508] sm:$0xff]  ;;  %v394_v4 = vld [vmem:[%s3815_s20 + $0x510] sm:$0xff] }
  0xdc   : > { %2950 = vst [vmem:[%s3838_s21 + $0x4f0] sm:$0xff] %v2438_v1  ;;  %v2439_v5 = vsel %vm1415_vm15, %v391_v56, %v1927_v63  ;;  %vm1417_vm1 = vcmp.gt.f32.partialorder %v905_v3, 0.0  ;;  %v1929_v7 = vmul.f32 0.1, %v393_v2  ;;  %v906_v8 = vld [vmem:[%s3822_s18 + $0x510] sm:$0xff]  ;;  %v395_v9 = vld [vmem:[%s3815_s20 + $0x518] sm:$0xff] }
  0xdd   : > { %v2440_v6 = vsel %vm1416_vm0, %v392_v61, %v1928_v0  ;;  %v907_v10 = vld [vmem:[%s3822_s18 + $0x518] sm:$0xff]  ;;  %2951 = vst [vmem:[%s3838_s21 + $0x4f8] sm:$0xff] %v2439_v5  ;;  %vm1418_vm2 = vcmp.gt.f32.partialorder %v906_v8, 0.0  ;;  %v1930_v11 = vmul.f32 0.1, %v394_v4  ;;  %v396_v14 = vld [vmem:[%s3815_s20 + $0x520] sm:$0xff] }
  0xde   : > { %2952 = vst [vmem:[%s3838_s21 + $0x500] sm:$0xff] %v2440_v6  ;;  %vm1419_vm3 = vcmp.gt.f32.partialorder %v907_v10, 0.0  ;;  %v1931_v12 = vmul.f32 0.1, %v395_v9  ;;  %v2441_v13 = vsel %vm1417_vm1, %v393_v2, %v1929_v7  ;;  %v908_v15 = vld [vmem:[%s3822_s18 + $0x520] sm:$0xff]  ;;  %v397_v16 = vld [vmem:[%s3815_s20 + $0x528] sm:$0xff] }
  0xdf   : > { %2953 = vst [vmem:[%s3838_s21 + $0x508] sm:$0xff] %v2441_v13  ;;  %v2442_v17 = vsel %vm1418_vm2, %v394_v4, %v1930_v11  ;;  %vm1420_vm4 = vcmp.gt.f32.partialorder %v908_v15, 0.0  ;;  %v1932_v19 = vmul.f32 0.1, %v396_v14  ;;  %v909_v20 = vld [vmem:[%s3822_s18 + $0x528] sm:$0xff]  ;;  %v398_v21 = vld [vmem:[%s3815_s20 + $0x530] sm:$0xff] }
  0xe0   : > { %v2443_v18 = vsel %vm1419_vm3, %v395_v9, %v1931_v12  ;;  %v910_v22 = vld [vmem:[%s3822_s18 + $0x530] sm:$0xff]  ;;  %2954 = vst [vmem:[%s3838_s21 + $0x510] sm:$0xff] %v2442_v17  ;;  %vm1421_vm5 = vcmp.gt.f32.partialorder %v909_v20, 0.0  ;;  %v1933_v23 = vmul.f32 0.1, %v397_v16  ;;  %v399_v26 = vld [vmem:[%s3815_s20 + $0x538] sm:$0xff] }
  0xe1   : > { %2955 = vst [vmem:[%s3838_s21 + $0x518] sm:$0xff] %v2443_v18  ;;  %vm1422_vm6 = vcmp.gt.f32.partialorder %v910_v22, 0.0  ;;  %v1934_v24 = vmul.f32 0.1, %v398_v21  ;;  %v2444_v25 = vsel %vm1420_vm4, %v396_v14, %v1932_v19  ;;  %v911_v27 = vld [vmem:[%s3822_s18 + $0x538] sm:$0xff]  ;;  %v400_v28 = vld [vmem:[%s3815_s20 + $0x540] sm:$0xff] }
  0xe2   : > { %2956 = vst [vmem:[%s3838_s21 + $0x520] sm:$0xff] %v2444_v25  ;;  %v2445_v29 = vsel %vm1421_vm5, %v397_v16, %v1933_v23  ;;  %vm1423_vm7 = vcmp.gt.f32.partialorder %v911_v27, 0.0  ;;  %v1935_v31 = vmul.f32 0.1, %v399_v26  ;;  %v912_v32 = vld [vmem:[%s3822_s18 + $0x540] sm:$0xff]  ;;  %v401_v33 = vld [vmem:[%s3815_s20 + $0x548] sm:$0xff] }
  0xe3   : > { %v2446_v30 = vsel %vm1422_vm6, %v398_v21, %v1934_v24  ;;  %v913_v34 = vld [vmem:[%s3822_s18 + $0x548] sm:$0xff]  ;;  %2957 = vst [vmem:[%s3838_s21 + $0x528] sm:$0xff] %v2445_v29  ;;  %vm1424_vm8 = vcmp.gt.f32.partialorder %v912_v32, 0.0  ;;  %v1936_v35 = vmul.f32 0.1, %v400_v28  ;;  %v402_v38 = vld [vmem:[%s3815_s20 + $0x550] sm:$0xff] }
  0xe4   : > { %2958 = vst [vmem:[%s3838_s21 + $0x530] sm:$0xff] %v2446_v30  ;;  %vm1425_vm9 = vcmp.gt.f32.partialorder %v913_v34, 0.0  ;;  %v1937_v36 = vmul.f32 0.1, %v401_v33  ;;  %v2447_v37 = vsel %vm1423_vm7, %v399_v26, %v1935_v31  ;;  %v914_v39 = vld [vmem:[%s3822_s18 + $0x550] sm:$0xff]  ;;  %v403_v40 = vld [vmem:[%s3815_s20 + $0x558] sm:$0xff] }
  0xe5   : > { %2959 = vst [vmem:[%s3838_s21 + $0x538] sm:$0xff] %v2447_v37  ;;  %v2448_v41 = vsel %vm1424_vm8, %v400_v28, %v1936_v35  ;;  %vm1426_vm10 = vcmp.gt.f32.partialorder %v914_v39, 0.0  ;;  %v1938_v43 = vmul.f32 0.1, %v402_v38  ;;  %v915_v44 = vld [vmem:[%s3822_s18 + $0x558] sm:$0xff]  ;;  %v404_v45 = vld [vmem:[%s3815_s20 + $0x560] sm:$0xff] }
  0xe6   : > { %v2449_v42 = vsel %vm1425_vm9, %v401_v33, %v1937_v36  ;;  %v916_v46 = vld [vmem:[%s3822_s18 + $0x560] sm:$0xff]  ;;  %2960 = vst [vmem:[%s3838_s21 + $0x540] sm:$0xff] %v2448_v41  ;;  %vm1427_vm11 = vcmp.gt.f32.partialorder %v915_v44, 0.0  ;;  %v1939_v47 = vmul.f32 0.1, %v403_v40  ;;  %v405_v50 = vld [vmem:[%s3815_s20 + $0x568] sm:$0xff] }
  0xe7   : > { %2961 = vst [vmem:[%s3838_s21 + $0x548] sm:$0xff] %v2449_v42  ;;  %vm1428_vm12 = vcmp.gt.f32.partialorder %v916_v46, 0.0  ;;  %v1940_v48 = vmul.f32 0.1, %v404_v45  ;;  %v2450_v49 = vsel %vm1426_vm10, %v402_v38, %v1938_v43  ;;  %v917_v51 = vld [vmem:[%s3822_s18 + $0x568] sm:$0xff]  ;;  %v406_v52 = vld [vmem:[%s3815_s20 + $0x570] sm:$0xff] }
  0xe8   : > { %2962 = vst [vmem:[%s3838_s21 + $0x550] sm:$0xff] %v2450_v49  ;;  %v2451_v53 = vsel %vm1427_vm11, %v403_v40, %v1939_v47  ;;  %vm1429_vm13 = vcmp.gt.f32.partialorder %v917_v51, 0.0  ;;  %v1941_v55 = vmul.f32 0.1, %v405_v50  ;;  %v918_v56 = vld [vmem:[%s3822_s18 + $0x570] sm:$0xff]  ;;  %v407_v57 = vld [vmem:[%s3815_s20 + $0x578] sm:$0xff] }
  0xe9   : > { %v2452_v54 = vsel %vm1428_vm12, %v404_v45, %v1940_v48  ;;  %v919_v58 = vld [vmem:[%s3822_s18 + $0x578] sm:$0xff]  ;;  %2963 = vst [vmem:[%s3838_s21 + $0x558] sm:$0xff] %v2451_v53  ;;  %vm1430_vm14 = vcmp.gt.f32.partialorder %v918_v56, 0.0  ;;  %v1942_v59 = vmul.f32 0.1, %v406_v52  ;;  %v408_v62 = vld [vmem:[%s3815_s20 + $0x580] sm:$0xff] }
  0xea   : > { %2964 = vst [vmem:[%s3838_s21 + $0x560] sm:$0xff] %v2452_v54  ;;  %vm1431_vm15 = vcmp.gt.f32.partialorder %v919_v58, 0.0  ;;  %v1943_v60 = vmul.f32 0.1, %v407_v57  ;;  %v2453_v61 = vsel %vm1429_vm13, %v405_v50, %v1941_v55  ;;  %v920_v63 = vld [vmem:[%s3822_s18 + $0x580] sm:$0xff]  ;;  %v409_v0 = vld [vmem:[%s3815_s20 + $0x588] sm:$0xff] }
  0xeb   : > { %2965 = vst [vmem:[%s3838_s21 + $0x568] sm:$0xff] %v2453_v61  ;;  %v2454_v1 = vsel %vm1430_vm14, %v406_v52, %v1942_v59  ;;  %vm1432_vm0 = vcmp.gt.f32.partialorder %v920_v63, 0.0  ;;  %v1944_v3 = vmul.f32 0.1, %v408_v62  ;;  %v921_v4 = vld [vmem:[%s3822_s18 + $0x588] sm:$0xff]  ;;  %v410_v5 = vld [vmem:[%s3815_s20 + $0x590] sm:$0xff] }
  0xec   : > { %v2455_v2 = vsel %vm1431_vm15, %v407_v57, %v1943_v60  ;;  %v922_v6 = vld [vmem:[%s3822_s18 + $0x590] sm:$0xff]  ;;  %2966 = vst [vmem:[%s3838_s21 + $0x570] sm:$0xff] %v2454_v1  ;;  %vm1433_vm1 = vcmp.gt.f32.partialorder %v921_v4, 0.0  ;;  %v1945_v7 = vmul.f32 0.1, %v409_v0  ;;  %v411_v10 = vld [vmem:[%s3815_s20 + $0x598] sm:$0xff] }
  0xed   : > { %2967 = vst [vmem:[%s3838_s21 + $0x578] sm:$0xff] %v2455_v2  ;;  %vm1434_vm2 = vcmp.gt.f32.partialorder %v922_v6, 0.0  ;;  %v1946_v8 = vmul.f32 0.1, %v410_v5  ;;  %v2456_v9 = vsel %vm1432_vm0, %v408_v62, %v1944_v3  ;;  %v923_v11 = vld [vmem:[%s3822_s18 + $0x598] sm:$0xff]  ;;  %v412_v12 = vld [vmem:[%s3815_s20 + $0x5a0] sm:$0xff] }
  0xee   : > { %2968 = vst [vmem:[%s3838_s21 + $0x580] sm:$0xff] %v2456_v9  ;;  %v2457_v13 = vsel %vm1433_vm1, %v409_v0, %v1945_v7  ;;  %vm1435_vm3 = vcmp.gt.f32.partialorder %v923_v11, 0.0  ;;  %v1947_v15 = vmul.f32 0.1, %v411_v10  ;;  %v924_v16 = vld [vmem:[%s3822_s18 + $0x5a0] sm:$0xff]  ;;  %v413_v17 = vld [vmem:[%s3815_s20 + $0x5a8] sm:$0xff] }
  0xef   : > { %v2458_v14 = vsel %vm1434_vm2, %v410_v5, %v1946_v8  ;;  %v925_v18 = vld [vmem:[%s3822_s18 + $0x5a8] sm:$0xff]  ;;  %2969 = vst [vmem:[%s3838_s21 + $0x588] sm:$0xff] %v2457_v13  ;;  %vm1436_vm4 = vcmp.gt.f32.partialorder %v924_v16, 0.0  ;;  %v1948_v19 = vmul.f32 0.1, %v412_v12  ;;  %v414_v22 = vld [vmem:[%s3815_s20 + $0x5b0] sm:$0xff] }
  0xf0   : > { %2970 = vst [vmem:[%s3838_s21 + $0x590] sm:$0xff] %v2458_v14  ;;  %vm1437_vm5 = vcmp.gt.f32.partialorder %v925_v18, 0.0  ;;  %v1949_v20 = vmul.f32 0.1, %v413_v17  ;;  %v2459_v21 = vsel %vm1435_vm3, %v411_v10, %v1947_v15  ;;  %v926_v23 = vld [vmem:[%s3822_s18 + $0x5b0] sm:$0xff]  ;;  %v415_v24 = vld [vmem:[%s3815_s20 + $0x5b8] sm:$0xff] }
  0xf1   : > { %2971 = vst [vmem:[%s3838_s21 + $0x598] sm:$0xff] %v2459_v21  ;;  %v2460_v25 = vsel %vm1436_vm4, %v412_v12, %v1948_v19  ;;  %vm1438_vm6 = vcmp.gt.f32.partialorder %v926_v23, 0.0  ;;  %v1950_v27 = vmul.f32 0.1, %v414_v22  ;;  %v927_v28 = vld [vmem:[%s3822_s18 + $0x5b8] sm:$0xff]  ;;  %v416_v29 = vld [vmem:[%s3815_s20 + $0x5c0] sm:$0xff] }
  0xf2   : > { %v2461_v26 = vsel %vm1437_vm5, %v413_v17, %v1949_v20  ;;  %v928_v30 = vld [vmem:[%s3822_s18 + $0x5c0] sm:$0xff]  ;;  %2972 = vst [vmem:[%s3838_s21 + $0x5a0] sm:$0xff] %v2460_v25  ;;  %vm1439_vm7 = vcmp.gt.f32.partialorder %v927_v28, 0.0  ;;  %v1951_v31 = vmul.f32 0.1, %v415_v24  ;;  %v417_v34 = vld [vmem:[%s3815_s20 + $0x5c8] sm:$0xff] }
  0xf3   : > { %2973 = vst [vmem:[%s3838_s21 + $0x5a8] sm:$0xff] %v2461_v26  ;;  %vm1440_vm8 = vcmp.gt.f32.partialorder %v928_v30, 0.0  ;;  %v1952_v32 = vmul.f32 0.1, %v416_v29  ;;  %v2462_v33 = vsel %vm1438_vm6, %v414_v22, %v1950_v27  ;;  %v929_v35 = vld [vmem:[%s3822_s18 + $0x5c8] sm:$0xff]  ;;  %v418_v36 = vld [vmem:[%s3815_s20 + $0x5d0] sm:$0xff] }
  0xf4   : > { %2974 = vst [vmem:[%s3838_s21 + $0x5b0] sm:$0xff] %v2462_v33  ;;  %v2463_v37 = vsel %vm1439_vm7, %v415_v24, %v1951_v31  ;;  %vm1441_vm9 = vcmp.gt.f32.partialorder %v929_v35, 0.0  ;;  %v1953_v39 = vmul.f32 0.1, %v417_v34  ;;  %v930_v40 = vld [vmem:[%s3822_s18 + $0x5d0] sm:$0xff]  ;;  %v419_v41 = vld [vmem:[%s3815_s20 + $0x5d8] sm:$0xff] }
  0xf5   : > { %v2464_v38 = vsel %vm1440_vm8, %v416_v29, %v1952_v32  ;;  %v931_v42 = vld [vmem:[%s3822_s18 + $0x5d8] sm:$0xff]  ;;  %2975 = vst [vmem:[%s3838_s21 + $0x5b8] sm:$0xff] %v2463_v37  ;;  %vm1442_vm10 = vcmp.gt.f32.partialorder %v930_v40, 0.0  ;;  %v1954_v43 = vmul.f32 0.1, %v418_v36  ;;  %v420_v46 = vld [vmem:[%s3815_s20 + $0x5e0] sm:$0xff] }
  0xf6   : > { %2976 = vst [vmem:[%s3838_s21 + $0x5c0] sm:$0xff] %v2464_v38  ;;  %vm1443_vm11 = vcmp.gt.f32.partialorder %v931_v42, 0.0  ;;  %v1955_v44 = vmul.f32 0.1, %v419_v41  ;;  %v2465_v45 = vsel %vm1441_vm9, %v417_v34, %v1953_v39  ;;  %v932_v47 = vld [vmem:[%s3822_s18 + $0x5e0] sm:$0xff]  ;;  %v421_v48 = vld [vmem:[%s3815_s20 + $0x5e8] sm:$0xff] }
  0xf7   : > { %2977 = vst [vmem:[%s3838_s21 + $0x5c8] sm:$0xff] %v2465_v45  ;;  %v2466_v49 = vsel %vm1442_vm10, %v418_v36, %v1954_v43  ;;  %vm1444_vm12 = vcmp.gt.f32.partialorder %v932_v47, 0.0  ;;  %v1956_v51 = vmul.f32 0.1, %v420_v46  ;;  %v933_v52 = vld [vmem:[%s3822_s18 + $0x5e8] sm:$0xff]  ;;  %v422_v53 = vld [vmem:[%s3815_s20 + $0x5f0] sm:$0xff] }
  0xf8   : > { %v2467_v50 = vsel %vm1443_vm11, %v419_v41, %v1955_v44  ;;  %v934_v54 = vld [vmem:[%s3822_s18 + $0x5f0] sm:$0xff]  ;;  %2978 = vst [vmem:[%s3838_s21 + $0x5d0] sm:$0xff] %v2466_v49  ;;  %vm1445_vm13 = vcmp.gt.f32.partialorder %v933_v52, 0.0  ;;  %v1957_v55 = vmul.f32 0.1, %v421_v48  ;;  %v423_v58 = vld [vmem:[%s3815_s20 + $0x5f8] sm:$0xff] }
  0xf9   : > { %2979 = vst [vmem:[%s3838_s21 + $0x5d8] sm:$0xff] %v2467_v50  ;;  %vm1446_vm14 = vcmp.gt.f32.partialorder %v934_v54, 0.0  ;;  %v1958_v56 = vmul.f32 0.1, %v422_v53  ;;  %v2468_v57 = vsel %vm1444_vm12, %v420_v46, %v1956_v51  ;;  %v935_v59 = vld [vmem:[%s3822_s18 + $0x5f8] sm:$0xff]  ;;  %v424_v60 = vld [vmem:[%s3815_s20 + $0x600] sm:$0xff] }
  0xfa   : > { %2980 = vst [vmem:[%s3838_s21 + $0x5e0] sm:$0xff] %v2468_v57  ;;  %v2469_v61 = vsel %vm1445_vm13, %v421_v48, %v1957_v55  ;;  %vm1447_vm15 = vcmp.gt.f32.partialorder %v935_v59, 0.0  ;;  %v1959_v63 = vmul.f32 0.1, %v423_v58  ;;  %v936_v0 = vld [vmem:[%s3822_s18 + $0x600] sm:$0xff]  ;;  %v425_v1 = vld [vmem:[%s3815_s20 + $0x608] sm:$0xff] }
  0xfb   : > { %v2470_v62 = vsel %vm1446_vm14, %v422_v53, %v1958_v56  ;;  %v937_v2 = vld [vmem:[%s3822_s18 + $0x608] sm:$0xff]  ;;  %2981 = vst [vmem:[%s3838_s21 + $0x5e8] sm:$0xff] %v2469_v61  ;;  %vm1448_vm0 = vcmp.gt.f32.partialorder %v936_v0, 0.0  ;;  %v1960_v3 = vmul.f32 0.1, %v424_v60  ;;  %v426_v6 = vld [vmem:[%s3815_s20 + $0x610] sm:$0xff] }
  0xfc   : > { %2982 = vst [vmem:[%s3838_s21 + $0x5f0] sm:$0xff] %v2470_v62  ;;  %vm1449_vm1 = vcmp.gt.f32.partialorder %v937_v2, 0.0  ;;  %v1961_v4 = vmul.f32 0.1, %v425_v1  ;;  %v2471_v5 = vsel %vm1447_vm15, %v423_v58, %v1959_v63  ;;  %v938_v7 = vld [vmem:[%s3822_s18 + $0x610] sm:$0xff]  ;;  %v427_v8 = vld [vmem:[%s3815_s20 + $0x618] sm:$0xff] }
  0xfd   : > { %2983 = vst [vmem:[%s3838_s21 + $0x5f8] sm:$0xff] %v2471_v5  ;;  %v2472_v9 = vsel %vm1448_vm0, %v424_v60, %v1960_v3  ;;  %vm1450_vm2 = vcmp.gt.f32.partialorder %v938_v7, 0.0  ;;  %v1962_v11 = vmul.f32 0.1, %v426_v6  ;;  %v939_v12 = vld [vmem:[%s3822_s18 + $0x618] sm:$0xff]  ;;  %v428_v13 = vld [vmem:[%s3815_s20 + $0x620] sm:$0xff] }
  0xfe   : > { %v2473_v10 = vsel %vm1449_vm1, %v425_v1, %v1961_v4  ;;  %v940_v14 = vld [vmem:[%s3822_s18 + $0x620] sm:$0xff]  ;;  %2984 = vst [vmem:[%s3838_s21 + $0x600] sm:$0xff] %v2472_v9  ;;  %vm1451_vm3 = vcmp.gt.f32.partialorder %v939_v12, 0.0  ;;  %v1963_v15 = vmul.f32 0.1, %v427_v8  ;;  %v429_v18 = vld [vmem:[%s3815_s20 + $0x628] sm:$0xff] }
  0xff   : > { %2985 = vst [vmem:[%s3838_s21 + $0x608] sm:$0xff] %v2473_v10  ;;  %vm1452_vm4 = vcmp.gt.f32.partialorder %v940_v14, 0.0  ;;  %v1964_v16 = vmul.f32 0.1, %v428_v13  ;;  %v2474_v17 = vsel %vm1450_vm2, %v426_v6, %v1962_v11  ;;  %v941_v19 = vld [vmem:[%s3822_s18 + $0x628] sm:$0xff]  ;;  %v430_v20 = vld [vmem:[%s3815_s20 + $0x630] sm:$0xff] }
 0x100   : > { %2986 = vst [vmem:[%s3838_s21 + $0x610] sm:$0xff] %v2474_v17  ;;  %v2475_v21 = vsel %vm1451_vm3, %v427_v8, %v1963_v15  ;;  %vm1453_vm5 = vcmp.gt.f32.partialorder %v941_v19, 0.0  ;;  %v1965_v23 = vmul.f32 0.1, %v429_v18  ;;  %v942_v24 = vld [vmem:[%s3822_s18 + $0x630] sm:$0xff]  ;;  %v431_v25 = vld [vmem:[%s3815_s20 + $0x638] sm:$0xff] }
 0x101   : > { %v2476_v22 = vsel %vm1452_vm4, %v428_v13, %v1964_v16  ;;  %v943_v26 = vld [vmem:[%s3822_s18 + $0x638] sm:$0xff]  ;;  %2987 = vst [vmem:[%s3838_s21 + $0x618] sm:$0xff] %v2475_v21  ;;  %vm1454_vm6 = vcmp.gt.f32.partialorder %v942_v24, 0.0  ;;  %v1966_v27 = vmul.f32 0.1, %v430_v20  ;;  %v432_v30 = vld [vmem:[%s3815_s20 + $0x640] sm:$0xff] }
 0x102   : > { %2988 = vst [vmem:[%s3838_s21 + $0x620] sm:$0xff] %v2476_v22  ;;  %vm1455_vm7 = vcmp.gt.f32.partialorder %v943_v26, 0.0  ;;  %v1967_v28 = vmul.f32 0.1, %v431_v25  ;;  %v2477_v29 = vsel %vm1453_vm5, %v429_v18, %v1965_v23  ;;  %v944_v31 = vld [vmem:[%s3822_s18 + $0x640] sm:$0xff]  ;;  %v433_v32 = vld [vmem:[%s3815_s20 + $0x648] sm:$0xff] }
 0x103   : > { %2989 = vst [vmem:[%s3838_s21 + $0x628] sm:$0xff] %v2477_v29  ;;  %v2478_v33 = vsel %vm1454_vm6, %v430_v20, %v1966_v27  ;;  %vm1456_vm8 = vcmp.gt.f32.partialorder %v944_v31, 0.0  ;;  %v1968_v35 = vmul.f32 0.1, %v432_v30  ;;  %v945_v36 = vld [vmem:[%s3822_s18 + $0x648] sm:$0xff]  ;;  %v434_v37 = vld [vmem:[%s3815_s20 + $0x650] sm:$0xff] }
 0x104   : > { %v2479_v34 = vsel %vm1455_vm7, %v431_v25, %v1967_v28  ;;  %v946_v38 = vld [vmem:[%s3822_s18 + $0x650] sm:$0xff]  ;;  %2990 = vst [vmem:[%s3838_s21 + $0x630] sm:$0xff] %v2478_v33  ;;  %vm1457_vm9 = vcmp.gt.f32.partialorder %v945_v36, 0.0  ;;  %v1969_v39 = vmul.f32 0.1, %v433_v32  ;;  %v435_v42 = vld [vmem:[%s3815_s20 + $0x658] sm:$0xff] }
 0x105   : > { %2991 = vst [vmem:[%s3838_s21 + $0x638] sm:$0xff] %v2479_v34  ;;  %vm1458_vm10 = vcmp.gt.f32.partialorder %v946_v38, 0.0  ;;  %v1970_v40 = vmul.f32 0.1, %v434_v37  ;;  %v2480_v41 = vsel %vm1456_vm8, %v432_v30, %v1968_v35  ;;  %v947_v43 = vld [vmem:[%s3822_s18 + $0x658] sm:$0xff]  ;;  %v436_v44 = vld [vmem:[%s3815_s20 + $0x660] sm:$0xff] }
 0x106   : > { %2992 = vst [vmem:[%s3838_s21 + $0x640] sm:$0xff] %v2480_v41  ;;  %v2481_v45 = vsel %vm1457_vm9, %v433_v32, %v1969_v39  ;;  %vm1459_vm11 = vcmp.gt.f32.partialorder %v947_v43, 0.0  ;;  %v1971_v47 = vmul.f32 0.1, %v435_v42  ;;  %v948_v48 = vld [vmem:[%s3822_s18 + $0x660] sm:$0xff]  ;;  %v437_v49 = vld [vmem:[%s3815_s20 + $0x668] sm:$0xff] }
 0x107   : > { %v2482_v46 = vsel %vm1458_vm10, %v434_v37, %v1970_v40  ;;  %v949_v50 = vld [vmem:[%s3822_s18 + $0x668] sm:$0xff]  ;;  %2993 = vst [vmem:[%s3838_s21 + $0x648] sm:$0xff] %v2481_v45  ;;  %vm1460_vm12 = vcmp.gt.f32.partialorder %v948_v48, 0.0  ;;  %v1972_v51 = vmul.f32 0.1, %v436_v44  ;;  %v438_v54 = vld [vmem:[%s3815_s20 + $0x670] sm:$0xff] }
 0x108   : > { %2994 = vst [vmem:[%s3838_s21 + $0x650] sm:$0xff] %v2482_v46  ;;  %vm1461_vm13 = vcmp.gt.f32.partialorder %v949_v50, 0.0  ;;  %v1973_v52 = vmul.f32 0.1, %v437_v49  ;;  %v2483_v53 = vsel %vm1459_vm11, %v435_v42, %v1971_v47  ;;  %v950_v55 = vld [vmem:[%s3822_s18 + $0x670] sm:$0xff]  ;;  %v439_v56 = vld [vmem:[%s3815_s20 + $0x678] sm:$0xff] }
 0x109   : > { %2995 = vst [vmem:[%s3838_s21 + $0x658] sm:$0xff] %v2483_v53  ;;  %v2484_v57 = vsel %vm1460_vm12, %v436_v44, %v1972_v51  ;;  %vm1462_vm14 = vcmp.gt.f32.partialorder %v950_v55, 0.0  ;;  %v1974_v59 = vmul.f32 0.1, %v438_v54  ;;  %v951_v60 = vld [vmem:[%s3822_s18 + $0x678] sm:$0xff]  ;;  %v440_v61 = vld [vmem:[%s3815_s20 + $0x680] sm:$0xff] }
 0x10a   : > { %v2485_v58 = vsel %vm1461_vm13, %v437_v49, %v1973_v52  ;;  %v952_v62 = vld [vmem:[%s3822_s18 + $0x680] sm:$0xff]  ;;  %2996 = vst [vmem:[%s3838_s21 + $0x660] sm:$0xff] %v2484_v57  ;;  %vm1463_vm15 = vcmp.gt.f32.partialorder %v951_v60, 0.0  ;;  %v1975_v63 = vmul.f32 0.1, %v439_v56  ;;  %v441_v2 = vld [vmem:[%s3815_s20 + $0x688] sm:$0xff] }
 0x10b   : > { %2997 = vst [vmem:[%s3838_s21 + $0x668] sm:$0xff] %v2485_v58  ;;  %vm1464_vm0 = vcmp.gt.f32.partialorder %v952_v62, 0.0  ;;  %v1976_v0 = vmul.f32 0.1, %v440_v61  ;;  %v2486_v1 = vsel %vm1462_vm14, %v438_v54, %v1974_v59  ;;  %v953_v3 = vld [vmem:[%s3822_s18 + $0x688] sm:$0xff]  ;;  %v442_v4 = vld [vmem:[%s3815_s20 + $0x690] sm:$0xff] }
 0x10c   : > { %2998 = vst [vmem:[%s3838_s21 + $0x670] sm:$0xff] %v2486_v1  ;;  %v2487_v5 = vsel %vm1463_vm15, %v439_v56, %v1975_v63  ;;  %vm1465_vm1 = vcmp.gt.f32.partialorder %v953_v3, 0.0  ;;  %v1977_v7 = vmul.f32 0.1, %v441_v2  ;;  %v954_v8 = vld [vmem:[%s3822_s18 + $0x690] sm:$0xff]  ;;  %v443_v9 = vld [vmem:[%s3815_s20 + $0x698] sm:$0xff] }
 0x10d   : > { %v2488_v6 = vsel %vm1464_vm0, %v440_v61, %v1976_v0  ;;  %v955_v10 = vld [vmem:[%s3822_s18 + $0x698] sm:$0xff]  ;;  %2999 = vst [vmem:[%s3838_s21 + $0x678] sm:$0xff] %v2487_v5  ;;  %vm1466_vm2 = vcmp.gt.f32.partialorder %v954_v8, 0.0  ;;  %v1978_v11 = vmul.f32 0.1, %v442_v4  ;;  %v444_v14 = vld [vmem:[%s3815_s20 + $0x6a0] sm:$0xff] }
 0x10e   : > { %3000 = vst [vmem:[%s3838_s21 + $0x680] sm:$0xff] %v2488_v6  ;;  %vm1467_vm3 = vcmp.gt.f32.partialorder %v955_v10, 0.0  ;;  %v1979_v12 = vmul.f32 0.1, %v443_v9  ;;  %v2489_v13 = vsel %vm1465_vm1, %v441_v2, %v1977_v7  ;;  %v956_v15 = vld [vmem:[%s3822_s18 + $0x6a0] sm:$0xff]  ;;  %v445_v16 = vld [vmem:[%s3815_s20 + $0x6a8] sm:$0xff] }
 0x10f   : > { %3001 = vst [vmem:[%s3838_s21 + $0x688] sm:$0xff] %v2489_v13  ;;  %v2490_v17 = vsel %vm1466_vm2, %v442_v4, %v1978_v11  ;;  %vm1468_vm4 = vcmp.gt.f32.partialorder %v956_v15, 0.0  ;;  %v1980_v19 = vmul.f32 0.1, %v444_v14  ;;  %v957_v20 = vld [vmem:[%s3822_s18 + $0x6a8] sm:$0xff]  ;;  %v446_v21 = vld [vmem:[%s3815_s20 + $0x6b0] sm:$0xff] }
 0x110   : > { %v2491_v18 = vsel %vm1467_vm3, %v443_v9, %v1979_v12  ;;  %v958_v22 = vld [vmem:[%s3822_s18 + $0x6b0] sm:$0xff]  ;;  %3002 = vst [vmem:[%s3838_s21 + $0x690] sm:$0xff] %v2490_v17  ;;  %vm1469_vm5 = vcmp.gt.f32.partialorder %v957_v20, 0.0  ;;  %v1981_v23 = vmul.f32 0.1, %v445_v16  ;;  %v447_v26 = vld [vmem:[%s3815_s20 + $0x6b8] sm:$0xff] }
 0x111   : > { %3003 = vst [vmem:[%s3838_s21 + $0x698] sm:$0xff] %v2491_v18  ;;  %vm1470_vm6 = vcmp.gt.f32.partialorder %v958_v22, 0.0  ;;  %v1982_v24 = vmul.f32 0.1, %v446_v21  ;;  %v2492_v25 = vsel %vm1468_vm4, %v444_v14, %v1980_v19  ;;  %v959_v27 = vld [vmem:[%s3822_s18 + $0x6b8] sm:$0xff]  ;;  %v448_v28 = vld [vmem:[%s3815_s20 + $0x6c0] sm:$0xff] }
 0x112   : > { %3004 = vst [vmem:[%s3838_s21 + $0x6a0] sm:$0xff] %v2492_v25  ;;  %v2493_v29 = vsel %vm1469_vm5, %v445_v16, %v1981_v23  ;;  %vm1471_vm7 = vcmp.gt.f32.partialorder %v959_v27, 0.0  ;;  %v1983_v31 = vmul.f32 0.1, %v447_v26  ;;  %v960_v32 = vld [vmem:[%s3822_s18 + $0x6c0] sm:$0xff]  ;;  %v449_v33 = vld [vmem:[%s3815_s20 + $0x6c8] sm:$0xff] }
 0x113   : > { %v2494_v30 = vsel %vm1470_vm6, %v446_v21, %v1982_v24  ;;  %v961_v34 = vld [vmem:[%s3822_s18 + $0x6c8] sm:$0xff]  ;;  %3005 = vst [vmem:[%s3838_s21 + $0x6a8] sm:$0xff] %v2493_v29  ;;  %vm1472_vm8 = vcmp.gt.f32.partialorder %v960_v32, 0.0  ;;  %v1984_v35 = vmul.f32 0.1, %v448_v28  ;;  %v450_v38 = vld [vmem:[%s3815_s20 + $0x6d0] sm:$0xff] }
 0x114   : > { %3006 = vst [vmem:[%s3838_s21 + $0x6b0] sm:$0xff] %v2494_v30  ;;  %vm1473_vm9 = vcmp.gt.f32.partialorder %v961_v34, 0.0  ;;  %v1985_v36 = vmul.f32 0.1, %v449_v33  ;;  %v2495_v37 = vsel %vm1471_vm7, %v447_v26, %v1983_v31  ;;  %v962_v39 = vld [vmem:[%s3822_s18 + $0x6d0] sm:$0xff]  ;;  %v451_v40 = vld [vmem:[%s3815_s20 + $0x6d8] sm:$0xff] }
 0x115   : > { %3007 = vst [vmem:[%s3838_s21 + $0x6b8] sm:$0xff] %v2495_v37  ;;  %v2496_v41 = vsel %vm1472_vm8, %v448_v28, %v1984_v35  ;;  %vm1474_vm10 = vcmp.gt.f32.partialorder %v962_v39, 0.0  ;;  %v1986_v43 = vmul.f32 0.1, %v450_v38  ;;  %v963_v44 = vld [vmem:[%s3822_s18 + $0x6d8] sm:$0xff]  ;;  %v452_v45 = vld [vmem:[%s3815_s20 + $0x6e0] sm:$0xff] }
 0x116   : > { %v2497_v42 = vsel %vm1473_vm9, %v449_v33, %v1985_v36  ;;  %v964_v46 = vld [vmem:[%s3822_s18 + $0x6e0] sm:$0xff]  ;;  %3008 = vst [vmem:[%s3838_s21 + $0x6c0] sm:$0xff] %v2496_v41  ;;  %vm1475_vm11 = vcmp.gt.f32.partialorder %v963_v44, 0.0  ;;  %v1987_v47 = vmul.f32 0.1, %v451_v40  ;;  %v453_v50 = vld [vmem:[%s3815_s20 + $0x6e8] sm:$0xff] }
 0x117   : > { %3009 = vst [vmem:[%s3838_s21 + $0x6c8] sm:$0xff] %v2497_v42  ;;  %vm1476_vm12 = vcmp.gt.f32.partialorder %v964_v46, 0.0  ;;  %v1988_v48 = vmul.f32 0.1, %v452_v45  ;;  %v2498_v49 = vsel %vm1474_vm10, %v450_v38, %v1986_v43  ;;  %v965_v51 = vld [vmem:[%s3822_s18 + $0x6e8] sm:$0xff]  ;;  %v454_v52 = vld [vmem:[%s3815_s20 + $0x6f0] sm:$0xff] }
 0x118   : > { %3010 = vst [vmem:[%s3838_s21 + $0x6d0] sm:$0xff] %v2498_v49  ;;  %v2499_v53 = vsel %vm1475_vm11, %v451_v40, %v1987_v47  ;;  %vm1477_vm13 = vcmp.gt.f32.partialorder %v965_v51, 0.0  ;;  %v1989_v55 = vmul.f32 0.1, %v453_v50  ;;  %v966_v56 = vld [vmem:[%s3822_s18 + $0x6f0] sm:$0xff]  ;;  %v455_v57 = vld [vmem:[%s3815_s20 + $0x6f8] sm:$0xff] }
 0x119   : > { %v2500_v54 = vsel %vm1476_vm12, %v452_v45, %v1988_v48  ;;  %v967_v58 = vld [vmem:[%s3822_s18 + $0x6f8] sm:$0xff]  ;;  %3011 = vst [vmem:[%s3838_s21 + $0x6d8] sm:$0xff] %v2499_v53  ;;  %vm1478_vm14 = vcmp.gt.f32.partialorder %v966_v56, 0.0  ;;  %v1990_v59 = vmul.f32 0.1, %v454_v52  ;;  %v456_v62 = vld [vmem:[%s3815_s20 + $0x700] sm:$0xff] }
 0x11a   : > { %3012 = vst [vmem:[%s3838_s21 + $0x6e0] sm:$0xff] %v2500_v54  ;;  %vm1479_vm15 = vcmp.gt.f32.partialorder %v967_v58, 0.0  ;;  %v1991_v60 = vmul.f32 0.1, %v455_v57  ;;  %v2501_v61 = vsel %vm1477_vm13, %v453_v50, %v1989_v55  ;;  %v968_v63 = vld [vmem:[%s3822_s18 + $0x700] sm:$0xff]  ;;  %v457_v0 = vld [vmem:[%s3815_s20 + $0x708] sm:$0xff] }
 0x11b   : > { %3013 = vst [vmem:[%s3838_s21 + $0x6e8] sm:$0xff] %v2501_v61  ;;  %v2502_v1 = vsel %vm1478_vm14, %v454_v52, %v1990_v59  ;;  %vm1480_vm0 = vcmp.gt.f32.partialorder %v968_v63, 0.0  ;;  %v1992_v3 = vmul.f32 0.1, %v456_v62  ;;  %v969_v4 = vld [vmem:[%s3822_s18 + $0x708] sm:$0xff]  ;;  %v458_v5 = vld [vmem:[%s3815_s20 + $0x710] sm:$0xff] }
 0x11c   : > { %v2503_v2 = vsel %vm1479_vm15, %v455_v57, %v1991_v60  ;;  %v970_v6 = vld [vmem:[%s3822_s18 + $0x710] sm:$0xff]  ;;  %3014 = vst [vmem:[%s3838_s21 + $0x6f0] sm:$0xff] %v2502_v1  ;;  %vm1481_vm1 = vcmp.gt.f32.partialorder %v969_v4, 0.0  ;;  %v1993_v7 = vmul.f32 0.1, %v457_v0  ;;  %v459_v10 = vld [vmem:[%s3815_s20 + $0x718] sm:$0xff] }
 0x11d   : > { %3015 = vst [vmem:[%s3838_s21 + $0x6f8] sm:$0xff] %v2503_v2  ;;  %vm1482_vm2 = vcmp.gt.f32.partialorder %v970_v6, 0.0  ;;  %v1994_v8 = vmul.f32 0.1, %v458_v5  ;;  %v2504_v9 = vsel %vm1480_vm0, %v456_v62, %v1992_v3  ;;  %v971_v11 = vld [vmem:[%s3822_s18 + $0x718] sm:$0xff]  ;;  %v460_v12 = vld [vmem:[%s3815_s20 + $0x720] sm:$0xff] }
 0x11e   : > { %3016 = vst [vmem:[%s3838_s21 + $0x700] sm:$0xff] %v2504_v9  ;;  %v2505_v13 = vsel %vm1481_vm1, %v457_v0, %v1993_v7  ;;  %vm1483_vm3 = vcmp.gt.f32.partialorder %v971_v11, 0.0  ;;  %v1995_v15 = vmul.f32 0.1, %v459_v10  ;;  %v972_v16 = vld [vmem:[%s3822_s18 + $0x720] sm:$0xff]  ;;  %v461_v17 = vld [vmem:[%s3815_s20 + $0x728] sm:$0xff] }
 0x11f   : > { %v2506_v14 = vsel %vm1482_vm2, %v458_v5, %v1994_v8  ;;  %v973_v18 = vld [vmem:[%s3822_s18 + $0x728] sm:$0xff]  ;;  %3017 = vst [vmem:[%s3838_s21 + $0x708] sm:$0xff] %v2505_v13  ;;  %vm1484_vm4 = vcmp.gt.f32.partialorder %v972_v16, 0.0  ;;  %v1996_v19 = vmul.f32 0.1, %v460_v12  ;;  %v462_v22 = vld [vmem:[%s3815_s20 + $0x730] sm:$0xff] }
 0x120   : > { %3018 = vst [vmem:[%s3838_s21 + $0x710] sm:$0xff] %v2506_v14  ;;  %vm1485_vm5 = vcmp.gt.f32.partialorder %v973_v18, 0.0  ;;  %v1997_v20 = vmul.f32 0.1, %v461_v17  ;;  %v2507_v21 = vsel %vm1483_vm3, %v459_v10, %v1995_v15  ;;  %v974_v23 = vld [vmem:[%s3822_s18 + $0x730] sm:$0xff]  ;;  %v463_v24 = vld [vmem:[%s3815_s20 + $0x738] sm:$0xff] }
 0x121   : > { %3019 = vst [vmem:[%s3838_s21 + $0x718] sm:$0xff] %v2507_v21  ;;  %v2508_v25 = vsel %vm1484_vm4, %v460_v12, %v1996_v19  ;;  %vm1486_vm6 = vcmp.gt.f32.partialorder %v974_v23, 0.0  ;;  %v1998_v27 = vmul.f32 0.1, %v462_v22  ;;  %v975_v28 = vld [vmem:[%s3822_s18 + $0x738] sm:$0xff]  ;;  %v464_v29 = vld [vmem:[%s3815_s20 + $0x740] sm:$0xff] }
 0x122   : > { %v2509_v26 = vsel %vm1485_vm5, %v461_v17, %v1997_v20  ;;  %v976_v30 = vld [vmem:[%s3822_s18 + $0x740] sm:$0xff]  ;;  %3020 = vst [vmem:[%s3838_s21 + $0x720] sm:$0xff] %v2508_v25  ;;  %vm1487_vm7 = vcmp.gt.f32.partialorder %v975_v28, 0.0  ;;  %v1999_v31 = vmul.f32 0.1, %v463_v24  ;;  %v465_v34 = vld [vmem:[%s3815_s20 + $0x748] sm:$0xff] }
 0x123   : > { %3021 = vst [vmem:[%s3838_s21 + $0x728] sm:$0xff] %v2509_v26  ;;  %vm1488_vm8 = vcmp.gt.f32.partialorder %v976_v30, 0.0  ;;  %v2000_v32 = vmul.f32 0.1, %v464_v29  ;;  %v2510_v33 = vsel %vm1486_vm6, %v462_v22, %v1998_v27  ;;  %v977_v35 = vld [vmem:[%s3822_s18 + $0x748] sm:$0xff]  ;;  %v466_v36 = vld [vmem:[%s3815_s20 + $0x750] sm:$0xff] }
 0x124   : > { %3022 = vst [vmem:[%s3838_s21 + $0x730] sm:$0xff] %v2510_v33  ;;  %v2511_v37 = vsel %vm1487_vm7, %v463_v24, %v1999_v31  ;;  %vm1489_vm9 = vcmp.gt.f32.partialorder %v977_v35, 0.0  ;;  %v2001_v39 = vmul.f32 0.1, %v465_v34  ;;  %v978_v40 = vld [vmem:[%s3822_s18 + $0x750] sm:$0xff]  ;;  %v467_v41 = vld [vmem:[%s3815_s20 + $0x758] sm:$0xff] }
 0x125   : > { %v2512_v38 = vsel %vm1488_vm8, %v464_v29, %v2000_v32  ;;  %v979_v42 = vld [vmem:[%s3822_s18 + $0x758] sm:$0xff]  ;;  %3023 = vst [vmem:[%s3838_s21 + $0x738] sm:$0xff] %v2511_v37  ;;  %vm1490_vm10 = vcmp.gt.f32.partialorder %v978_v40, 0.0  ;;  %v2002_v43 = vmul.f32 0.1, %v466_v36  ;;  %v468_v46 = vld [vmem:[%s3815_s20 + $0x760] sm:$0xff] }
 0x126   : > { %3024 = vst [vmem:[%s3838_s21 + $0x740] sm:$0xff] %v2512_v38  ;;  %vm1491_vm11 = vcmp.gt.f32.partialorder %v979_v42, 0.0  ;;  %v2003_v44 = vmul.f32 0.1, %v467_v41  ;;  %v2513_v45 = vsel %vm1489_vm9, %v465_v34, %v2001_v39  ;;  %v980_v47 = vld [vmem:[%s3822_s18 + $0x760] sm:$0xff]  ;;  %v469_v48 = vld [vmem:[%s3815_s20 + $0x768] sm:$0xff] }
 0x127   : > { %3025 = vst [vmem:[%s3838_s21 + $0x748] sm:$0xff] %v2513_v45  ;;  %v2514_v49 = vsel %vm1490_vm10, %v466_v36, %v2002_v43  ;;  %vm1492_vm12 = vcmp.gt.f32.partialorder %v980_v47, 0.0  ;;  %v2004_v51 = vmul.f32 0.1, %v468_v46  ;;  %v981_v52 = vld [vmem:[%s3822_s18 + $0x768] sm:$0xff]  ;;  %v470_v53 = vld [vmem:[%s3815_s20 + $0x770] sm:$0xff] }
 0x128   : > { %v2515_v50 = vsel %vm1491_vm11, %v467_v41, %v2003_v44  ;;  %v982_v54 = vld [vmem:[%s3822_s18 + $0x770] sm:$0xff]  ;;  %3026 = vst [vmem:[%s3838_s21 + $0x750] sm:$0xff] %v2514_v49  ;;  %vm1493_vm13 = vcmp.gt.f32.partialorder %v981_v52, 0.0  ;;  %v2005_v55 = vmul.f32 0.1, %v469_v48  ;;  %v471_v58 = vld [vmem:[%s3815_s20 + $0x778] sm:$0xff] }
 0x129   : > { %3027 = vst [vmem:[%s3838_s21 + $0x758] sm:$0xff] %v2515_v50  ;;  %vm1494_vm14 = vcmp.gt.f32.partialorder %v982_v54, 0.0  ;;  %v2006_v56 = vmul.f32 0.1, %v470_v53  ;;  %v2516_v57 = vsel %vm1492_vm12, %v468_v46, %v2004_v51  ;;  %v983_v59 = vld [vmem:[%s3822_s18 + $0x778] sm:$0xff]  ;;  %v472_v60 = vld [vmem:[%s3815_s20 + $0x780] sm:$0xff] }
 0x12a   : > { %3028 = vst [vmem:[%s3838_s21 + $0x760] sm:$0xff] %v2516_v57  ;;  %v2517_v61 = vsel %vm1493_vm13, %v469_v48, %v2005_v55  ;;  %vm1495_vm15 = vcmp.gt.f32.partialorder %v983_v59, 0.0  ;;  %v2007_v63 = vmul.f32 0.1, %v471_v58  ;;  %v984_v0 = vld [vmem:[%s3822_s18 + $0x780] sm:$0xff]  ;;  %v473_v1 = vld [vmem:[%s3815_s20 + $0x788] sm:$0xff] }
 0x12b   : > { %v2518_v62 = vsel %vm1494_vm14, %v470_v53, %v2006_v56  ;;  %v985_v2 = vld [vmem:[%s3822_s18 + $0x788] sm:$0xff]  ;;  %3029 = vst [vmem:[%s3838_s21 + $0x768] sm:$0xff] %v2517_v61  ;;  %vm1496_vm0 = vcmp.gt.f32.partialorder %v984_v0, 0.0  ;;  %v2008_v3 = vmul.f32 0.1, %v472_v60  ;;  %v474_v6 = vld [vmem:[%s3815_s20 + $0x790] sm:$0xff] }
 0x12c   : > { %3030 = vst [vmem:[%s3838_s21 + $0x770] sm:$0xff] %v2518_v62  ;;  %vm1497_vm1 = vcmp.gt.f32.partialorder %v985_v2, 0.0  ;;  %v2009_v4 = vmul.f32 0.1, %v473_v1  ;;  %v2519_v5 = vsel %vm1495_vm15, %v471_v58, %v2007_v63  ;;  %v986_v7 = vld [vmem:[%s3822_s18 + $0x790] sm:$0xff]  ;;  %v475_v8 = vld [vmem:[%s3815_s20 + $0x798] sm:$0xff] }
 0x12d   : > { %3031 = vst [vmem:[%s3838_s21 + $0x778] sm:$0xff] %v2519_v5  ;;  %v2520_v9 = vsel %vm1496_vm0, %v472_v60, %v2008_v3  ;;  %vm1498_vm2 = vcmp.gt.f32.partialorder %v986_v7, 0.0  ;;  %v2010_v11 = vmul.f32 0.1, %v474_v6  ;;  %v987_v12 = vld [vmem:[%s3822_s18 + $0x798] sm:$0xff]  ;;  %v476_v13 = vld [vmem:[%s3815_s20 + $0x7a0] sm:$0xff] }
 0x12e   : > { %v2521_v10 = vsel %vm1497_vm1, %v473_v1, %v2009_v4  ;;  %v988_v14 = vld [vmem:[%s3822_s18 + $0x7a0] sm:$0xff]  ;;  %3032 = vst [vmem:[%s3838_s21 + $0x780] sm:$0xff] %v2520_v9  ;;  %vm1499_vm3 = vcmp.gt.f32.partialorder %v987_v12, 0.0  ;;  %v2011_v15 = vmul.f32 0.1, %v475_v8  ;;  %v477_v18 = vld [vmem:[%s3815_s20 + $0x7a8] sm:$0xff] }
 0x12f   : > { %3033 = vst [vmem:[%s3838_s21 + $0x788] sm:$0xff] %v2521_v10  ;;  %vm1500_vm4 = vcmp.gt.f32.partialorder %v988_v14, 0.0  ;;  %v2012_v16 = vmul.f32 0.1, %v476_v13  ;;  %v2522_v17 = vsel %vm1498_vm2, %v474_v6, %v2010_v11  ;;  %v989_v19 = vld [vmem:[%s3822_s18 + $0x7a8] sm:$0xff]  ;;  %v478_v20 = vld [vmem:[%s3815_s20 + $0x7b0] sm:$0xff] }
 0x130   : > { %3034 = vst [vmem:[%s3838_s21 + $0x790] sm:$0xff] %v2522_v17  ;;  %v2523_v21 = vsel %vm1499_vm3, %v475_v8, %v2011_v15  ;;  %vm1501_vm5 = vcmp.gt.f32.partialorder %v989_v19, 0.0  ;;  %v2013_v23 = vmul.f32 0.1, %v477_v18  ;;  %v990_v24 = vld [vmem:[%s3822_s18 + $0x7b0] sm:$0xff]  ;;  %v479_v25 = vld [vmem:[%s3815_s20 + $0x7b8] sm:$0xff] }
 0x131   : > { %v2524_v22 = vsel %vm1500_vm4, %v476_v13, %v2012_v16  ;;  %v991_v26 = vld [vmem:[%s3822_s18 + $0x7b8] sm:$0xff]  ;;  %3035 = vst [vmem:[%s3838_s21 + $0x798] sm:$0xff] %v2523_v21  ;;  %vm1502_vm6 = vcmp.gt.f32.partialorder %v990_v24, 0.0  ;;  %v2014_v27 = vmul.f32 0.1, %v478_v20  ;;  %v480_v30 = vld [vmem:[%s3815_s20 + $0x7c0] sm:$0xff] }
 0x132   : > { %3036 = vst [vmem:[%s3838_s21 + $0x7a0] sm:$0xff] %v2524_v22  ;;  %vm1503_vm7 = vcmp.gt.f32.partialorder %v991_v26, 0.0  ;;  %v2015_v28 = vmul.f32 0.1, %v479_v25  ;;  %v2525_v29 = vsel %vm1501_vm5, %v477_v18, %v2013_v23  ;;  %v992_v31 = vld [vmem:[%s3822_s18 + $0x7c0] sm:$0xff]  ;;  %v481_v32 = vld [vmem:[%s3815_s20 + $0x7c8] sm:$0xff] }
 0x133   : > { %3037 = vst [vmem:[%s3838_s21 + $0x7a8] sm:$0xff] %v2525_v29  ;;  %v2526_v33 = vsel %vm1502_vm6, %v478_v20, %v2014_v27  ;;  %vm1504_vm8 = vcmp.gt.f32.partialorder %v992_v31, 0.0  ;;  %v2016_v35 = vmul.f32 0.1, %v480_v30  ;;  %v993_v36 = vld [vmem:[%s3822_s18 + $0x7c8] sm:$0xff]  ;;  %v482_v37 = vld [vmem:[%s3815_s20 + $0x7d0] sm:$0xff] }
 0x134   : > { %v2527_v34 = vsel %vm1503_vm7, %v479_v25, %v2015_v28  ;;  %v994_v38 = vld [vmem:[%s3822_s18 + $0x7d0] sm:$0xff]  ;;  %3038 = vst [vmem:[%s3838_s21 + $0x7b0] sm:$0xff] %v2526_v33  ;;  %vm1505_vm9 = vcmp.gt.f32.partialorder %v993_v36, 0.0  ;;  %v2017_v39 = vmul.f32 0.1, %v481_v32  ;;  %v483_v42 = vld [vmem:[%s3815_s20 + $0x7d8] sm:$0xff] }
 0x135   : > { %3039 = vst [vmem:[%s3838_s21 + $0x7b8] sm:$0xff] %v2527_v34  ;;  %vm1506_vm10 = vcmp.gt.f32.partialorder %v994_v38, 0.0  ;;  %v2018_v40 = vmul.f32 0.1, %v482_v37  ;;  %v2528_v41 = vsel %vm1504_vm8, %v480_v30, %v2016_v35  ;;  %v995_v43 = vld [vmem:[%s3822_s18 + $0x7d8] sm:$0xff]  ;;  %v484_v44 = vld [vmem:[%s3815_s20 + $0x7e0] sm:$0xff] }
 0x136   : > { %3040 = vst [vmem:[%s3838_s21 + $0x7c0] sm:$0xff] %v2528_v41  ;;  %v2529_v45 = vsel %vm1505_vm9, %v481_v32, %v2017_v39  ;;  %vm1507_vm11 = vcmp.gt.f32.partialorder %v995_v43, 0.0  ;;  %v2019_v47 = vmul.f32 0.1, %v483_v42  ;;  %v996_v48 = vld [vmem:[%s3822_s18 + $0x7e0] sm:$0xff]  ;;  %v485_v49 = vld [vmem:[%s3815_s20 + $0x7e8] sm:$0xff] }
 0x137   : > { %v2530_v46 = vsel %vm1506_vm10, %v482_v37, %v2018_v40  ;;  %v997_v50 = vld [vmem:[%s3822_s18 + $0x7e8] sm:$0xff]  ;;  %3041 = vst [vmem:[%s3838_s21 + $0x7c8] sm:$0xff] %v2529_v45  ;;  %vm1508_vm12 = vcmp.gt.f32.partialorder %v996_v48, 0.0  ;;  %v2020_v51 = vmul.f32 0.1, %v484_v44  ;;  %v486_v54 = vld [vmem:[%s3815_s20 + $0x7f0] sm:$0xff] }
 0x138   : > { %3042 = vst [vmem:[%s3838_s21 + $0x7d0] sm:$0xff] %v2530_v46  ;;  %vm1509_vm13 = vcmp.gt.f32.partialorder %v997_v50, 0.0  ;;  %v2021_v52 = vmul.f32 0.1, %v485_v49  ;;  %v2531_v53 = vsel %vm1507_vm11, %v483_v42, %v2019_v47  ;;  %v998_v55 = vld [vmem:[%s3822_s18 + $0x7f0] sm:$0xff]  ;;  %v487_v56 = vld [vmem:[%s3815_s20 + $0x7f8] sm:$0xff] }
 0x139   : > { %3043 = vst [vmem:[%s3838_s21 + $0x7d8] sm:$0xff] %v2531_v53  ;;  %v2532_v57 = vsel %vm1508_vm12, %v484_v44, %v2020_v51  ;;  %vm1510_vm14 = vcmp.gt.f32.partialorder %v998_v55, 0.0  ;;  %v2022_v59 = vmul.f32 0.1, %v486_v54  ;;  %v999_v60 = vld [vmem:[%s3822_s18 + $0x7f8] sm:$0xff]  ;;  %v488_v61 = vld [vmem:[%s3815_s20 + $0x800] sm:$0xff] }
 0x13a   : > { %v2533_v58 = vsel %vm1509_vm13, %v485_v49, %v2021_v52  ;;  %v1000_v62 = vld [vmem:[%s3822_s18 + $0x800] sm:$0xff]  ;;  %3044 = vst [vmem:[%s3838_s21 + $0x7e0] sm:$0xff] %v2532_v57  ;;  %vm1511_vm15 = vcmp.gt.f32.partialorder %v999_v60, 0.0  ;;  %v2023_v63 = vmul.f32 0.1, %v487_v56  ;;  %v489_v2 = vld [vmem:[%s3815_s20 + $0x808] sm:$0xff] }
 0x13b   : > { %3045 = vst [vmem:[%s3838_s21 + $0x7e8] sm:$0xff] %v2533_v58  ;;  %vm1512_vm0 = vcmp.gt.f32.partialorder %v1000_v62, 0.0  ;;  %v2024_v0 = vmul.f32 0.1, %v488_v61  ;;  %v2534_v1 = vsel %vm1510_vm14, %v486_v54, %v2022_v59  ;;  %v1001_v3 = vld [vmem:[%s3822_s18 + $0x808] sm:$0xff]  ;;  %v490_v4 = vld [vmem:[%s3815_s20 + $0x810] sm:$0xff] }
 0x13c   : > { %3046 = vst [vmem:[%s3838_s21 + $0x7f0] sm:$0xff] %v2534_v1  ;;  %v2535_v5 = vsel %vm1511_vm15, %v487_v56, %v2023_v63  ;;  %vm1513_vm1 = vcmp.gt.f32.partialorder %v1001_v3, 0.0  ;;  %v2025_v7 = vmul.f32 0.1, %v489_v2  ;;  %v1002_v8 = vld [vmem:[%s3822_s18 + $0x810] sm:$0xff]  ;;  %v491_v9 = vld [vmem:[%s3815_s20 + $0x818] sm:$0xff] }
 0x13d   : > { %v2536_v6 = vsel %vm1512_vm0, %v488_v61, %v2024_v0  ;;  %v1003_v10 = vld [vmem:[%s3822_s18 + $0x818] sm:$0xff]  ;;  %3047 = vst [vmem:[%s3838_s21 + $0x7f8] sm:$0xff] %v2535_v5  ;;  %vm1514_vm2 = vcmp.gt.f32.partialorder %v1002_v8, 0.0  ;;  %v2026_v11 = vmul.f32 0.1, %v490_v4  ;;  %v492_v14 = vld [vmem:[%s3815_s20 + $0x820] sm:$0xff] }
 0x13e   : > { %3048 = vst [vmem:[%s3838_s21 + $0x800] sm:$0xff] %v2536_v6  ;;  %vm1515_vm3 = vcmp.gt.f32.partialorder %v1003_v10, 0.0  ;;  %v2027_v12 = vmul.f32 0.1, %v491_v9  ;;  %v2537_v13 = vsel %vm1513_vm1, %v489_v2, %v2025_v7  ;;  %v1004_v15 = vld [vmem:[%s3822_s18 + $0x820] sm:$0xff]  ;;  %v493_v16 = vld [vmem:[%s3815_s20 + $0x828] sm:$0xff] }
 0x13f   : > { %3049 = vst [vmem:[%s3838_s21 + $0x808] sm:$0xff] %v2537_v13  ;;  %v2538_v17 = vsel %vm1514_vm2, %v490_v4, %v2026_v11  ;;  %vm1516_vm4 = vcmp.gt.f32.partialorder %v1004_v15, 0.0  ;;  %v2028_v19 = vmul.f32 0.1, %v492_v14  ;;  %v1005_v20 = vld [vmem:[%s3822_s18 + $0x828] sm:$0xff]  ;;  %v494_v21 = vld [vmem:[%s3815_s20 + $0x830] sm:$0xff] }
 0x140   : > { %v2539_v18 = vsel %vm1515_vm3, %v491_v9, %v2027_v12  ;;  %v1006_v22 = vld [vmem:[%s3822_s18 + $0x830] sm:$0xff]  ;;  %3050 = vst [vmem:[%s3838_s21 + $0x810] sm:$0xff] %v2538_v17  ;;  %vm1517_vm5 = vcmp.gt.f32.partialorder %v1005_v20, 0.0  ;;  %v2029_v23 = vmul.f32 0.1, %v493_v16  ;;  %v495_v26 = vld [vmem:[%s3815_s20 + $0x838] sm:$0xff] }
 0x141   : > { %3051 = vst [vmem:[%s3838_s21 + $0x818] sm:$0xff] %v2539_v18  ;;  %vm1518_vm6 = vcmp.gt.f32.partialorder %v1006_v22, 0.0  ;;  %v2030_v24 = vmul.f32 0.1, %v494_v21  ;;  %v2540_v25 = vsel %vm1516_vm4, %v492_v14, %v2028_v19  ;;  %v1007_v27 = vld [vmem:[%s3822_s18 + $0x838] sm:$0xff]  ;;  %v496_v28 = vld [vmem:[%s3815_s20 + $0x840] sm:$0xff] }
 0x142   : > { %3052 = vst [vmem:[%s3838_s21 + $0x820] sm:$0xff] %v2540_v25  ;;  %v2541_v29 = vsel %vm1517_vm5, %v493_v16, %v2029_v23  ;;  %vm1519_vm7 = vcmp.gt.f32.partialorder %v1007_v27, 0.0  ;;  %v2031_v31 = vmul.f32 0.1, %v495_v26  ;;  %v1008_v32 = vld [vmem:[%s3822_s18 + $0x840] sm:$0xff]  ;;  %v497_v33 = vld [vmem:[%s3815_s20 + $0x848] sm:$0xff] }
 0x143   : > { %v2542_v30 = vsel %vm1518_vm6, %v494_v21, %v2030_v24  ;;  %v1009_v34 = vld [vmem:[%s3822_s18 + $0x848] sm:$0xff]  ;;  %3053 = vst [vmem:[%s3838_s21 + $0x828] sm:$0xff] %v2541_v29  ;;  %vm1520_vm8 = vcmp.gt.f32.partialorder %v1008_v32, 0.0  ;;  %v2032_v35 = vmul.f32 0.1, %v496_v28  ;;  %v498_v38 = vld [vmem:[%s3815_s20 + $0x850] sm:$0xff] }
 0x144   : > { %3054 = vst [vmem:[%s3838_s21 + $0x830] sm:$0xff] %v2542_v30  ;;  %vm1521_vm9 = vcmp.gt.f32.partialorder %v1009_v34, 0.0  ;;  %v2033_v36 = vmul.f32 0.1, %v497_v33  ;;  %v2543_v37 = vsel %vm1519_vm7, %v495_v26, %v2031_v31  ;;  %v1010_v39 = vld [vmem:[%s3822_s18 + $0x850] sm:$0xff]  ;;  %v499_v40 = vld [vmem:[%s3815_s20 + $0x858] sm:$0xff] }
 0x145   : > { %3055 = vst [vmem:[%s3838_s21 + $0x838] sm:$0xff] %v2543_v37  ;;  %v2544_v41 = vsel %vm1520_vm8, %v496_v28, %v2032_v35  ;;  %vm1522_vm10 = vcmp.gt.f32.partialorder %v1010_v39, 0.0  ;;  %v2034_v43 = vmul.f32 0.1, %v498_v38  ;;  %v1011_v44 = vld [vmem:[%s3822_s18 + $0x858] sm:$0xff]  ;;  %v500_v45 = vld [vmem:[%s3815_s20 + $0x860] sm:$0xff] }
 0x146   : > { %v2545_v42 = vsel %vm1521_vm9, %v497_v33, %v2033_v36  ;;  %v1012_v46 = vld [vmem:[%s3822_s18 + $0x860] sm:$0xff]  ;;  %3056 = vst [vmem:[%s3838_s21 + $0x840] sm:$0xff] %v2544_v41  ;;  %vm1523_vm11 = vcmp.gt.f32.partialorder %v1011_v44, 0.0  ;;  %v2035_v47 = vmul.f32 0.1, %v499_v40  ;;  %v501_v50 = vld [vmem:[%s3815_s20 + $0x868] sm:$0xff] }
 0x147   : > { %3057 = vst [vmem:[%s3838_s21 + $0x848] sm:$0xff] %v2545_v42  ;;  %vm1524_vm12 = vcmp.gt.f32.partialorder %v1012_v46, 0.0  ;;  %v2036_v48 = vmul.f32 0.1, %v500_v45  ;;  %v2546_v49 = vsel %vm1522_vm10, %v498_v38, %v2034_v43  ;;  %v1013_v51 = vld [vmem:[%s3822_s18 + $0x868] sm:$0xff]  ;;  %v502_v52 = vld [vmem:[%s3815_s20 + $0x870] sm:$0xff] }
 0x148   : > { %3058 = vst [vmem:[%s3838_s21 + $0x850] sm:$0xff] %v2546_v49  ;;  %v2547_v53 = vsel %vm1523_vm11, %v499_v40, %v2035_v47  ;;  %vm1525_vm13 = vcmp.gt.f32.partialorder %v1013_v51, 0.0  ;;  %v2037_v55 = vmul.f32 0.1, %v501_v50  ;;  %v1014_v56 = vld [vmem:[%s3822_s18 + $0x870] sm:$0xff]  ;;  %v503_v57 = vld [vmem:[%s3815_s20 + $0x878] sm:$0xff] }
 0x149   : > { %v2548_v54 = vsel %vm1524_vm12, %v500_v45, %v2036_v48  ;;  %v1015_v58 = vld [vmem:[%s3822_s18 + $0x878] sm:$0xff]  ;;  %3059 = vst [vmem:[%s3838_s21 + $0x858] sm:$0xff] %v2547_v53  ;;  %vm1526_vm14 = vcmp.gt.f32.partialorder %v1014_v56, 0.0  ;;  %v2038_v59 = vmul.f32 0.1, %v502_v52  ;;  %v504_v62 = vld [vmem:[%s3815_s20 + $0x880] sm:$0xff] }
 0x14a   : > { %3060 = vst [vmem:[%s3838_s21 + $0x860] sm:$0xff] %v2548_v54  ;;  %vm1527_vm15 = vcmp.gt.f32.partialorder %v1015_v58, 0.0  ;;  %v2039_v60 = vmul.f32 0.1, %v503_v57  ;;  %v2549_v61 = vsel %vm1525_vm13, %v501_v50, %v2037_v55  ;;  %v1016_v63 = vld [vmem:[%s3822_s18 + $0x880] sm:$0xff]  ;;  %v505_v0 = vld [vmem:[%s3815_s20 + $0x888] sm:$0xff] }
 0x14b   : > { %3061 = vst [vmem:[%s3838_s21 + $0x868] sm:$0xff] %v2549_v61  ;;  %v2550_v1 = vsel %vm1526_vm14, %v502_v52, %v2038_v59  ;;  %vm1528_vm0 = vcmp.gt.f32.partialorder %v1016_v63, 0.0  ;;  %v2040_v3 = vmul.f32 0.1, %v504_v62  ;;  %v1017_v4 = vld [vmem:[%s3822_s18 + $0x888] sm:$0xff]  ;;  %v506_v5 = vld [vmem:[%s3815_s20 + $0x890] sm:$0xff] }
 0x14c   : > { %v2551_v2 = vsel %vm1527_vm15, %v503_v57, %v2039_v60  ;;  %v1018_v6 = vld [vmem:[%s3822_s18 + $0x890] sm:$0xff]  ;;  %3062 = vst [vmem:[%s3838_s21 + $0x870] sm:$0xff] %v2550_v1  ;;  %vm1529_vm1 = vcmp.gt.f32.partialorder %v1017_v4, 0.0  ;;  %v2041_v7 = vmul.f32 0.1, %v505_v0  ;;  %v507_v10 = vld [vmem:[%s3815_s20 + $0x898] sm:$0xff] }
 0x14d   : > { %3063 = vst [vmem:[%s3838_s21 + $0x878] sm:$0xff] %v2551_v2  ;;  %vm1530_vm2 = vcmp.gt.f32.partialorder %v1018_v6, 0.0  ;;  %v2042_v8 = vmul.f32 0.1, %v506_v5  ;;  %v2552_v9 = vsel %vm1528_vm0, %v504_v62, %v2040_v3  ;;  %v1019_v11 = vld [vmem:[%s3822_s18 + $0x898] sm:$0xff]  ;;  %v508_v12 = vld [vmem:[%s3815_s20 + $0x8a0] sm:$0xff] }
 0x14e   : > { %3064 = vst [vmem:[%s3838_s21 + $0x880] sm:$0xff] %v2552_v9  ;;  %v2553_v13 = vsel %vm1529_vm1, %v505_v0, %v2041_v7  ;;  %vm1531_vm3 = vcmp.gt.f32.partialorder %v1019_v11, 0.0  ;;  %v2043_v15 = vmul.f32 0.1, %v507_v10  ;;  %v1020_v16 = vld [vmem:[%s3822_s18 + $0x8a0] sm:$0xff]  ;;  %v509_v17 = vld [vmem:[%s3815_s20 + $0x8a8] sm:$0xff] }
 0x14f   : > { %v2554_v14 = vsel %vm1530_vm2, %v506_v5, %v2042_v8  ;;  %v1021_v18 = vld [vmem:[%s3822_s18 + $0x8a8] sm:$0xff]  ;;  %3065 = vst [vmem:[%s3838_s21 + $0x888] sm:$0xff] %v2553_v13  ;;  %vm1532_vm4 = vcmp.gt.f32.partialorder %v1020_v16, 0.0  ;;  %v2044_v19 = vmul.f32 0.1, %v508_v12  ;;  %v510_v22 = vld [vmem:[%s3815_s20 + $0x8b0] sm:$0xff] }
 0x150   : > { %3066 = vst [vmem:[%s3838_s21 + $0x890] sm:$0xff] %v2554_v14  ;;  %vm1533_vm5 = vcmp.gt.f32.partialorder %v1021_v18, 0.0  ;;  %v2045_v20 = vmul.f32 0.1, %v509_v17  ;;  %v2555_v21 = vsel %vm1531_vm3, %v507_v10, %v2043_v15  ;;  %v1022_v23 = vld [vmem:[%s3822_s18 + $0x8b0] sm:$0xff]  ;;  %v511_v24 = vld [vmem:[%s3815_s20 + $0x8b8] sm:$0xff] }
 0x151   : > { %3067 = vst [vmem:[%s3838_s21 + $0x898] sm:$0xff] %v2555_v21  ;;  %v2556_v25 = vsel %vm1532_vm4, %v508_v12, %v2044_v19  ;;  %vm1534_vm6 = vcmp.gt.f32.partialorder %v1022_v23, 0.0  ;;  %v2046_v27 = vmul.f32 0.1, %v510_v22  ;;  %v1023_v28 = vld [vmem:[%s3822_s18 + $0x8b8] sm:$0xff]  ;;  %v512_v29 = vld [vmem:[%s3815_s20 + $0x8c0] sm:$0xff] }
 0x152   : > { %v2557_v26 = vsel %vm1533_vm5, %v509_v17, %v2045_v20  ;;  %v1024_v30 = vld [vmem:[%s3822_s18 + $0x8c0] sm:$0xff]  ;;  %3068 = vst [vmem:[%s3838_s21 + $0x8a0] sm:$0xff] %v2556_v25  ;;  %vm1535_vm7 = vcmp.gt.f32.partialorder %v1023_v28, 0.0  ;;  %v2047_v31 = vmul.f32 0.1, %v511_v24  ;;  %v513_v34 = vld [vmem:[%s3815_s20 + $0x8c8] sm:$0xff] }
 0x153   : > { %3069 = vst [vmem:[%s3838_s21 + $0x8a8] sm:$0xff] %v2557_v26  ;;  %vm1536_vm8 = vcmp.gt.f32.partialorder %v1024_v30, 0.0  ;;  %v2048_v32 = vmul.f32 0.1, %v512_v29  ;;  %v2558_v33 = vsel %vm1534_vm6, %v510_v22, %v2046_v27  ;;  %v1025_v35 = vld [vmem:[%s3822_s18 + $0x8c8] sm:$0xff]  ;;  %v514_v36 = vld [vmem:[%s3815_s20 + $0x8d0] sm:$0xff] }
 0x154   : > { %3070 = vst [vmem:[%s3838_s21 + $0x8b0] sm:$0xff] %v2558_v33  ;;  %v2559_v37 = vsel %vm1535_vm7, %v511_v24, %v2047_v31  ;;  %vm1537_vm9 = vcmp.gt.f32.partialorder %v1025_v35, 0.0  ;;  %v2049_v39 = vmul.f32 0.1, %v513_v34  ;;  %v1026_v40 = vld [vmem:[%s3822_s18 + $0x8d0] sm:$0xff]  ;;  %v515_v41 = vld [vmem:[%s3815_s20 + $0x8d8] sm:$0xff] }
 0x155   : > { %v2560_v38 = vsel %vm1536_vm8, %v512_v29, %v2048_v32  ;;  %v1027_v42 = vld [vmem:[%s3822_s18 + $0x8d8] sm:$0xff]  ;;  %3071 = vst [vmem:[%s3838_s21 + $0x8b8] sm:$0xff] %v2559_v37  ;;  %vm1538_vm10 = vcmp.gt.f32.partialorder %v1026_v40, 0.0  ;;  %v2050_v43 = vmul.f32 0.1, %v514_v36  ;;  %v516_v46 = vld [vmem:[%s3815_s20 + $0x8e0] sm:$0xff] }
 0x156   : > { %3072 = vst [vmem:[%s3838_s21 + $0x8c0] sm:$0xff] %v2560_v38  ;;  %vm1539_vm11 = vcmp.gt.f32.partialorder %v1027_v42, 0.0  ;;  %v2051_v44 = vmul.f32 0.1, %v515_v41  ;;  %v2561_v45 = vsel %vm1537_vm9, %v513_v34, %v2049_v39  ;;  %v1028_v47 = vld [vmem:[%s3822_s18 + $0x8e0] sm:$0xff]  ;;  %v517_v48 = vld [vmem:[%s3815_s20 + $0x8e8] sm:$0xff] }
 0x157   : > { %3073 = vst [vmem:[%s3838_s21 + $0x8c8] sm:$0xff] %v2561_v45  ;;  %v2562_v49 = vsel %vm1538_vm10, %v514_v36, %v2050_v43  ;;  %vm1540_vm12 = vcmp.gt.f32.partialorder %v1028_v47, 0.0  ;;  %v2052_v51 = vmul.f32 0.1, %v516_v46  ;;  %v1029_v52 = vld [vmem:[%s3822_s18 + $0x8e8] sm:$0xff]  ;;  %v518_v53 = vld [vmem:[%s3815_s20 + $0x8f0] sm:$0xff] }
 0x158   : > { %v2563_v50 = vsel %vm1539_vm11, %v515_v41, %v2051_v44  ;;  %v1030_v54 = vld [vmem:[%s3822_s18 + $0x8f0] sm:$0xff]  ;;  %3074 = vst [vmem:[%s3838_s21 + $0x8d0] sm:$0xff] %v2562_v49  ;;  %vm1541_vm13 = vcmp.gt.f32.partialorder %v1029_v52, 0.0  ;;  %v2053_v55 = vmul.f32 0.1, %v517_v48  ;;  %v519_v58 = vld [vmem:[%s3815_s20 + $0x8f8] sm:$0xff] }
 0x159   : > { %3075 = vst [vmem:[%s3838_s21 + $0x8d8] sm:$0xff] %v2563_v50  ;;  %vm1542_vm14 = vcmp.gt.f32.partialorder %v1030_v54, 0.0  ;;  %v2054_v56 = vmul.f32 0.1, %v518_v53  ;;  %v2564_v57 = vsel %vm1540_vm12, %v516_v46, %v2052_v51  ;;  %v1031_v59 = vld [vmem:[%s3822_s18 + $0x8f8] sm:$0xff]  ;;  %v520_v60 = vld [vmem:[%s3815_s20 + $0x900] sm:$0xff] }
 0x15a   : > { %3076 = vst [vmem:[%s3838_s21 + $0x8e0] sm:$0xff] %v2564_v57  ;;  %v2565_v61 = vsel %vm1541_vm13, %v517_v48, %v2053_v55  ;;  %vm1543_vm15 = vcmp.gt.f32.partialorder %v1031_v59, 0.0  ;;  %v2055_v63 = vmul.f32 0.1, %v519_v58  ;;  %v1032_v0 = vld [vmem:[%s3822_s18 + $0x900] sm:$0xff]  ;;  %v521_v1 = vld [vmem:[%s3815_s20 + $0x908] sm:$0xff] }
 0x15b   : > { %v2566_v62 = vsel %vm1542_vm14, %v518_v53, %v2054_v56  ;;  %v1033_v2 = vld [vmem:[%s3822_s18 + $0x908] sm:$0xff]  ;;  %3077 = vst [vmem:[%s3838_s21 + $0x8e8] sm:$0xff] %v2565_v61  ;;  %vm1544_vm0 = vcmp.gt.f32.partialorder %v1032_v0, 0.0  ;;  %v2056_v3 = vmul.f32 0.1, %v520_v60  ;;  %v522_v6 = vld [vmem:[%s3815_s20 + $0x910] sm:$0xff] }
 0x15c   : > { %3078 = vst [vmem:[%s3838_s21 + $0x8f0] sm:$0xff] %v2566_v62  ;;  %vm1545_vm1 = vcmp.gt.f32.partialorder %v1033_v2, 0.0  ;;  %v2057_v4 = vmul.f32 0.1, %v521_v1  ;;  %v2567_v5 = vsel %vm1543_vm15, %v519_v58, %v2055_v63  ;;  %v1034_v7 = vld [vmem:[%s3822_s18 + $0x910] sm:$0xff]  ;;  %v523_v8 = vld [vmem:[%s3815_s20 + $0x918] sm:$0xff] }
 0x15d   : > { %3079 = vst [vmem:[%s3838_s21 + $0x8f8] sm:$0xff] %v2567_v5  ;;  %v2568_v9 = vsel %vm1544_vm0, %v520_v60, %v2056_v3  ;;  %vm1546_vm2 = vcmp.gt.f32.partialorder %v1034_v7, 0.0  ;;  %v2058_v11 = vmul.f32 0.1, %v522_v6  ;;  %v1035_v12 = vld [vmem:[%s3822_s18 + $0x918] sm:$0xff]  ;;  %v524_v13 = vld [vmem:[%s3815_s20 + $0x920] sm:$0xff] }
 0x15e   : > { %v2569_v10 = vsel %vm1545_vm1, %v521_v1, %v2057_v4  ;;  %v1036_v14 = vld [vmem:[%s3822_s18 + $0x920] sm:$0xff]  ;;  %3080 = vst [vmem:[%s3838_s21 + $0x900] sm:$0xff] %v2568_v9  ;;  %vm1547_vm3 = vcmp.gt.f32.partialorder %v1035_v12, 0.0  ;;  %v2059_v15 = vmul.f32 0.1, %v523_v8  ;;  %v525_v18 = vld [vmem:[%s3815_s20 + $0x928] sm:$0xff] }
 0x15f   : > { %3081 = vst [vmem:[%s3838_s21 + $0x908] sm:$0xff] %v2569_v10  ;;  %vm1548_vm4 = vcmp.gt.f32.partialorder %v1036_v14, 0.0  ;;  %v2060_v16 = vmul.f32 0.1, %v524_v13  ;;  %v2570_v17 = vsel %vm1546_vm2, %v522_v6, %v2058_v11  ;;  %v1037_v19 = vld [vmem:[%s3822_s18 + $0x928] sm:$0xff]  ;;  %v526_v20 = vld [vmem:[%s3815_s20 + $0x930] sm:$0xff] }
 0x160   : > { %3082 = vst [vmem:[%s3838_s21 + $0x910] sm:$0xff] %v2570_v17  ;;  %v2571_v21 = vsel %vm1547_vm3, %v523_v8, %v2059_v15  ;;  %vm1549_vm5 = vcmp.gt.f32.partialorder %v1037_v19, 0.0  ;;  %v2061_v23 = vmul.f32 0.1, %v525_v18  ;;  %v1038_v24 = vld [vmem:[%s3822_s18 + $0x930] sm:$0xff]  ;;  %v527_v25 = vld [vmem:[%s3815_s20 + $0x938] sm:$0xff] }
 0x161   : > { %v2572_v22 = vsel %vm1548_vm4, %v524_v13, %v2060_v16  ;;  %v1039_v26 = vld [vmem:[%s3822_s18 + $0x938] sm:$0xff]  ;;  %3083 = vst [vmem:[%s3838_s21 + $0x918] sm:$0xff] %v2571_v21  ;;  %vm1550_vm6 = vcmp.gt.f32.partialorder %v1038_v24, 0.0  ;;  %v2062_v27 = vmul.f32 0.1, %v526_v20  ;;  %v528_v30 = vld [vmem:[%s3815_s20 + $0x940] sm:$0xff] }
 0x162   : > { %3084 = vst [vmem:[%s3838_s21 + $0x920] sm:$0xff] %v2572_v22  ;;  %vm1551_vm7 = vcmp.gt.f32.partialorder %v1039_v26, 0.0  ;;  %v2063_v28 = vmul.f32 0.1, %v527_v25  ;;  %v2573_v29 = vsel %vm1549_vm5, %v525_v18, %v2061_v23  ;;  %v1040_v31 = vld [vmem:[%s3822_s18 + $0x940] sm:$0xff]  ;;  %v529_v32 = vld [vmem:[%s3815_s20 + $0x948] sm:$0xff] }
 0x163   : > { %3085 = vst [vmem:[%s3838_s21 + $0x928] sm:$0xff] %v2573_v29  ;;  %v2574_v33 = vsel %vm1550_vm6, %v526_v20, %v2062_v27  ;;  %vm1552_vm8 = vcmp.gt.f32.partialorder %v1040_v31, 0.0  ;;  %v2064_v35 = vmul.f32 0.1, %v528_v30  ;;  %v1041_v36 = vld [vmem:[%s3822_s18 + $0x948] sm:$0xff]  ;;  %v530_v37 = vld [vmem:[%s3815_s20 + $0x950] sm:$0xff] }
 0x164   : > { %v2575_v34 = vsel %vm1551_vm7, %v527_v25, %v2063_v28  ;;  %v1042_v38 = vld [vmem:[%s3822_s18 + $0x950] sm:$0xff]  ;;  %3086 = vst [vmem:[%s3838_s21 + $0x930] sm:$0xff] %v2574_v33  ;;  %vm1553_vm9 = vcmp.gt.f32.partialorder %v1041_v36, 0.0  ;;  %v2065_v39 = vmul.f32 0.1, %v529_v32  ;;  %v531_v42 = vld [vmem:[%s3815_s20 + $0x958] sm:$0xff] }
 0x165   : > { %3087 = vst [vmem:[%s3838_s21 + $0x938] sm:$0xff] %v2575_v34  ;;  %vm1554_vm10 = vcmp.gt.f32.partialorder %v1042_v38, 0.0  ;;  %v2066_v40 = vmul.f32 0.1, %v530_v37  ;;  %v2576_v41 = vsel %vm1552_vm8, %v528_v30, %v2064_v35  ;;  %v1043_v43 = vld [vmem:[%s3822_s18 + $0x958] sm:$0xff]  ;;  %v532_v44 = vld [vmem:[%s3815_s20 + $0x960] sm:$0xff] }
 0x166   : > { %3088 = vst [vmem:[%s3838_s21 + $0x940] sm:$0xff] %v2576_v41  ;;  %v2577_v45 = vsel %vm1553_vm9, %v529_v32, %v2065_v39  ;;  %vm1555_vm11 = vcmp.gt.f32.partialorder %v1043_v43, 0.0  ;;  %v2067_v47 = vmul.f32 0.1, %v531_v42  ;;  %v1044_v48 = vld [vmem:[%s3822_s18 + $0x960] sm:$0xff]  ;;  %v533_v49 = vld [vmem:[%s3815_s20 + $0x968] sm:$0xff] }
 0x167   : > { %v2578_v46 = vsel %vm1554_vm10, %v530_v37, %v2066_v40  ;;  %v1045_v50 = vld [vmem:[%s3822_s18 + $0x968] sm:$0xff]  ;;  %3089 = vst [vmem:[%s3838_s21 + $0x948] sm:$0xff] %v2577_v45  ;;  %vm1556_vm12 = vcmp.gt.f32.partialorder %v1044_v48, 0.0  ;;  %v2068_v51 = vmul.f32 0.1, %v532_v44  ;;  %v534_v54 = vld [vmem:[%s3815_s20 + $0x970] sm:$0xff] }
 0x168   : > { %3090 = vst [vmem:[%s3838_s21 + $0x950] sm:$0xff] %v2578_v46  ;;  %vm1557_vm13 = vcmp.gt.f32.partialorder %v1045_v50, 0.0  ;;  %v2069_v52 = vmul.f32 0.1, %v533_v49  ;;  %v2579_v53 = vsel %vm1555_vm11, %v531_v42, %v2067_v47  ;;  %v1046_v55 = vld [vmem:[%s3822_s18 + $0x970] sm:$0xff]  ;;  %v535_v56 = vld [vmem:[%s3815_s20 + $0x978] sm:$0xff] }
 0x169   : > { %3091 = vst [vmem:[%s3838_s21 + $0x958] sm:$0xff] %v2579_v53  ;;  %v2580_v57 = vsel %vm1556_vm12, %v532_v44, %v2068_v51  ;;  %vm1558_vm14 = vcmp.gt.f32.partialorder %v1046_v55, 0.0  ;;  %v2070_v59 = vmul.f32 0.1, %v534_v54  ;;  %v1047_v60 = vld [vmem:[%s3822_s18 + $0x978] sm:$0xff]  ;;  %v536_v61 = vld [vmem:[%s3815_s20 + $0x980] sm:$0xff] }
 0x16a   : > { %v2581_v58 = vsel %vm1557_vm13, %v533_v49, %v2069_v52  ;;  %v1048_v62 = vld [vmem:[%s3822_s18 + $0x980] sm:$0xff]  ;;  %3092 = vst [vmem:[%s3838_s21 + $0x960] sm:$0xff] %v2580_v57  ;;  %vm1559_vm15 = vcmp.gt.f32.partialorder %v1047_v60, 0.0  ;;  %v2071_v63 = vmul.f32 0.1, %v535_v56  ;;  %v537_v2 = vld [vmem:[%s3815_s20 + $0x988] sm:$0xff] }
 0x16b   : > { %3093 = vst [vmem:[%s3838_s21 + $0x968] sm:$0xff] %v2581_v58  ;;  %vm1560_vm0 = vcmp.gt.f32.partialorder %v1048_v62, 0.0  ;;  %v2072_v0 = vmul.f32 0.1, %v536_v61  ;;  %v2582_v1 = vsel %vm1558_vm14, %v534_v54, %v2070_v59  ;;  %v1049_v3 = vld [vmem:[%s3822_s18 + $0x988] sm:$0xff]  ;;  %v538_v4 = vld [vmem:[%s3815_s20 + $0x990] sm:$0xff] }
 0x16c   : > { %3094 = vst [vmem:[%s3838_s21 + $0x970] sm:$0xff] %v2582_v1  ;;  %v2583_v5 = vsel %vm1559_vm15, %v535_v56, %v2071_v63  ;;  %vm1561_vm1 = vcmp.gt.f32.partialorder %v1049_v3, 0.0  ;;  %v2073_v7 = vmul.f32 0.1, %v537_v2  ;;  %v1050_v8 = vld [vmem:[%s3822_s18 + $0x990] sm:$0xff]  ;;  %v539_v9 = vld [vmem:[%s3815_s20 + $0x998] sm:$0xff] }
 0x16d   : > { %v2584_v6 = vsel %vm1560_vm0, %v536_v61, %v2072_v0  ;;  %v1051_v10 = vld [vmem:[%s3822_s18 + $0x998] sm:$0xff]  ;;  %3095 = vst [vmem:[%s3838_s21 + $0x978] sm:$0xff] %v2583_v5  ;;  %vm1562_vm2 = vcmp.gt.f32.partialorder %v1050_v8, 0.0  ;;  %v2074_v11 = vmul.f32 0.1, %v538_v4  ;;  %v540_v14 = vld [vmem:[%s3815_s20 + $0x9a0] sm:$0xff] }
 0x16e   : > { %3096 = vst [vmem:[%s3838_s21 + $0x980] sm:$0xff] %v2584_v6  ;;  %vm1563_vm3 = vcmp.gt.f32.partialorder %v1051_v10, 0.0  ;;  %v2075_v12 = vmul.f32 0.1, %v539_v9  ;;  %v2585_v13 = vsel %vm1561_vm1, %v537_v2, %v2073_v7  ;;  %v1052_v15 = vld [vmem:[%s3822_s18 + $0x9a0] sm:$0xff]  ;;  %v541_v16 = vld [vmem:[%s3815_s20 + $0x9a8] sm:$0xff] }
 0x16f   : > { %3097 = vst [vmem:[%s3838_s21 + $0x988] sm:$0xff] %v2585_v13  ;;  %v2586_v17 = vsel %vm1562_vm2, %v538_v4, %v2074_v11  ;;  %vm1564_vm4 = vcmp.gt.f32.partialorder %v1052_v15, 0.0  ;;  %v2076_v19 = vmul.f32 0.1, %v540_v14  ;;  %v1053_v20 = vld [vmem:[%s3822_s18 + $0x9a8] sm:$0xff]  ;;  %v542_v21 = vld [vmem:[%s3815_s20 + $0x9b0] sm:$0xff] }
 0x170   : > { %v2587_v18 = vsel %vm1563_vm3, %v539_v9, %v2075_v12  ;;  %v1054_v22 = vld [vmem:[%s3822_s18 + $0x9b0] sm:$0xff]  ;;  %3098 = vst [vmem:[%s3838_s21 + $0x990] sm:$0xff] %v2586_v17  ;;  %vm1565_vm5 = vcmp.gt.f32.partialorder %v1053_v20, 0.0  ;;  %v2077_v23 = vmul.f32 0.1, %v541_v16  ;;  %v543_v26 = vld [vmem:[%s3815_s20 + $0x9b8] sm:$0xff] }
 0x171   : > { %3099 = vst [vmem:[%s3838_s21 + $0x998] sm:$0xff] %v2587_v18  ;;  %vm1566_vm6 = vcmp.gt.f32.partialorder %v1054_v22, 0.0  ;;  %v2078_v24 = vmul.f32 0.1, %v542_v21  ;;  %v2588_v25 = vsel %vm1564_vm4, %v540_v14, %v2076_v19  ;;  %v1055_v27 = vld [vmem:[%s3822_s18 + $0x9b8] sm:$0xff]  ;;  %v544_v28 = vld [vmem:[%s3815_s20 + $0x9c0] sm:$0xff] }
 0x172   : > { %3100 = vst [vmem:[%s3838_s21 + $0x9a0] sm:$0xff] %v2588_v25  ;;  %v2589_v29 = vsel %vm1565_vm5, %v541_v16, %v2077_v23  ;;  %vm1567_vm7 = vcmp.gt.f32.partialorder %v1055_v27, 0.0  ;;  %v2079_v31 = vmul.f32 0.1, %v543_v26  ;;  %v1056_v32 = vld [vmem:[%s3822_s18 + $0x9c0] sm:$0xff]  ;;  %v545_v33 = vld [vmem:[%s3815_s20 + $0x9c8] sm:$0xff] }
 0x173   : > { %v2590_v30 = vsel %vm1566_vm6, %v542_v21, %v2078_v24  ;;  %v1057_v34 = vld [vmem:[%s3822_s18 + $0x9c8] sm:$0xff]  ;;  %3101 = vst [vmem:[%s3838_s21 + $0x9a8] sm:$0xff] %v2589_v29  ;;  %vm1568_vm8 = vcmp.gt.f32.partialorder %v1056_v32, 0.0  ;;  %v2080_v35 = vmul.f32 0.1, %v544_v28  ;;  %v546_v38 = vld [vmem:[%s3815_s20 + $0x9d0] sm:$0xff] }
 0x174   : > { %3102 = vst [vmem:[%s3838_s21 + $0x9b0] sm:$0xff] %v2590_v30  ;;  %vm1569_vm9 = vcmp.gt.f32.partialorder %v1057_v34, 0.0  ;;  %v2081_v36 = vmul.f32 0.1, %v545_v33  ;;  %v2591_v37 = vsel %vm1567_vm7, %v543_v26, %v2079_v31  ;;  %v1058_v39 = vld [vmem:[%s3822_s18 + $0x9d0] sm:$0xff]  ;;  %v547_v40 = vld [vmem:[%s3815_s20 + $0x9d8] sm:$0xff] }
 0x175   : > { %3103 = vst [vmem:[%s3838_s21 + $0x9b8] sm:$0xff] %v2591_v37  ;;  %v2592_v41 = vsel %vm1568_vm8, %v544_v28, %v2080_v35  ;;  %vm1570_vm10 = vcmp.gt.f32.partialorder %v1058_v39, 0.0  ;;  %v2082_v43 = vmul.f32 0.1, %v546_v38  ;;  %v1059_v44 = vld [vmem:[%s3822_s18 + $0x9d8] sm:$0xff]  ;;  %v548_v45 = vld [vmem:[%s3815_s20 + $0x9e0] sm:$0xff] }
 0x176   : > { %v2593_v42 = vsel %vm1569_vm9, %v545_v33, %v2081_v36  ;;  %v1060_v46 = vld [vmem:[%s3822_s18 + $0x9e0] sm:$0xff]  ;;  %3104 = vst [vmem:[%s3838_s21 + $0x9c0] sm:$0xff] %v2592_v41  ;;  %vm1571_vm11 = vcmp.gt.f32.partialorder %v1059_v44, 0.0  ;;  %v2083_v47 = vmul.f32 0.1, %v547_v40  ;;  %v549_v50 = vld [vmem:[%s3815_s20 + $0x9e8] sm:$0xff] }
 0x177   : > { %3105 = vst [vmem:[%s3838_s21 + $0x9c8] sm:$0xff] %v2593_v42  ;;  %vm1572_vm12 = vcmp.gt.f32.partialorder %v1060_v46, 0.0  ;;  %v2084_v48 = vmul.f32 0.1, %v548_v45  ;;  %v2594_v49 = vsel %vm1570_vm10, %v546_v38, %v2082_v43  ;;  %v1061_v51 = vld [vmem:[%s3822_s18 + $0x9e8] sm:$0xff]  ;;  %v550_v52 = vld [vmem:[%s3815_s20 + $0x9f0] sm:$0xff] }
 0x178   : > { %3106 = vst [vmem:[%s3838_s21 + $0x9d0] sm:$0xff] %v2594_v49  ;;  %v2595_v53 = vsel %vm1571_vm11, %v547_v40, %v2083_v47  ;;  %vm1573_vm13 = vcmp.gt.f32.partialorder %v1061_v51, 0.0  ;;  %v2085_v55 = vmul.f32 0.1, %v549_v50  ;;  %v1062_v56 = vld [vmem:[%s3822_s18 + $0x9f0] sm:$0xff]  ;;  %v551_v57 = vld [vmem:[%s3815_s20 + $0x9f8] sm:$0xff] }
 0x179   : > { %v2596_v54 = vsel %vm1572_vm12, %v548_v45, %v2084_v48  ;;  %v1063_v58 = vld [vmem:[%s3822_s18 + $0x9f8] sm:$0xff]  ;;  %3107 = vst [vmem:[%s3838_s21 + $0x9d8] sm:$0xff] %v2595_v53  ;;  %vm1574_vm14 = vcmp.gt.f32.partialorder %v1062_v56, 0.0  ;;  %v2086_v59 = vmul.f32 0.1, %v550_v52  ;;  %v552_v62 = vld [vmem:[%s3815_s20 + $0xa00] sm:$0xff] }
 0x17a   : > { %3108 = vst [vmem:[%s3838_s21 + $0x9e0] sm:$0xff] %v2596_v54  ;;  %vm1575_vm15 = vcmp.gt.f32.partialorder %v1063_v58, 0.0  ;;  %v2087_v60 = vmul.f32 0.1, %v551_v57  ;;  %v2597_v61 = vsel %vm1573_vm13, %v549_v50, %v2085_v55  ;;  %v1064_v63 = vld [vmem:[%s3822_s18 + $0xa00] sm:$0xff]  ;;  %v553_v0 = vld [vmem:[%s3815_s20 + $0xa08] sm:$0xff] }
 0x17b   : > { %3109 = vst [vmem:[%s3838_s21 + $0x9e8] sm:$0xff] %v2597_v61  ;;  %v2598_v1 = vsel %vm1574_vm14, %v550_v52, %v2086_v59  ;;  %vm1576_vm0 = vcmp.gt.f32.partialorder %v1064_v63, 0.0  ;;  %v2088_v3 = vmul.f32 0.1, %v552_v62  ;;  %v1065_v4 = vld [vmem:[%s3822_s18 + $0xa08] sm:$0xff]  ;;  %v554_v5 = vld [vmem:[%s3815_s20 + $0xa10] sm:$0xff] }
 0x17c   : > { %v2599_v2 = vsel %vm1575_vm15, %v551_v57, %v2087_v60  ;;  %v1066_v6 = vld [vmem:[%s3822_s18 + $0xa10] sm:$0xff]  ;;  %3110 = vst [vmem:[%s3838_s21 + $0x9f0] sm:$0xff] %v2598_v1  ;;  %vm1577_vm1 = vcmp.gt.f32.partialorder %v1065_v4, 0.0  ;;  %v2089_v7 = vmul.f32 0.1, %v553_v0  ;;  %v555_v10 = vld [vmem:[%s3815_s20 + $0xa18] sm:$0xff] }
 0x17d   : > { %3111 = vst [vmem:[%s3838_s21 + $0x9f8] sm:$0xff] %v2599_v2  ;;  %vm1578_vm2 = vcmp.gt.f32.partialorder %v1066_v6, 0.0  ;;  %v2090_v8 = vmul.f32 0.1, %v554_v5  ;;  %v2600_v9 = vsel %vm1576_vm0, %v552_v62, %v2088_v3  ;;  %v1067_v11 = vld [vmem:[%s3822_s18 + $0xa18] sm:$0xff]  ;;  %v556_v12 = vld [vmem:[%s3815_s20 + $0xa20] sm:$0xff] }
 0x17e   : > { %3112 = vst [vmem:[%s3838_s21 + $0xa00] sm:$0xff] %v2600_v9  ;;  %v2601_v13 = vsel %vm1577_vm1, %v553_v0, %v2089_v7  ;;  %vm1579_vm3 = vcmp.gt.f32.partialorder %v1067_v11, 0.0  ;;  %v2091_v15 = vmul.f32 0.1, %v555_v10  ;;  %v1068_v16 = vld [vmem:[%s3822_s18 + $0xa20] sm:$0xff]  ;;  %v557_v17 = vld [vmem:[%s3815_s20 + $0xa28] sm:$0xff] }
 0x17f   : > { %v2602_v14 = vsel %vm1578_vm2, %v554_v5, %v2090_v8  ;;  %v1069_v18 = vld [vmem:[%s3822_s18 + $0xa28] sm:$0xff]  ;;  %3113 = vst [vmem:[%s3838_s21 + $0xa08] sm:$0xff] %v2601_v13  ;;  %vm1580_vm4 = vcmp.gt.f32.partialorder %v1068_v16, 0.0  ;;  %v2092_v19 = vmul.f32 0.1, %v556_v12  ;;  %v558_v22 = vld [vmem:[%s3815_s20 + $0xa30] sm:$0xff] }
 0x180   : > { %3114 = vst [vmem:[%s3838_s21 + $0xa10] sm:$0xff] %v2602_v14  ;;  %vm1581_vm5 = vcmp.gt.f32.partialorder %v1069_v18, 0.0  ;;  %v2093_v20 = vmul.f32 0.1, %v557_v17  ;;  %v2603_v21 = vsel %vm1579_vm3, %v555_v10, %v2091_v15  ;;  %v1070_v23 = vld [vmem:[%s3822_s18 + $0xa30] sm:$0xff]  ;;  %v559_v24 = vld [vmem:[%s3815_s20 + $0xa38] sm:$0xff] }
 0x181   : > { %3115 = vst [vmem:[%s3838_s21 + $0xa18] sm:$0xff] %v2603_v21  ;;  %v2604_v25 = vsel %vm1580_vm4, %v556_v12, %v2092_v19  ;;  %vm1582_vm6 = vcmp.gt.f32.partialorder %v1070_v23, 0.0  ;;  %v2094_v27 = vmul.f32 0.1, %v558_v22  ;;  %v1071_v28 = vld [vmem:[%s3822_s18 + $0xa38] sm:$0xff]  ;;  %v560_v29 = vld [vmem:[%s3815_s20 + $0xa40] sm:$0xff] }
 0x182   : > { %v2605_v26 = vsel %vm1581_vm5, %v557_v17, %v2093_v20  ;;  %v1072_v30 = vld [vmem:[%s3822_s18 + $0xa40] sm:$0xff]  ;;  %3116 = vst [vmem:[%s3838_s21 + $0xa20] sm:$0xff] %v2604_v25  ;;  %vm1583_vm7 = vcmp.gt.f32.partialorder %v1071_v28, 0.0  ;;  %v2095_v31 = vmul.f32 0.1, %v559_v24  ;;  %v561_v34 = vld [vmem:[%s3815_s20 + $0xa48] sm:$0xff] }
 0x183   : > { %3117 = vst [vmem:[%s3838_s21 + $0xa28] sm:$0xff] %v2605_v26  ;;  %vm1584_vm8 = vcmp.gt.f32.partialorder %v1072_v30, 0.0  ;;  %v2096_v32 = vmul.f32 0.1, %v560_v29  ;;  %v2606_v33 = vsel %vm1582_vm6, %v558_v22, %v2094_v27  ;;  %v1073_v35 = vld [vmem:[%s3822_s18 + $0xa48] sm:$0xff]  ;;  %v562_v36 = vld [vmem:[%s3815_s20 + $0xa50] sm:$0xff] }
 0x184   : > { %3118 = vst [vmem:[%s3838_s21 + $0xa30] sm:$0xff] %v2606_v33  ;;  %v2607_v37 = vsel %vm1583_vm7, %v559_v24, %v2095_v31  ;;  %vm1585_vm9 = vcmp.gt.f32.partialorder %v1073_v35, 0.0  ;;  %v2097_v39 = vmul.f32 0.1, %v561_v34  ;;  %v1074_v40 = vld [vmem:[%s3822_s18 + $0xa50] sm:$0xff]  ;;  %v563_v41 = vld [vmem:[%s3815_s20 + $0xa58] sm:$0xff] }
 0x185   : > { %v2608_v38 = vsel %vm1584_vm8, %v560_v29, %v2096_v32  ;;  %v1075_v42 = vld [vmem:[%s3822_s18 + $0xa58] sm:$0xff]  ;;  %3119 = vst [vmem:[%s3838_s21 + $0xa38] sm:$0xff] %v2607_v37  ;;  %vm1586_vm10 = vcmp.gt.f32.partialorder %v1074_v40, 0.0  ;;  %v2098_v43 = vmul.f32 0.1, %v562_v36  ;;  %v564_v46 = vld [vmem:[%s3815_s20 + $0xa60] sm:$0xff] }
 0x186   : > { %3120 = vst [vmem:[%s3838_s21 + $0xa40] sm:$0xff] %v2608_v38  ;;  %vm1587_vm11 = vcmp.gt.f32.partialorder %v1075_v42, 0.0  ;;  %v2099_v44 = vmul.f32 0.1, %v563_v41  ;;  %v2609_v45 = vsel %vm1585_vm9, %v561_v34, %v2097_v39  ;;  %v1076_v47 = vld [vmem:[%s3822_s18 + $0xa60] sm:$0xff]  ;;  %v565_v48 = vld [vmem:[%s3815_s20 + $0xa68] sm:$0xff] }
 0x187   : > { %3121 = vst [vmem:[%s3838_s21 + $0xa48] sm:$0xff] %v2609_v45  ;;  %v2610_v49 = vsel %vm1586_vm10, %v562_v36, %v2098_v43  ;;  %vm1588_vm12 = vcmp.gt.f32.partialorder %v1076_v47, 0.0  ;;  %v2100_v51 = vmul.f32 0.1, %v564_v46  ;;  %v1077_v52 = vld [vmem:[%s3822_s18 + $0xa68] sm:$0xff]  ;;  %v566_v53 = vld [vmem:[%s3815_s20 + $0xa70] sm:$0xff] }
 0x188   : > { %v2611_v50 = vsel %vm1587_vm11, %v563_v41, %v2099_v44  ;;  %v1078_v54 = vld [vmem:[%s3822_s18 + $0xa70] sm:$0xff]  ;;  %3122 = vst [vmem:[%s3838_s21 + $0xa50] sm:$0xff] %v2610_v49  ;;  %vm1589_vm13 = vcmp.gt.f32.partialorder %v1077_v52, 0.0  ;;  %v2101_v55 = vmul.f32 0.1, %v565_v48  ;;  %v567_v58 = vld [vmem:[%s3815_s20 + $0xa78] sm:$0xff] }
 0x189   : > { %3123 = vst [vmem:[%s3838_s21 + $0xa58] sm:$0xff] %v2611_v50  ;;  %vm1590_vm14 = vcmp.gt.f32.partialorder %v1078_v54, 0.0  ;;  %v2102_v56 = vmul.f32 0.1, %v566_v53  ;;  %v2612_v57 = vsel %vm1588_vm12, %v564_v46, %v2100_v51  ;;  %v1079_v59 = vld [vmem:[%s3822_s18 + $0xa78] sm:$0xff]  ;;  %v568_v60 = vld [vmem:[%s3815_s20 + $0xa80] sm:$0xff] }
 0x18a   : > { %3124 = vst [vmem:[%s3838_s21 + $0xa60] sm:$0xff] %v2612_v57  ;;  %v2613_v61 = vsel %vm1589_vm13, %v565_v48, %v2101_v55  ;;  %vm1591_vm15 = vcmp.gt.f32.partialorder %v1079_v59, 0.0  ;;  %v2103_v63 = vmul.f32 0.1, %v567_v58  ;;  %v1080_v0 = vld [vmem:[%s3822_s18 + $0xa80] sm:$0xff]  ;;  %v569_v1 = vld [vmem:[%s3815_s20 + $0xa88] sm:$0xff] }
 0x18b   : > { %v2614_v62 = vsel %vm1590_vm14, %v566_v53, %v2102_v56  ;;  %v1081_v2 = vld [vmem:[%s3822_s18 + $0xa88] sm:$0xff]  ;;  %3125 = vst [vmem:[%s3838_s21 + $0xa68] sm:$0xff] %v2613_v61  ;;  %vm1592_vm0 = vcmp.gt.f32.partialorder %v1080_v0, 0.0  ;;  %v2104_v3 = vmul.f32 0.1, %v568_v60  ;;  %v570_v6 = vld [vmem:[%s3815_s20 + $0xa90] sm:$0xff] }
 0x18c   : > { %3126 = vst [vmem:[%s3838_s21 + $0xa70] sm:$0xff] %v2614_v62  ;;  %vm1593_vm1 = vcmp.gt.f32.partialorder %v1081_v2, 0.0  ;;  %v2105_v4 = vmul.f32 0.1, %v569_v1  ;;  %v2615_v5 = vsel %vm1591_vm15, %v567_v58, %v2103_v63  ;;  %v1082_v7 = vld [vmem:[%s3822_s18 + $0xa90] sm:$0xff]  ;;  %v571_v8 = vld [vmem:[%s3815_s20 + $0xa98] sm:$0xff] }
 0x18d   : > { %3127 = vst [vmem:[%s3838_s21 + $0xa78] sm:$0xff] %v2615_v5  ;;  %v2616_v9 = vsel %vm1592_vm0, %v568_v60, %v2104_v3  ;;  %vm1594_vm2 = vcmp.gt.f32.partialorder %v1082_v7, 0.0  ;;  %v2106_v11 = vmul.f32 0.1, %v570_v6  ;;  %v1083_v12 = vld [vmem:[%s3822_s18 + $0xa98] sm:$0xff]  ;;  %v572_v13 = vld [vmem:[%s3815_s20 + $0xaa0] sm:$0xff] }
 0x18e   : > { %v2617_v10 = vsel %vm1593_vm1, %v569_v1, %v2105_v4  ;;  %v1084_v14 = vld [vmem:[%s3822_s18 + $0xaa0] sm:$0xff]  ;;  %3128 = vst [vmem:[%s3838_s21 + $0xa80] sm:$0xff] %v2616_v9  ;;  %vm1595_vm3 = vcmp.gt.f32.partialorder %v1083_v12, 0.0  ;;  %v2107_v15 = vmul.f32 0.1, %v571_v8  ;;  %v573_v18 = vld [vmem:[%s3815_s20 + $0xaa8] sm:$0xff] }
 0x18f   : > { %3129 = vst [vmem:[%s3838_s21 + $0xa88] sm:$0xff] %v2617_v10  ;;  %vm1596_vm4 = vcmp.gt.f32.partialorder %v1084_v14, 0.0  ;;  %v2108_v16 = vmul.f32 0.1, %v572_v13  ;;  %v2618_v17 = vsel %vm1594_vm2, %v570_v6, %v2106_v11  ;;  %v1085_v19 = vld [vmem:[%s3822_s18 + $0xaa8] sm:$0xff]  ;;  %v574_v20 = vld [vmem:[%s3815_s20 + $0xab0] sm:$0xff] }
 0x190   : > { %3130 = vst [vmem:[%s3838_s21 + $0xa90] sm:$0xff] %v2618_v17  ;;  %v2619_v21 = vsel %vm1595_vm3, %v571_v8, %v2107_v15  ;;  %vm1597_vm5 = vcmp.gt.f32.partialorder %v1085_v19, 0.0  ;;  %v2109_v23 = vmul.f32 0.1, %v573_v18  ;;  %v1086_v24 = vld [vmem:[%s3822_s18 + $0xab0] sm:$0xff]  ;;  %v575_v25 = vld [vmem:[%s3815_s20 + $0xab8] sm:$0xff] }
 0x191   : > { %v2620_v22 = vsel %vm1596_vm4, %v572_v13, %v2108_v16  ;;  %v1087_v26 = vld [vmem:[%s3822_s18 + $0xab8] sm:$0xff]  ;;  %3131 = vst [vmem:[%s3838_s21 + $0xa98] sm:$0xff] %v2619_v21  ;;  %vm1598_vm6 = vcmp.gt.f32.partialorder %v1086_v24, 0.0  ;;  %v2110_v27 = vmul.f32 0.1, %v574_v20  ;;  %v576_v30 = vld [vmem:[%s3815_s20 + $0xac0] sm:$0xff] }
 0x192   : > { %3132 = vst [vmem:[%s3838_s21 + $0xaa0] sm:$0xff] %v2620_v22  ;;  %vm1599_vm7 = vcmp.gt.f32.partialorder %v1087_v26, 0.0  ;;  %v2111_v28 = vmul.f32 0.1, %v575_v25  ;;  %v2621_v29 = vsel %vm1597_vm5, %v573_v18, %v2109_v23  ;;  %v1088_v31 = vld [vmem:[%s3822_s18 + $0xac0] sm:$0xff]  ;;  %v577_v32 = vld [vmem:[%s3815_s20 + $0xac8] sm:$0xff] }
 0x193   : > { %3133 = vst [vmem:[%s3838_s21 + $0xaa8] sm:$0xff] %v2621_v29  ;;  %v2622_v33 = vsel %vm1598_vm6, %v574_v20, %v2110_v27  ;;  %vm1600_vm8 = vcmp.gt.f32.partialorder %v1088_v31, 0.0  ;;  %v2112_v35 = vmul.f32 0.1, %v576_v30  ;;  %v1089_v36 = vld [vmem:[%s3822_s18 + $0xac8] sm:$0xff]  ;;  %v578_v37 = vld [vmem:[%s3815_s20 + $0xad0] sm:$0xff] }
 0x194   : > { %v2623_v34 = vsel %vm1599_vm7, %v575_v25, %v2111_v28  ;;  %v1090_v38 = vld [vmem:[%s3822_s18 + $0xad0] sm:$0xff]  ;;  %3134 = vst [vmem:[%s3838_s21 + $0xab0] sm:$0xff] %v2622_v33  ;;  %vm1601_vm9 = vcmp.gt.f32.partialorder %v1089_v36, 0.0  ;;  %v2113_v39 = vmul.f32 0.1, %v577_v32  ;;  %v579_v42 = vld [vmem:[%s3815_s20 + $0xad8] sm:$0xff] }
 0x195   : > { %3135 = vst [vmem:[%s3838_s21 + $0xab8] sm:$0xff] %v2623_v34  ;;  %vm1602_vm10 = vcmp.gt.f32.partialorder %v1090_v38, 0.0  ;;  %v2114_v40 = vmul.f32 0.1, %v578_v37  ;;  %v2624_v41 = vsel %vm1600_vm8, %v576_v30, %v2112_v35  ;;  %v1091_v43 = vld [vmem:[%s3822_s18 + $0xad8] sm:$0xff]  ;;  %v580_v44 = vld [vmem:[%s3815_s20 + $0xae0] sm:$0xff] }
 0x196   : > { %3136 = vst [vmem:[%s3838_s21 + $0xac0] sm:$0xff] %v2624_v41  ;;  %v2625_v45 = vsel %vm1601_vm9, %v577_v32, %v2113_v39  ;;  %vm1603_vm11 = vcmp.gt.f32.partialorder %v1091_v43, 0.0  ;;  %v2115_v47 = vmul.f32 0.1, %v579_v42  ;;  %v1092_v48 = vld [vmem:[%s3822_s18 + $0xae0] sm:$0xff]  ;;  %v581_v49 = vld [vmem:[%s3815_s20 + $0xae8] sm:$0xff] }
 0x197   : > { %v2626_v46 = vsel %vm1602_vm10, %v578_v37, %v2114_v40  ;;  %v1093_v50 = vld [vmem:[%s3822_s18 + $0xae8] sm:$0xff]  ;;  %3137 = vst [vmem:[%s3838_s21 + $0xac8] sm:$0xff] %v2625_v45  ;;  %vm1604_vm12 = vcmp.gt.f32.partialorder %v1092_v48, 0.0  ;;  %v2116_v51 = vmul.f32 0.1, %v580_v44  ;;  %v582_v54 = vld [vmem:[%s3815_s20 + $0xaf0] sm:$0xff] }
 0x198   : > { %3138 = vst [vmem:[%s3838_s21 + $0xad0] sm:$0xff] %v2626_v46  ;;  %vm1605_vm13 = vcmp.gt.f32.partialorder %v1093_v50, 0.0  ;;  %v2117_v52 = vmul.f32 0.1, %v581_v49  ;;  %v2627_v53 = vsel %vm1603_vm11, %v579_v42, %v2115_v47  ;;  %v1094_v55 = vld [vmem:[%s3822_s18 + $0xaf0] sm:$0xff]  ;;  %v583_v56 = vld [vmem:[%s3815_s20 + $0xaf8] sm:$0xff] }
 0x199   : > { %3139 = vst [vmem:[%s3838_s21 + $0xad8] sm:$0xff] %v2627_v53  ;;  %v2628_v57 = vsel %vm1604_vm12, %v580_v44, %v2116_v51  ;;  %vm1606_vm14 = vcmp.gt.f32.partialorder %v1094_v55, 0.0  ;;  %v2118_v59 = vmul.f32 0.1, %v582_v54  ;;  %v1095_v60 = vld [vmem:[%s3822_s18 + $0xaf8] sm:$0xff]  ;;  %v584_v61 = vld [vmem:[%s3815_s20 + $0xb00] sm:$0xff] }
 0x19a   : > { %v2629_v58 = vsel %vm1605_vm13, %v581_v49, %v2117_v52  ;;  %v1096_v62 = vld [vmem:[%s3822_s18 + $0xb00] sm:$0xff]  ;;  %3140 = vst [vmem:[%s3838_s21 + $0xae0] sm:$0xff] %v2628_v57  ;;  %vm1607_vm15 = vcmp.gt.f32.partialorder %v1095_v60, 0.0  ;;  %v2119_v63 = vmul.f32 0.1, %v583_v56  ;;  %v585_v2 = vld [vmem:[%s3815_s20 + $0xb08] sm:$0xff] }
 0x19b   : > { %3141 = vst [vmem:[%s3838_s21 + $0xae8] sm:$0xff] %v2629_v58  ;;  %vm1608_vm0 = vcmp.gt.f32.partialorder %v1096_v62, 0.0  ;;  %v2120_v0 = vmul.f32 0.1, %v584_v61  ;;  %v2630_v1 = vsel %vm1606_vm14, %v582_v54, %v2118_v59  ;;  %v1097_v3 = vld [vmem:[%s3822_s18 + $0xb08] sm:$0xff]  ;;  %v586_v4 = vld [vmem:[%s3815_s20 + $0xb10] sm:$0xff] }
 0x19c   : > { %3142 = vst [vmem:[%s3838_s21 + $0xaf0] sm:$0xff] %v2630_v1  ;;  %v2631_v5 = vsel %vm1607_vm15, %v583_v56, %v2119_v63  ;;  %vm1609_vm1 = vcmp.gt.f32.partialorder %v1097_v3, 0.0  ;;  %v2121_v7 = vmul.f32 0.1, %v585_v2  ;;  %v1098_v8 = vld [vmem:[%s3822_s18 + $0xb10] sm:$0xff]  ;;  %v587_v9 = vld [vmem:[%s3815_s20 + $0xb18] sm:$0xff] }
 0x19d   : > { %v2632_v6 = vsel %vm1608_vm0, %v584_v61, %v2120_v0  ;;  %v1099_v10 = vld [vmem:[%s3822_s18 + $0xb18] sm:$0xff]  ;;  %3143 = vst [vmem:[%s3838_s21 + $0xaf8] sm:$0xff] %v2631_v5  ;;  %vm1610_vm2 = vcmp.gt.f32.partialorder %v1098_v8, 0.0  ;;  %v2122_v11 = vmul.f32 0.1, %v586_v4  ;;  %v588_v14 = vld [vmem:[%s3815_s20 + $0xb20] sm:$0xff] }
 0x19e   : > { %3144 = vst [vmem:[%s3838_s21 + $0xb00] sm:$0xff] %v2632_v6  ;;  %vm1611_vm3 = vcmp.gt.f32.partialorder %v1099_v10, 0.0  ;;  %v2123_v12 = vmul.f32 0.1, %v587_v9  ;;  %v2633_v13 = vsel %vm1609_vm1, %v585_v2, %v2121_v7  ;;  %v1100_v15 = vld [vmem:[%s3822_s18 + $0xb20] sm:$0xff]  ;;  %v589_v16 = vld [vmem:[%s3815_s20 + $0xb28] sm:$0xff] }
 0x19f   : > { %3145 = vst [vmem:[%s3838_s21 + $0xb08] sm:$0xff] %v2633_v13  ;;  %v2634_v17 = vsel %vm1610_vm2, %v586_v4, %v2122_v11  ;;  %vm1612_vm4 = vcmp.gt.f32.partialorder %v1100_v15, 0.0  ;;  %v2124_v19 = vmul.f32 0.1, %v588_v14  ;;  %v1101_v20 = vld [vmem:[%s3822_s18 + $0xb28] sm:$0xff]  ;;  %v590_v21 = vld [vmem:[%s3815_s20 + $0xb30] sm:$0xff] }
 0x1a0   : > { %v2635_v18 = vsel %vm1611_vm3, %v587_v9, %v2123_v12  ;;  %v1102_v22 = vld [vmem:[%s3822_s18 + $0xb30] sm:$0xff]  ;;  %3146 = vst [vmem:[%s3838_s21 + $0xb10] sm:$0xff] %v2634_v17  ;;  %vm1613_vm5 = vcmp.gt.f32.partialorder %v1101_v20, 0.0  ;;  %v2125_v23 = vmul.f32 0.1, %v589_v16  ;;  %v591_v26 = vld [vmem:[%s3815_s20 + $0xb38] sm:$0xff] }
 0x1a1   : > { %3147 = vst [vmem:[%s3838_s21 + $0xb18] sm:$0xff] %v2635_v18  ;;  %vm1614_vm6 = vcmp.gt.f32.partialorder %v1102_v22, 0.0  ;;  %v2126_v24 = vmul.f32 0.1, %v590_v21  ;;  %v2636_v25 = vsel %vm1612_vm4, %v588_v14, %v2124_v19  ;;  %v1103_v27 = vld [vmem:[%s3822_s18 + $0xb38] sm:$0xff]  ;;  %v592_v28 = vld [vmem:[%s3815_s20 + $0xb40] sm:$0xff] }
 0x1a2   : > { %3148 = vst [vmem:[%s3838_s21 + $0xb20] sm:$0xff] %v2636_v25  ;;  %v2637_v29 = vsel %vm1613_vm5, %v589_v16, %v2125_v23  ;;  %vm1615_vm7 = vcmp.gt.f32.partialorder %v1103_v27, 0.0  ;;  %v2127_v31 = vmul.f32 0.1, %v591_v26  ;;  %v1104_v32 = vld [vmem:[%s3822_s18 + $0xb40] sm:$0xff]  ;;  %v593_v33 = vld [vmem:[%s3815_s20 + $0xb48] sm:$0xff] }
 0x1a3   : > { %v2638_v30 = vsel %vm1614_vm6, %v590_v21, %v2126_v24  ;;  %v1105_v34 = vld [vmem:[%s3822_s18 + $0xb48] sm:$0xff]  ;;  %3149 = vst [vmem:[%s3838_s21 + $0xb28] sm:$0xff] %v2637_v29  ;;  %vm1616_vm8 = vcmp.gt.f32.partialorder %v1104_v32, 0.0  ;;  %v2128_v35 = vmul.f32 0.1, %v592_v28  ;;  %v594_v38 = vld [vmem:[%s3815_s20 + $0xb50] sm:$0xff] }
 0x1a4   : > { %3150 = vst [vmem:[%s3838_s21 + $0xb30] sm:$0xff] %v2638_v30  ;;  %vm1617_vm9 = vcmp.gt.f32.partialorder %v1105_v34, 0.0  ;;  %v2129_v36 = vmul.f32 0.1, %v593_v33  ;;  %v2639_v37 = vsel %vm1615_vm7, %v591_v26, %v2127_v31  ;;  %v1106_v39 = vld [vmem:[%s3822_s18 + $0xb50] sm:$0xff]  ;;  %v595_v40 = vld [vmem:[%s3815_s20 + $0xb58] sm:$0xff] }
 0x1a5   : > { %3151 = vst [vmem:[%s3838_s21 + $0xb38] sm:$0xff] %v2639_v37  ;;  %v2640_v41 = vsel %vm1616_vm8, %v592_v28, %v2128_v35  ;;  %vm1618_vm10 = vcmp.gt.f32.partialorder %v1106_v39, 0.0  ;;  %v2130_v43 = vmul.f32 0.1, %v594_v38  ;;  %v1107_v44 = vld [vmem:[%s3822_s18 + $0xb58] sm:$0xff]  ;;  %v596_v45 = vld [vmem:[%s3815_s20 + $0xb60] sm:$0xff] }
 0x1a6   : > { %v2641_v42 = vsel %vm1617_vm9, %v593_v33, %v2129_v36  ;;  %v1108_v46 = vld [vmem:[%s3822_s18 + $0xb60] sm:$0xff]  ;;  %3152 = vst [vmem:[%s3838_s21 + $0xb40] sm:$0xff] %v2640_v41  ;;  %vm1619_vm11 = vcmp.gt.f32.partialorder %v1107_v44, 0.0  ;;  %v2131_v47 = vmul.f32 0.1, %v595_v40  ;;  %v597_v50 = vld [vmem:[%s3815_s20 + $0xb68] sm:$0xff] }
 0x1a7   : > { %3153 = vst [vmem:[%s3838_s21 + $0xb48] sm:$0xff] %v2641_v42  ;;  %vm1620_vm12 = vcmp.gt.f32.partialorder %v1108_v46, 0.0  ;;  %v2132_v48 = vmul.f32 0.1, %v596_v45  ;;  %v2642_v49 = vsel %vm1618_vm10, %v594_v38, %v2130_v43  ;;  %v1109_v51 = vld [vmem:[%s3822_s18 + $0xb68] sm:$0xff]  ;;  %v598_v52 = vld [vmem:[%s3815_s20 + $0xb70] sm:$0xff] }
 0x1a8   : > { %3154 = vst [vmem:[%s3838_s21 + $0xb50] sm:$0xff] %v2642_v49  ;;  %v2643_v53 = vsel %vm1619_vm11, %v595_v40, %v2131_v47  ;;  %vm1621_vm13 = vcmp.gt.f32.partialorder %v1109_v51, 0.0  ;;  %v2133_v55 = vmul.f32 0.1, %v597_v50  ;;  %v1110_v56 = vld [vmem:[%s3822_s18 + $0xb70] sm:$0xff]  ;;  %v599_v57 = vld [vmem:[%s3815_s20 + $0xb78] sm:$0xff] }
 0x1a9   : > { %v2644_v54 = vsel %vm1620_vm12, %v596_v45, %v2132_v48  ;;  %v1111_v58 = vld [vmem:[%s3822_s18 + $0xb78] sm:$0xff]  ;;  %3155 = vst [vmem:[%s3838_s21 + $0xb58] sm:$0xff] %v2643_v53  ;;  %vm1622_vm14 = vcmp.gt.f32.partialorder %v1110_v56, 0.0  ;;  %v2134_v59 = vmul.f32 0.1, %v598_v52  ;;  %v600_v62 = vld [vmem:[%s3815_s20 + $0xb80] sm:$0xff] }
 0x1aa   : > { %3156 = vst [vmem:[%s3838_s21 + $0xb60] sm:$0xff] %v2644_v54  ;;  %vm1623_vm15 = vcmp.gt.f32.partialorder %v1111_v58, 0.0  ;;  %v2135_v60 = vmul.f32 0.1, %v599_v57  ;;  %v2645_v61 = vsel %vm1621_vm13, %v597_v50, %v2133_v55  ;;  %v1112_v63 = vld [vmem:[%s3822_s18 + $0xb80] sm:$0xff]  ;;  %v601_v0 = vld [vmem:[%s3815_s20 + $0xb88] sm:$0xff] }
 0x1ab   : > { %3157 = vst [vmem:[%s3838_s21 + $0xb68] sm:$0xff] %v2645_v61  ;;  %v2646_v1 = vsel %vm1622_vm14, %v598_v52, %v2134_v59  ;;  %vm1624_vm0 = vcmp.gt.f32.partialorder %v1112_v63, 0.0  ;;  %v2136_v3 = vmul.f32 0.1, %v600_v62  ;;  %v1113_v4 = vld [vmem:[%s3822_s18 + $0xb88] sm:$0xff]  ;;  %v602_v5 = vld [vmem:[%s3815_s20 + $0xb90] sm:$0xff] }
 0x1ac   : > { %v2647_v2 = vsel %vm1623_vm15, %v599_v57, %v2135_v60  ;;  %v1114_v6 = vld [vmem:[%s3822_s18 + $0xb90] sm:$0xff]  ;;  %3158 = vst [vmem:[%s3838_s21 + $0xb70] sm:$0xff] %v2646_v1  ;;  %vm1625_vm1 = vcmp.gt.f32.partialorder %v1113_v4, 0.0  ;;  %v2137_v7 = vmul.f32 0.1, %v601_v0  ;;  %v603_v10 = vld [vmem:[%s3815_s20 + $0xb98] sm:$0xff] }
 0x1ad   : > { %3159 = vst [vmem:[%s3838_s21 + $0xb78] sm:$0xff] %v2647_v2  ;;  %vm1626_vm2 = vcmp.gt.f32.partialorder %v1114_v6, 0.0  ;;  %v2138_v8 = vmul.f32 0.1, %v602_v5  ;;  %v2648_v9 = vsel %vm1624_vm0, %v600_v62, %v2136_v3  ;;  %v1115_v11 = vld [vmem:[%s3822_s18 + $0xb98] sm:$0xff]  ;;  %v604_v12 = vld [vmem:[%s3815_s20 + $0xba0] sm:$0xff] }
 0x1ae   : > { %3160 = vst [vmem:[%s3838_s21 + $0xb80] sm:$0xff] %v2648_v9  ;;  %v2649_v13 = vsel %vm1625_vm1, %v601_v0, %v2137_v7  ;;  %vm1627_vm3 = vcmp.gt.f32.partialorder %v1115_v11, 0.0  ;;  %v2139_v15 = vmul.f32 0.1, %v603_v10  ;;  %v1116_v16 = vld [vmem:[%s3822_s18 + $0xba0] sm:$0xff]  ;;  %v605_v17 = vld [vmem:[%s3815_s20 + $0xba8] sm:$0xff] }
 0x1af   : > { %v2650_v14 = vsel %vm1626_vm2, %v602_v5, %v2138_v8  ;;  %v1117_v18 = vld [vmem:[%s3822_s18 + $0xba8] sm:$0xff]  ;;  %3161 = vst [vmem:[%s3838_s21 + $0xb88] sm:$0xff] %v2649_v13  ;;  %vm1628_vm4 = vcmp.gt.f32.partialorder %v1116_v16, 0.0  ;;  %v2140_v19 = vmul.f32 0.1, %v604_v12  ;;  %v606_v22 = vld [vmem:[%s3815_s20 + $0xbb0] sm:$0xff] }
 0x1b0   : > { %3162 = vst [vmem:[%s3838_s21 + $0xb90] sm:$0xff] %v2650_v14  ;;  %vm1629_vm5 = vcmp.gt.f32.partialorder %v1117_v18, 0.0  ;;  %v2141_v20 = vmul.f32 0.1, %v605_v17  ;;  %v2651_v21 = vsel %vm1627_vm3, %v603_v10, %v2139_v15  ;;  %v1118_v23 = vld [vmem:[%s3822_s18 + $0xbb0] sm:$0xff]  ;;  %v607_v24 = vld [vmem:[%s3815_s20 + $0xbb8] sm:$0xff] }
 0x1b1   : > { %3163 = vst [vmem:[%s3838_s21 + $0xb98] sm:$0xff] %v2651_v21  ;;  %v2652_v25 = vsel %vm1628_vm4, %v604_v12, %v2140_v19  ;;  %vm1630_vm6 = vcmp.gt.f32.partialorder %v1118_v23, 0.0  ;;  %v2142_v27 = vmul.f32 0.1, %v606_v22  ;;  %v1119_v28 = vld [vmem:[%s3822_s18 + $0xbb8] sm:$0xff]  ;;  %v608_v29 = vld [vmem:[%s3815_s20 + $0xbc0] sm:$0xff] }
 0x1b2   : > { %v2653_v26 = vsel %vm1629_vm5, %v605_v17, %v2141_v20  ;;  %v1120_v30 = vld [vmem:[%s3822_s18 + $0xbc0] sm:$0xff]  ;;  %3164 = vst [vmem:[%s3838_s21 + $0xba0] sm:$0xff] %v2652_v25  ;;  %vm1631_vm7 = vcmp.gt.f32.partialorder %v1119_v28, 0.0  ;;  %v2143_v31 = vmul.f32 0.1, %v607_v24  ;;  %v609_v34 = vld [vmem:[%s3815_s20 + $0xbc8] sm:$0xff] }
 0x1b3   : > { %3165 = vst [vmem:[%s3838_s21 + $0xba8] sm:$0xff] %v2653_v26  ;;  %vm1632_vm8 = vcmp.gt.f32.partialorder %v1120_v30, 0.0  ;;  %v2144_v32 = vmul.f32 0.1, %v608_v29  ;;  %v2654_v33 = vsel %vm1630_vm6, %v606_v22, %v2142_v27  ;;  %v1121_v35 = vld [vmem:[%s3822_s18 + $0xbc8] sm:$0xff]  ;;  %v610_v36 = vld [vmem:[%s3815_s20 + $0xbd0] sm:$0xff] }
 0x1b4   : > { %3166 = vst [vmem:[%s3838_s21 + $0xbb0] sm:$0xff] %v2654_v33  ;;  %v2655_v37 = vsel %vm1631_vm7, %v607_v24, %v2143_v31  ;;  %vm1633_vm9 = vcmp.gt.f32.partialorder %v1121_v35, 0.0  ;;  %v2145_v39 = vmul.f32 0.1, %v609_v34  ;;  %v1122_v40 = vld [vmem:[%s3822_s18 + $0xbd0] sm:$0xff]  ;;  %v611_v41 = vld [vmem:[%s3815_s20 + $0xbd8] sm:$0xff] }
 0x1b5   : > { %v2656_v38 = vsel %vm1632_vm8, %v608_v29, %v2144_v32  ;;  %v1123_v42 = vld [vmem:[%s3822_s18 + $0xbd8] sm:$0xff]  ;;  %3167 = vst [vmem:[%s3838_s21 + $0xbb8] sm:$0xff] %v2655_v37  ;;  %vm1634_vm10 = vcmp.gt.f32.partialorder %v1122_v40, 0.0  ;;  %v2146_v43 = vmul.f32 0.1, %v610_v36  ;;  %v612_v46 = vld [vmem:[%s3815_s20 + $0xbe0] sm:$0xff] }
 0x1b6   : > { %3168 = vst [vmem:[%s3838_s21 + $0xbc0] sm:$0xff] %v2656_v38  ;;  %vm1635_vm11 = vcmp.gt.f32.partialorder %v1123_v42, 0.0  ;;  %v2147_v44 = vmul.f32 0.1, %v611_v41  ;;  %v2657_v45 = vsel %vm1633_vm9, %v609_v34, %v2145_v39  ;;  %v1124_v47 = vld [vmem:[%s3822_s18 + $0xbe0] sm:$0xff]  ;;  %v613_v48 = vld [vmem:[%s3815_s20 + $0xbe8] sm:$0xff] }
 0x1b7   : > { %3169 = vst [vmem:[%s3838_s21 + $0xbc8] sm:$0xff] %v2657_v45  ;;  %v2658_v49 = vsel %vm1634_vm10, %v610_v36, %v2146_v43  ;;  %vm1636_vm12 = vcmp.gt.f32.partialorder %v1124_v47, 0.0  ;;  %v2148_v51 = vmul.f32 0.1, %v612_v46  ;;  %v1125_v52 = vld [vmem:[%s3822_s18 + $0xbe8] sm:$0xff]  ;;  %v614_v53 = vld [vmem:[%s3815_s20 + $0xbf0] sm:$0xff] }
 0x1b8   : > { %v2659_v50 = vsel %vm1635_vm11, %v611_v41, %v2147_v44  ;;  %v1126_v54 = vld [vmem:[%s3822_s18 + $0xbf0] sm:$0xff]  ;;  %3170 = vst [vmem:[%s3838_s21 + $0xbd0] sm:$0xff] %v2658_v49  ;;  %vm1637_vm13 = vcmp.gt.f32.partialorder %v1125_v52, 0.0  ;;  %v2149_v55 = vmul.f32 0.1, %v613_v48  ;;  %v615_v58 = vld [vmem:[%s3815_s20 + $0xbf8] sm:$0xff] }
 0x1b9   : > { %3171 = vst [vmem:[%s3838_s21 + $0xbd8] sm:$0xff] %v2659_v50  ;;  %vm1638_vm14 = vcmp.gt.f32.partialorder %v1126_v54, 0.0  ;;  %v2150_v56 = vmul.f32 0.1, %v614_v53  ;;  %v2660_v57 = vsel %vm1636_vm12, %v612_v46, %v2148_v51  ;;  %v1127_v59 = vld [vmem:[%s3822_s18 + $0xbf8] sm:$0xff]  ;;  %v616_v60 = vld [vmem:[%s3815_s20 + $0xc00] sm:$0xff] }
 0x1ba   : > { %3172 = vst [vmem:[%s3838_s21 + $0xbe0] sm:$0xff] %v2660_v57  ;;  %v2661_v61 = vsel %vm1637_vm13, %v613_v48, %v2149_v55  ;;  %vm1639_vm15 = vcmp.gt.f32.partialorder %v1127_v59, 0.0  ;;  %v2151_v63 = vmul.f32 0.1, %v615_v58  ;;  %v1128_v0 = vld [vmem:[%s3822_s18 + $0xc00] sm:$0xff]  ;;  %v617_v1 = vld [vmem:[%s3815_s20 + $0xc08] sm:$0xff] }
 0x1bb   : > { %v2662_v62 = vsel %vm1638_vm14, %v614_v53, %v2150_v56  ;;  %v1129_v2 = vld [vmem:[%s3822_s18 + $0xc08] sm:$0xff]  ;;  %3173 = vst [vmem:[%s3838_s21 + $0xbe8] sm:$0xff] %v2661_v61  ;;  %vm1640_vm0 = vcmp.gt.f32.partialorder %v1128_v0, 0.0  ;;  %v2152_v3 = vmul.f32 0.1, %v616_v60  ;;  %v618_v6 = vld [vmem:[%s3815_s20 + $0xc10] sm:$0xff] }
 0x1bc   : > { %3174 = vst [vmem:[%s3838_s21 + $0xbf0] sm:$0xff] %v2662_v62  ;;  %vm1641_vm1 = vcmp.gt.f32.partialorder %v1129_v2, 0.0  ;;  %v2153_v4 = vmul.f32 0.1, %v617_v1  ;;  %v2663_v5 = vsel %vm1639_vm15, %v615_v58, %v2151_v63  ;;  %v1130_v7 = vld [vmem:[%s3822_s18 + $0xc10] sm:$0xff]  ;;  %v619_v8 = vld [vmem:[%s3815_s20 + $0xc18] sm:$0xff] }
 0x1bd   : > { %3175 = vst [vmem:[%s3838_s21 + $0xbf8] sm:$0xff] %v2663_v5  ;;  %v2664_v9 = vsel %vm1640_vm0, %v616_v60, %v2152_v3  ;;  %vm1642_vm2 = vcmp.gt.f32.partialorder %v1130_v7, 0.0  ;;  %v2154_v11 = vmul.f32 0.1, %v618_v6  ;;  %v1131_v12 = vld [vmem:[%s3822_s18 + $0xc18] sm:$0xff]  ;;  %v620_v13 = vld [vmem:[%s3815_s20 + $0xc20] sm:$0xff] }
 0x1be   : > { %v2665_v10 = vsel %vm1641_vm1, %v617_v1, %v2153_v4  ;;  %v1132_v14 = vld [vmem:[%s3822_s18 + $0xc20] sm:$0xff]  ;;  %3176 = vst [vmem:[%s3838_s21 + $0xc00] sm:$0xff] %v2664_v9  ;;  %vm1643_vm3 = vcmp.gt.f32.partialorder %v1131_v12, 0.0  ;;  %v2155_v15 = vmul.f32 0.1, %v619_v8  ;;  %v621_v18 = vld [vmem:[%s3815_s20 + $0xc28] sm:$0xff] }
 0x1bf   : > { %3177 = vst [vmem:[%s3838_s21 + $0xc08] sm:$0xff] %v2665_v10  ;;  %vm1644_vm4 = vcmp.gt.f32.partialorder %v1132_v14, 0.0  ;;  %v2156_v16 = vmul.f32 0.1, %v620_v13  ;;  %v2666_v17 = vsel %vm1642_vm2, %v618_v6, %v2154_v11  ;;  %v1133_v19 = vld [vmem:[%s3822_s18 + $0xc28] sm:$0xff]  ;;  %v622_v20 = vld [vmem:[%s3815_s20 + $0xc30] sm:$0xff] }
 0x1c0   : > { %3178 = vst [vmem:[%s3838_s21 + $0xc10] sm:$0xff] %v2666_v17  ;;  %v2667_v21 = vsel %vm1643_vm3, %v619_v8, %v2155_v15  ;;  %vm1645_vm5 = vcmp.gt.f32.partialorder %v1133_v19, 0.0  ;;  %v2157_v23 = vmul.f32 0.1, %v621_v18  ;;  %v1134_v24 = vld [vmem:[%s3822_s18 + $0xc30] sm:$0xff]  ;;  %v623_v25 = vld [vmem:[%s3815_s20 + $0xc38] sm:$0xff] }
 0x1c1   : > { %v2668_v22 = vsel %vm1644_vm4, %v620_v13, %v2156_v16  ;;  %v1135_v26 = vld [vmem:[%s3822_s18 + $0xc38] sm:$0xff]  ;;  %3179 = vst [vmem:[%s3838_s21 + $0xc18] sm:$0xff] %v2667_v21  ;;  %vm1646_vm6 = vcmp.gt.f32.partialorder %v1134_v24, 0.0  ;;  %v2158_v27 = vmul.f32 0.1, %v622_v20  ;;  %v624_v30 = vld [vmem:[%s3815_s20 + $0xc40] sm:$0xff] }
 0x1c2   : > { %3180 = vst [vmem:[%s3838_s21 + $0xc20] sm:$0xff] %v2668_v22  ;;  %vm1647_vm7 = vcmp.gt.f32.partialorder %v1135_v26, 0.0  ;;  %v2159_v28 = vmul.f32 0.1, %v623_v25  ;;  %v2669_v29 = vsel %vm1645_vm5, %v621_v18, %v2157_v23  ;;  %v1136_v31 = vld [vmem:[%s3822_s18 + $0xc40] sm:$0xff]  ;;  %v625_v32 = vld [vmem:[%s3815_s20 + $0xc48] sm:$0xff] }
 0x1c3   : > { %3181 = vst [vmem:[%s3838_s21 + $0xc28] sm:$0xff] %v2669_v29  ;;  %v2670_v33 = vsel %vm1646_vm6, %v622_v20, %v2158_v27  ;;  %vm1648_vm8 = vcmp.gt.f32.partialorder %v1136_v31, 0.0  ;;  %v2160_v35 = vmul.f32 0.1, %v624_v30  ;;  %v1137_v36 = vld [vmem:[%s3822_s18 + $0xc48] sm:$0xff]  ;;  %v626_v37 = vld [vmem:[%s3815_s20 + $0xc50] sm:$0xff] }
 0x1c4   : > { %v2671_v34 = vsel %vm1647_vm7, %v623_v25, %v2159_v28  ;;  %v1138_v38 = vld [vmem:[%s3822_s18 + $0xc50] sm:$0xff]  ;;  %3182 = vst [vmem:[%s3838_s21 + $0xc30] sm:$0xff] %v2670_v33  ;;  %vm1649_vm9 = vcmp.gt.f32.partialorder %v1137_v36, 0.0  ;;  %v2161_v39 = vmul.f32 0.1, %v625_v32  ;;  %v627_v42 = vld [vmem:[%s3815_s20 + $0xc58] sm:$0xff] }
 0x1c5   : > { %3183 = vst [vmem:[%s3838_s21 + $0xc38] sm:$0xff] %v2671_v34  ;;  %vm1650_vm10 = vcmp.gt.f32.partialorder %v1138_v38, 0.0  ;;  %v2162_v40 = vmul.f32 0.1, %v626_v37  ;;  %v2672_v41 = vsel %vm1648_vm8, %v624_v30, %v2160_v35  ;;  %v1139_v43 = vld [vmem:[%s3822_s18 + $0xc58] sm:$0xff]  ;;  %v628_v44 = vld [vmem:[%s3815_s20 + $0xc60] sm:$0xff] }
 0x1c6   : > { %3184 = vst [vmem:[%s3838_s21 + $0xc40] sm:$0xff] %v2672_v41  ;;  %v2673_v45 = vsel %vm1649_vm9, %v625_v32, %v2161_v39  ;;  %vm1651_vm11 = vcmp.gt.f32.partialorder %v1139_v43, 0.0  ;;  %v2163_v47 = vmul.f32 0.1, %v627_v42  ;;  %v1140_v48 = vld [vmem:[%s3822_s18 + $0xc60] sm:$0xff]  ;;  %v629_v49 = vld [vmem:[%s3815_s20 + $0xc68] sm:$0xff] }
 0x1c7   : > { %v2674_v46 = vsel %vm1650_vm10, %v626_v37, %v2162_v40  ;;  %v1141_v50 = vld [vmem:[%s3822_s18 + $0xc68] sm:$0xff]  ;;  %3185 = vst [vmem:[%s3838_s21 + $0xc48] sm:$0xff] %v2673_v45  ;;  %vm1652_vm12 = vcmp.gt.f32.partialorder %v1140_v48, 0.0  ;;  %v2164_v51 = vmul.f32 0.1, %v628_v44  ;;  %v630_v54 = vld [vmem:[%s3815_s20 + $0xc70] sm:$0xff] }
 0x1c8   : > { %3186 = vst [vmem:[%s3838_s21 + $0xc50] sm:$0xff] %v2674_v46  ;;  %vm1653_vm13 = vcmp.gt.f32.partialorder %v1141_v50, 0.0  ;;  %v2165_v52 = vmul.f32 0.1, %v629_v49  ;;  %v2675_v53 = vsel %vm1651_vm11, %v627_v42, %v2163_v47  ;;  %v1142_v55 = vld [vmem:[%s3822_s18 + $0xc70] sm:$0xff]  ;;  %v631_v56 = vld [vmem:[%s3815_s20 + $0xc78] sm:$0xff] }
 0x1c9   : > { %3187 = vst [vmem:[%s3838_s21 + $0xc58] sm:$0xff] %v2675_v53  ;;  %v2676_v57 = vsel %vm1652_vm12, %v628_v44, %v2164_v51  ;;  %vm1654_vm14 = vcmp.gt.f32.partialorder %v1142_v55, 0.0  ;;  %v2166_v59 = vmul.f32 0.1, %v630_v54  ;;  %v1143_v60 = vld [vmem:[%s3822_s18 + $0xc78] sm:$0xff]  ;;  %v632_v61 = vld [vmem:[%s3815_s20 + $0xc80] sm:$0xff] }
 0x1ca   : > { %v2677_v58 = vsel %vm1653_vm13, %v629_v49, %v2165_v52  ;;  %v1144_v62 = vld [vmem:[%s3822_s18 + $0xc80] sm:$0xff]  ;;  %3188 = vst [vmem:[%s3838_s21 + $0xc60] sm:$0xff] %v2676_v57  ;;  %vm1655_vm15 = vcmp.gt.f32.partialorder %v1143_v60, 0.0  ;;  %v2167_v63 = vmul.f32 0.1, %v631_v56  ;;  %v633_v2 = vld [vmem:[%s3815_s20 + $0xc88] sm:$0xff] }
 0x1cb   : > { %3189 = vst [vmem:[%s3838_s21 + $0xc68] sm:$0xff] %v2677_v58  ;;  %vm1656_vm0 = vcmp.gt.f32.partialorder %v1144_v62, 0.0  ;;  %v2168_v0 = vmul.f32 0.1, %v632_v61  ;;  %v2678_v1 = vsel %vm1654_vm14, %v630_v54, %v2166_v59  ;;  %v1145_v3 = vld [vmem:[%s3822_s18 + $0xc88] sm:$0xff]  ;;  %v634_v4 = vld [vmem:[%s3815_s20 + $0xc90] sm:$0xff] }
 0x1cc   : > { %3190 = vst [vmem:[%s3838_s21 + $0xc70] sm:$0xff] %v2678_v1  ;;  %v2679_v5 = vsel %vm1655_vm15, %v631_v56, %v2167_v63  ;;  %vm1657_vm1 = vcmp.gt.f32.partialorder %v1145_v3, 0.0  ;;  %v2169_v7 = vmul.f32 0.1, %v633_v2  ;;  %v1146_v8 = vld [vmem:[%s3822_s18 + $0xc90] sm:$0xff]  ;;  %v635_v9 = vld [vmem:[%s3815_s20 + $0xc98] sm:$0xff] }
 0x1cd   : > { %v2680_v6 = vsel %vm1656_vm0, %v632_v61, %v2168_v0  ;;  %v1147_v10 = vld [vmem:[%s3822_s18 + $0xc98] sm:$0xff]  ;;  %3191 = vst [vmem:[%s3838_s21 + $0xc78] sm:$0xff] %v2679_v5  ;;  %vm1658_vm2 = vcmp.gt.f32.partialorder %v1146_v8, 0.0  ;;  %v2170_v11 = vmul.f32 0.1, %v634_v4  ;;  %v636_v14 = vld [vmem:[%s3815_s20 + $0xca0] sm:$0xff] }
 0x1ce   : > { %3192 = vst [vmem:[%s3838_s21 + $0xc80] sm:$0xff] %v2680_v6  ;;  %vm1659_vm3 = vcmp.gt.f32.partialorder %v1147_v10, 0.0  ;;  %v2171_v12 = vmul.f32 0.1, %v635_v9  ;;  %v2681_v13 = vsel %vm1657_vm1, %v633_v2, %v2169_v7  ;;  %v1148_v15 = vld [vmem:[%s3822_s18 + $0xca0] sm:$0xff]  ;;  %v637_v16 = vld [vmem:[%s3815_s20 + $0xca8] sm:$0xff] }
 0x1cf   : > { %3193 = vst [vmem:[%s3838_s21 + $0xc88] sm:$0xff] %v2681_v13  ;;  %v2682_v17 = vsel %vm1658_vm2, %v634_v4, %v2170_v11  ;;  %vm1660_vm4 = vcmp.gt.f32.partialorder %v1148_v15, 0.0  ;;  %v2172_v19 = vmul.f32 0.1, %v636_v14  ;;  %v1149_v20 = vld [vmem:[%s3822_s18 + $0xca8] sm:$0xff]  ;;  %v638_v21 = vld [vmem:[%s3815_s20 + $0xcb0] sm:$0xff] }
 0x1d0   : > { %v2683_v18 = vsel %vm1659_vm3, %v635_v9, %v2171_v12  ;;  %v1150_v22 = vld [vmem:[%s3822_s18 + $0xcb0] sm:$0xff]  ;;  %3194 = vst [vmem:[%s3838_s21 + $0xc90] sm:$0xff] %v2682_v17  ;;  %vm1661_vm5 = vcmp.gt.f32.partialorder %v1149_v20, 0.0  ;;  %v2173_v23 = vmul.f32 0.1, %v637_v16  ;;  %v639_v26 = vld [vmem:[%s3815_s20 + $0xcb8] sm:$0xff] }
 0x1d1   : > { %3195 = vst [vmem:[%s3838_s21 + $0xc98] sm:$0xff] %v2683_v18  ;;  %vm1662_vm6 = vcmp.gt.f32.partialorder %v1150_v22, 0.0  ;;  %v2174_v24 = vmul.f32 0.1, %v638_v21  ;;  %v2684_v25 = vsel %vm1660_vm4, %v636_v14, %v2172_v19  ;;  %v1151_v27 = vld [vmem:[%s3822_s18 + $0xcb8] sm:$0xff]  ;;  %v640_v28 = vld [vmem:[%s3815_s20 + $0xcc0] sm:$0xff] }
 0x1d2   : > { %3196 = vst [vmem:[%s3838_s21 + $0xca0] sm:$0xff] %v2684_v25  ;;  %v2685_v29 = vsel %vm1661_vm5, %v637_v16, %v2173_v23  ;;  %vm1663_vm7 = vcmp.gt.f32.partialorder %v1151_v27, 0.0  ;;  %v2175_v31 = vmul.f32 0.1, %v639_v26  ;;  %v1152_v32 = vld [vmem:[%s3822_s18 + $0xcc0] sm:$0xff]  ;;  %v641_v33 = vld [vmem:[%s3815_s20 + $0xcc8] sm:$0xff] }
 0x1d3   : > { %v2686_v30 = vsel %vm1662_vm6, %v638_v21, %v2174_v24  ;;  %v1153_v34 = vld [vmem:[%s3822_s18 + $0xcc8] sm:$0xff]  ;;  %3197 = vst [vmem:[%s3838_s21 + $0xca8] sm:$0xff] %v2685_v29  ;;  %vm1664_vm8 = vcmp.gt.f32.partialorder %v1152_v32, 0.0  ;;  %v2176_v35 = vmul.f32 0.1, %v640_v28  ;;  %v642_v38 = vld [vmem:[%s3815_s20 + $0xcd0] sm:$0xff] }
 0x1d4   : > { %3198 = vst [vmem:[%s3838_s21 + $0xcb0] sm:$0xff] %v2686_v30  ;;  %vm1665_vm9 = vcmp.gt.f32.partialorder %v1153_v34, 0.0  ;;  %v2177_v36 = vmul.f32 0.1, %v641_v33  ;;  %v2687_v37 = vsel %vm1663_vm7, %v639_v26, %v2175_v31  ;;  %v1154_v39 = vld [vmem:[%s3822_s18 + $0xcd0] sm:$0xff]  ;;  %v643_v40 = vld [vmem:[%s3815_s20 + $0xcd8] sm:$0xff] }
 0x1d5   : > { %3199 = vst [vmem:[%s3838_s21 + $0xcb8] sm:$0xff] %v2687_v37  ;;  %v2688_v41 = vsel %vm1664_vm8, %v640_v28, %v2176_v35  ;;  %vm1666_vm10 = vcmp.gt.f32.partialorder %v1154_v39, 0.0  ;;  %v2178_v43 = vmul.f32 0.1, %v642_v38  ;;  %v1155_v44 = vld [vmem:[%s3822_s18 + $0xcd8] sm:$0xff]  ;;  %v644_v45 = vld [vmem:[%s3815_s20 + $0xce0] sm:$0xff] }
 0x1d6   : > { %v2689_v42 = vsel %vm1665_vm9, %v641_v33, %v2177_v36  ;;  %v1156_v46 = vld [vmem:[%s3822_s18 + $0xce0] sm:$0xff]  ;;  %3200 = vst [vmem:[%s3838_s21 + $0xcc0] sm:$0xff] %v2688_v41  ;;  %vm1667_vm11 = vcmp.gt.f32.partialorder %v1155_v44, 0.0  ;;  %v2179_v47 = vmul.f32 0.1, %v643_v40  ;;  %v645_v50 = vld [vmem:[%s3815_s20 + $0xce8] sm:$0xff] }
 0x1d7   : > { %3201 = vst [vmem:[%s3838_s21 + $0xcc8] sm:$0xff] %v2689_v42  ;;  %vm1668_vm12 = vcmp.gt.f32.partialorder %v1156_v46, 0.0  ;;  %v2180_v48 = vmul.f32 0.1, %v644_v45  ;;  %v2690_v49 = vsel %vm1666_vm10, %v642_v38, %v2178_v43  ;;  %v1157_v51 = vld [vmem:[%s3822_s18 + $0xce8] sm:$0xff]  ;;  %v646_v52 = vld [vmem:[%s3815_s20 + $0xcf0] sm:$0xff] }
 0x1d8   : > { %3202 = vst [vmem:[%s3838_s21 + $0xcd0] sm:$0xff] %v2690_v49  ;;  %v2691_v53 = vsel %vm1667_vm11, %v643_v40, %v2179_v47  ;;  %vm1669_vm13 = vcmp.gt.f32.partialorder %v1157_v51, 0.0  ;;  %v2181_v55 = vmul.f32 0.1, %v645_v50  ;;  %v1158_v56 = vld [vmem:[%s3822_s18 + $0xcf0] sm:$0xff]  ;;  %v647_v57 = vld [vmem:[%s3815_s20 + $0xcf8] sm:$0xff] }
 0x1d9   : > { %v2692_v54 = vsel %vm1668_vm12, %v644_v45, %v2180_v48  ;;  %v1159_v58 = vld [vmem:[%s3822_s18 + $0xcf8] sm:$0xff]  ;;  %3203 = vst [vmem:[%s3838_s21 + $0xcd8] sm:$0xff] %v2691_v53  ;;  %vm1670_vm14 = vcmp.gt.f32.partialorder %v1158_v56, 0.0  ;;  %v2182_v59 = vmul.f32 0.1, %v646_v52  ;;  %v648_v62 = vld [vmem:[%s3815_s20 + $0xd00] sm:$0xff] }
 0x1da   : > { %3204 = vst [vmem:[%s3838_s21 + $0xce0] sm:$0xff] %v2692_v54  ;;  %vm1671_vm15 = vcmp.gt.f32.partialorder %v1159_v58, 0.0  ;;  %v2183_v60 = vmul.f32 0.1, %v647_v57  ;;  %v2693_v61 = vsel %vm1669_vm13, %v645_v50, %v2181_v55  ;;  %v1160_v63 = vld [vmem:[%s3822_s18 + $0xd00] sm:$0xff]  ;;  %v649_v0 = vld [vmem:[%s3815_s20 + $0xd08] sm:$0xff] }
 0x1db   : > { %3205 = vst [vmem:[%s3838_s21 + $0xce8] sm:$0xff] %v2693_v61  ;;  %v2694_v1 = vsel %vm1670_vm14, %v646_v52, %v2182_v59  ;;  %vm1672_vm0 = vcmp.gt.f32.partialorder %v1160_v63, 0.0  ;;  %v2184_v3 = vmul.f32 0.1, %v648_v62  ;;  %v1161_v4 = vld [vmem:[%s3822_s18 + $0xd08] sm:$0xff]  ;;  %v650_v5 = vld [vmem:[%s3815_s20 + $0xd10] sm:$0xff] }
 0x1dc   : > { %v2695_v2 = vsel %vm1671_vm15, %v647_v57, %v2183_v60  ;;  %v1162_v6 = vld [vmem:[%s3822_s18 + $0xd10] sm:$0xff]  ;;  %3206 = vst [vmem:[%s3838_s21 + $0xcf0] sm:$0xff] %v2694_v1  ;;  %vm1673_vm1 = vcmp.gt.f32.partialorder %v1161_v4, 0.0  ;;  %v2185_v7 = vmul.f32 0.1, %v649_v0  ;;  %v651_v10 = vld [vmem:[%s3815_s20 + $0xd18] sm:$0xff] }
 0x1dd   : > { %3207 = vst [vmem:[%s3838_s21 + $0xcf8] sm:$0xff] %v2695_v2  ;;  %vm1674_vm2 = vcmp.gt.f32.partialorder %v1162_v6, 0.0  ;;  %v2186_v8 = vmul.f32 0.1, %v650_v5  ;;  %v2696_v9 = vsel %vm1672_vm0, %v648_v62, %v2184_v3  ;;  %v1163_v11 = vld [vmem:[%s3822_s18 + $0xd18] sm:$0xff]  ;;  %v652_v12 = vld [vmem:[%s3815_s20 + $0xd20] sm:$0xff] }
 0x1de   : > { %3208 = vst [vmem:[%s3838_s21 + $0xd00] sm:$0xff] %v2696_v9  ;;  %v2697_v13 = vsel %vm1673_vm1, %v649_v0, %v2185_v7  ;;  %vm1675_vm3 = vcmp.gt.f32.partialorder %v1163_v11, 0.0  ;;  %v2187_v15 = vmul.f32 0.1, %v651_v10  ;;  %v1164_v16 = vld [vmem:[%s3822_s18 + $0xd20] sm:$0xff]  ;;  %v653_v17 = vld [vmem:[%s3815_s20 + $0xd28] sm:$0xff] }
 0x1df   : > { %v2698_v14 = vsel %vm1674_vm2, %v650_v5, %v2186_v8  ;;  %v1165_v18 = vld [vmem:[%s3822_s18 + $0xd28] sm:$0xff]  ;;  %3209 = vst [vmem:[%s3838_s21 + $0xd08] sm:$0xff] %v2697_v13  ;;  %vm1676_vm4 = vcmp.gt.f32.partialorder %v1164_v16, 0.0  ;;  %v2188_v19 = vmul.f32 0.1, %v652_v12  ;;  %v654_v22 = vld [vmem:[%s3815_s20 + $0xd30] sm:$0xff] }
 0x1e0   : > { %3210 = vst [vmem:[%s3838_s21 + $0xd10] sm:$0xff] %v2698_v14  ;;  %vm1677_vm5 = vcmp.gt.f32.partialorder %v1165_v18, 0.0  ;;  %v2189_v20 = vmul.f32 0.1, %v653_v17  ;;  %v2699_v21 = vsel %vm1675_vm3, %v651_v10, %v2187_v15  ;;  %v1166_v23 = vld [vmem:[%s3822_s18 + $0xd30] sm:$0xff]  ;;  %v655_v24 = vld [vmem:[%s3815_s20 + $0xd38] sm:$0xff] }
 0x1e1   : > { %3211 = vst [vmem:[%s3838_s21 + $0xd18] sm:$0xff] %v2699_v21  ;;  %v2700_v25 = vsel %vm1676_vm4, %v652_v12, %v2188_v19  ;;  %vm1678_vm6 = vcmp.gt.f32.partialorder %v1166_v23, 0.0  ;;  %v2190_v27 = vmul.f32 0.1, %v654_v22  ;;  %v1167_v28 = vld [vmem:[%s3822_s18 + $0xd38] sm:$0xff]  ;;  %v656_v29 = vld [vmem:[%s3815_s20 + $0xd40] sm:$0xff] }
 0x1e2   : > { %v2701_v26 = vsel %vm1677_vm5, %v653_v17, %v2189_v20  ;;  %v1168_v30 = vld [vmem:[%s3822_s18 + $0xd40] sm:$0xff]  ;;  %3212 = vst [vmem:[%s3838_s21 + $0xd20] sm:$0xff] %v2700_v25  ;;  %vm1679_vm7 = vcmp.gt.f32.partialorder %v1167_v28, 0.0  ;;  %v2191_v31 = vmul.f32 0.1, %v655_v24  ;;  %v657_v34 = vld [vmem:[%s3815_s20 + $0xd48] sm:$0xff] }
 0x1e3   : > { %3213 = vst [vmem:[%s3838_s21 + $0xd28] sm:$0xff] %v2701_v26  ;;  %vm1680_vm8 = vcmp.gt.f32.partialorder %v1168_v30, 0.0  ;;  %v2192_v32 = vmul.f32 0.1, %v656_v29  ;;  %v2702_v33 = vsel %vm1678_vm6, %v654_v22, %v2190_v27  ;;  %v1169_v35 = vld [vmem:[%s3822_s18 + $0xd48] sm:$0xff]  ;;  %v658_v36 = vld [vmem:[%s3815_s20 + $0xd50] sm:$0xff] }
 0x1e4   : > { %3214 = vst [vmem:[%s3838_s21 + $0xd30] sm:$0xff] %v2702_v33  ;;  %v2703_v37 = vsel %vm1679_vm7, %v655_v24, %v2191_v31  ;;  %vm1681_vm9 = vcmp.gt.f32.partialorder %v1169_v35, 0.0  ;;  %v2193_v39 = vmul.f32 0.1, %v657_v34  ;;  %v1170_v40 = vld [vmem:[%s3822_s18 + $0xd50] sm:$0xff]  ;;  %v659_v41 = vld [vmem:[%s3815_s20 + $0xd58] sm:$0xff] }
 0x1e5   : > { %v2704_v38 = vsel %vm1680_vm8, %v656_v29, %v2192_v32  ;;  %v1171_v42 = vld [vmem:[%s3822_s18 + $0xd58] sm:$0xff]  ;;  %3215 = vst [vmem:[%s3838_s21 + $0xd38] sm:$0xff] %v2703_v37  ;;  %vm1682_vm10 = vcmp.gt.f32.partialorder %v1170_v40, 0.0  ;;  %v2194_v43 = vmul.f32 0.1, %v658_v36  ;;  %v660_v46 = vld [vmem:[%s3815_s20 + $0xd60] sm:$0xff] }
 0x1e6   : > { %3216 = vst [vmem:[%s3838_s21 + $0xd40] sm:$0xff] %v2704_v38  ;;  %vm1683_vm11 = vcmp.gt.f32.partialorder %v1171_v42, 0.0  ;;  %v2195_v44 = vmul.f32 0.1, %v659_v41  ;;  %v2705_v45 = vsel %vm1681_vm9, %v657_v34, %v2193_v39  ;;  %v1172_v47 = vld [vmem:[%s3822_s18 + $0xd60] sm:$0xff]  ;;  %v661_v48 = vld [vmem:[%s3815_s20 + $0xd68] sm:$0xff] }
 0x1e7   : > { %3217 = vst [vmem:[%s3838_s21 + $0xd48] sm:$0xff] %v2705_v45  ;;  %v2706_v49 = vsel %vm1682_vm10, %v658_v36, %v2194_v43  ;;  %vm1684_vm12 = vcmp.gt.f32.partialorder %v1172_v47, 0.0  ;;  %v2196_v51 = vmul.f32 0.1, %v660_v46  ;;  %v1173_v52 = vld [vmem:[%s3822_s18 + $0xd68] sm:$0xff]  ;;  %v662_v53 = vld [vmem:[%s3815_s20 + $0xd70] sm:$0xff] }
 0x1e8   : > { %v2707_v50 = vsel %vm1683_vm11, %v659_v41, %v2195_v44  ;;  %v1174_v54 = vld [vmem:[%s3822_s18 + $0xd70] sm:$0xff]  ;;  %3218 = vst [vmem:[%s3838_s21 + $0xd50] sm:$0xff] %v2706_v49  ;;  %vm1685_vm13 = vcmp.gt.f32.partialorder %v1173_v52, 0.0  ;;  %v2197_v55 = vmul.f32 0.1, %v661_v48  ;;  %v663_v58 = vld [vmem:[%s3815_s20 + $0xd78] sm:$0xff] }
 0x1e9   : > { %3219 = vst [vmem:[%s3838_s21 + $0xd58] sm:$0xff] %v2707_v50  ;;  %vm1686_vm14 = vcmp.gt.f32.partialorder %v1174_v54, 0.0  ;;  %v2198_v56 = vmul.f32 0.1, %v662_v53  ;;  %v2708_v57 = vsel %vm1684_vm12, %v660_v46, %v2196_v51  ;;  %v1175_v59 = vld [vmem:[%s3822_s18 + $0xd78] sm:$0xff]  ;;  %v664_v60 = vld [vmem:[%s3815_s20 + $0xd80] sm:$0xff] }
 0x1ea   : > { %3220 = vst [vmem:[%s3838_s21 + $0xd60] sm:$0xff] %v2708_v57  ;;  %v2709_v61 = vsel %vm1685_vm13, %v661_v48, %v2197_v55  ;;  %vm1687_vm15 = vcmp.gt.f32.partialorder %v1175_v59, 0.0  ;;  %v2199_v63 = vmul.f32 0.1, %v663_v58  ;;  %v1176_v0 = vld [vmem:[%s3822_s18 + $0xd80] sm:$0xff]  ;;  %v665_v1 = vld [vmem:[%s3815_s20 + $0xd88] sm:$0xff] }
 0x1eb   : > { %v2710_v62 = vsel %vm1686_vm14, %v662_v53, %v2198_v56  ;;  %v1177_v2 = vld [vmem:[%s3822_s18 + $0xd88] sm:$0xff]  ;;  %3221 = vst [vmem:[%s3838_s21 + $0xd68] sm:$0xff] %v2709_v61  ;;  %vm1688_vm0 = vcmp.gt.f32.partialorder %v1176_v0, 0.0  ;;  %v2200_v3 = vmul.f32 0.1, %v664_v60  ;;  %v666_v6 = vld [vmem:[%s3815_s20 + $0xd90] sm:$0xff] }
 0x1ec   : > { %3222 = vst [vmem:[%s3838_s21 + $0xd70] sm:$0xff] %v2710_v62  ;;  %vm1689_vm1 = vcmp.gt.f32.partialorder %v1177_v2, 0.0  ;;  %v2201_v4 = vmul.f32 0.1, %v665_v1  ;;  %v2711_v5 = vsel %vm1687_vm15, %v663_v58, %v2199_v63  ;;  %v1178_v7 = vld [vmem:[%s3822_s18 + $0xd90] sm:$0xff]  ;;  %v667_v8 = vld [vmem:[%s3815_s20 + $0xd98] sm:$0xff] }
 0x1ed   : > { %3223 = vst [vmem:[%s3838_s21 + $0xd78] sm:$0xff] %v2711_v5  ;;  %v2712_v9 = vsel %vm1688_vm0, %v664_v60, %v2200_v3  ;;  %vm1690_vm2 = vcmp.gt.f32.partialorder %v1178_v7, 0.0  ;;  %v2202_v11 = vmul.f32 0.1, %v666_v6  ;;  %v1179_v12 = vld [vmem:[%s3822_s18 + $0xd98] sm:$0xff]  ;;  %v668_v13 = vld [vmem:[%s3815_s20 + $0xda0] sm:$0xff] }
 0x1ee   : > { %v2713_v10 = vsel %vm1689_vm1, %v665_v1, %v2201_v4  ;;  %v1180_v14 = vld [vmem:[%s3822_s18 + $0xda0] sm:$0xff]  ;;  %3224 = vst [vmem:[%s3838_s21 + $0xd80] sm:$0xff] %v2712_v9  ;;  %vm1691_vm3 = vcmp.gt.f32.partialorder %v1179_v12, 0.0  ;;  %v2203_v15 = vmul.f32 0.1, %v667_v8  ;;  %v669_v18 = vld [vmem:[%s3815_s20 + $0xda8] sm:$0xff] }
 0x1ef   : > { %3225 = vst [vmem:[%s3838_s21 + $0xd88] sm:$0xff] %v2713_v10  ;;  %vm1692_vm4 = vcmp.gt.f32.partialorder %v1180_v14, 0.0  ;;  %v2204_v16 = vmul.f32 0.1, %v668_v13  ;;  %v2714_v17 = vsel %vm1690_vm2, %v666_v6, %v2202_v11  ;;  %v1181_v19 = vld [vmem:[%s3822_s18 + $0xda8] sm:$0xff]  ;;  %v670_v20 = vld [vmem:[%s3815_s20 + $0xdb0] sm:$0xff] }
 0x1f0   : > { %3226 = vst [vmem:[%s3838_s21 + $0xd90] sm:$0xff] %v2714_v17  ;;  %v2715_v21 = vsel %vm1691_vm3, %v667_v8, %v2203_v15  ;;  %vm1693_vm5 = vcmp.gt.f32.partialorder %v1181_v19, 0.0  ;;  %v2205_v23 = vmul.f32 0.1, %v669_v18  ;;  %v1182_v24 = vld [vmem:[%s3822_s18 + $0xdb0] sm:$0xff]  ;;  %v671_v25 = vld [vmem:[%s3815_s20 + $0xdb8] sm:$0xff] }
 0x1f1   : > { %v2716_v22 = vsel %vm1692_vm4, %v668_v13, %v2204_v16  ;;  %v1183_v26 = vld [vmem:[%s3822_s18 + $0xdb8] sm:$0xff]  ;;  %3227 = vst [vmem:[%s3838_s21 + $0xd98] sm:$0xff] %v2715_v21  ;;  %vm1694_vm6 = vcmp.gt.f32.partialorder %v1182_v24, 0.0  ;;  %v2206_v27 = vmul.f32 0.1, %v670_v20  ;;  %v672_v30 = vld [vmem:[%s3815_s20 + $0xdc0] sm:$0xff] }
 0x1f2   : > { %3228 = vst [vmem:[%s3838_s21 + $0xda0] sm:$0xff] %v2716_v22  ;;  %vm1695_vm7 = vcmp.gt.f32.partialorder %v1183_v26, 0.0  ;;  %v2207_v28 = vmul.f32 0.1, %v671_v25  ;;  %v2717_v29 = vsel %vm1693_vm5, %v669_v18, %v2205_v23  ;;  %v1184_v31 = vld [vmem:[%s3822_s18 + $0xdc0] sm:$0xff]  ;;  %v673_v32 = vld [vmem:[%s3815_s20 + $0xdc8] sm:$0xff] }
 0x1f3   : > { %3229 = vst [vmem:[%s3838_s21 + $0xda8] sm:$0xff] %v2717_v29  ;;  %v2718_v33 = vsel %vm1694_vm6, %v670_v20, %v2206_v27  ;;  %vm1696_vm8 = vcmp.gt.f32.partialorder %v1184_v31, 0.0  ;;  %v2208_v35 = vmul.f32 0.1, %v672_v30  ;;  %v1185_v36 = vld [vmem:[%s3822_s18 + $0xdc8] sm:$0xff]  ;;  %v674_v37 = vld [vmem:[%s3815_s20 + $0xdd0] sm:$0xff] }
 0x1f4   : > { %v2719_v34 = vsel %vm1695_vm7, %v671_v25, %v2207_v28  ;;  %v1186_v38 = vld [vmem:[%s3822_s18 + $0xdd0] sm:$0xff]  ;;  %3230 = vst [vmem:[%s3838_s21 + $0xdb0] sm:$0xff] %v2718_v33  ;;  %vm1697_vm9 = vcmp.gt.f32.partialorder %v1185_v36, 0.0  ;;  %v2209_v39 = vmul.f32 0.1, %v673_v32  ;;  %v675_v42 = vld [vmem:[%s3815_s20 + $0xdd8] sm:$0xff] }
 0x1f5   : > { %3231 = vst [vmem:[%s3838_s21 + $0xdb8] sm:$0xff] %v2719_v34  ;;  %vm1698_vm10 = vcmp.gt.f32.partialorder %v1186_v38, 0.0  ;;  %v2210_v40 = vmul.f32 0.1, %v674_v37  ;;  %v2720_v41 = vsel %vm1696_vm8, %v672_v30, %v2208_v35  ;;  %v1187_v43 = vld [vmem:[%s3822_s18 + $0xdd8] sm:$0xff]  ;;  %v676_v44 = vld [vmem:[%s3815_s20 + $0xde0] sm:$0xff] }
 0x1f6   : > { %3232 = vst [vmem:[%s3838_s21 + $0xdc0] sm:$0xff] %v2720_v41  ;;  %v2721_v45 = vsel %vm1697_vm9, %v673_v32, %v2209_v39  ;;  %vm1699_vm11 = vcmp.gt.f32.partialorder %v1187_v43, 0.0  ;;  %v2211_v47 = vmul.f32 0.1, %v675_v42  ;;  %v1188_v48 = vld [vmem:[%s3822_s18 + $0xde0] sm:$0xff]  ;;  %v677_v49 = vld [vmem:[%s3815_s20 + $0xde8] sm:$0xff] }
 0x1f7   : > { %v2722_v46 = vsel %vm1698_vm10, %v674_v37, %v2210_v40  ;;  %v1189_v50 = vld [vmem:[%s3822_s18 + $0xde8] sm:$0xff]  ;;  %3233 = vst [vmem:[%s3838_s21 + $0xdc8] sm:$0xff] %v2721_v45  ;;  %vm1700_vm12 = vcmp.gt.f32.partialorder %v1188_v48, 0.0  ;;  %v2212_v51 = vmul.f32 0.1, %v676_v44  ;;  %v678_v54 = vld [vmem:[%s3815_s20 + $0xdf0] sm:$0xff] }
 0x1f8   : > { %3234 = vst [vmem:[%s3838_s21 + $0xdd0] sm:$0xff] %v2722_v46  ;;  %vm1701_vm13 = vcmp.gt.f32.partialorder %v1189_v50, 0.0  ;;  %v2213_v52 = vmul.f32 0.1, %v677_v49  ;;  %v2723_v53 = vsel %vm1699_vm11, %v675_v42, %v2211_v47  ;;  %v1190_v55 = vld [vmem:[%s3822_s18 + $0xdf0] sm:$0xff]  ;;  %v679_v56 = vld [vmem:[%s3815_s20 + $0xdf8] sm:$0xff] }
 0x1f9   : > { %3235 = vst [vmem:[%s3838_s21 + $0xdd8] sm:$0xff] %v2723_v53  ;;  %v2724_v57 = vsel %vm1700_vm12, %v676_v44, %v2212_v51  ;;  %vm1702_vm14 = vcmp.gt.f32.partialorder %v1190_v55, 0.0  ;;  %v2214_v59 = vmul.f32 0.1, %v678_v54  ;;  %v1191_v60 = vld [vmem:[%s3822_s18 + $0xdf8] sm:$0xff]  ;;  %v680_v61 = vld [vmem:[%s3815_s20 + $0xe00] sm:$0xff] }
 0x1fa   : > { %v2725_v58 = vsel %vm1701_vm13, %v677_v49, %v2213_v52  ;;  %v1192_v62 = vld [vmem:[%s3822_s18 + $0xe00] sm:$0xff]  ;;  %3236 = vst [vmem:[%s3838_s21 + $0xde0] sm:$0xff] %v2724_v57  ;;  %vm1703_vm15 = vcmp.gt.f32.partialorder %v1191_v60, 0.0  ;;  %v2215_v63 = vmul.f32 0.1, %v679_v56  ;;  %v681_v2 = vld [vmem:[%s3815_s20 + $0xe08] sm:$0xff] }
 0x1fb   : > { %3237 = vst [vmem:[%s3838_s21 + $0xde8] sm:$0xff] %v2725_v58  ;;  %vm1704_vm0 = vcmp.gt.f32.partialorder %v1192_v62, 0.0  ;;  %v2216_v0 = vmul.f32 0.1, %v680_v61  ;;  %v2726_v1 = vsel %vm1702_vm14, %v678_v54, %v2214_v59  ;;  %v1193_v3 = vld [vmem:[%s3822_s18 + $0xe08] sm:$0xff]  ;;  %v682_v4 = vld [vmem:[%s3815_s20 + $0xe10] sm:$0xff] }
 0x1fc   : > { %3238 = vst [vmem:[%s3838_s21 + $0xdf0] sm:$0xff] %v2726_v1  ;;  %v2727_v5 = vsel %vm1703_vm15, %v679_v56, %v2215_v63  ;;  %vm1705_vm1 = vcmp.gt.f32.partialorder %v1193_v3, 0.0  ;;  %v2217_v7 = vmul.f32 0.1, %v681_v2  ;;  %v1194_v8 = vld [vmem:[%s3822_s18 + $0xe10] sm:$0xff]  ;;  %v683_v9 = vld [vmem:[%s3815_s20 + $0xe18] sm:$0xff] }
 0x1fd   : > { %v2728_v6 = vsel %vm1704_vm0, %v680_v61, %v2216_v0  ;;  %v1195_v10 = vld [vmem:[%s3822_s18 + $0xe18] sm:$0xff]  ;;  %3239 = vst [vmem:[%s3838_s21 + $0xdf8] sm:$0xff] %v2727_v5  ;;  %vm1706_vm2 = vcmp.gt.f32.partialorder %v1194_v8, 0.0  ;;  %v2218_v11 = vmul.f32 0.1, %v682_v4  ;;  %v684_v14 = vld [vmem:[%s3815_s20 + $0xe20] sm:$0xff] }
 0x1fe   : > { %3240 = vst [vmem:[%s3838_s21 + $0xe00] sm:$0xff] %v2728_v6  ;;  %vm1707_vm3 = vcmp.gt.f32.partialorder %v1195_v10, 0.0  ;;  %v2219_v12 = vmul.f32 0.1, %v683_v9  ;;  %v2729_v13 = vsel %vm1705_vm1, %v681_v2, %v2217_v7  ;;  %v1196_v15 = vld [vmem:[%s3822_s18 + $0xe20] sm:$0xff]  ;;  %v685_v16 = vld [vmem:[%s3815_s20 + $0xe28] sm:$0xff] }
 0x1ff   : > { %3241 = vst [vmem:[%s3838_s21 + $0xe08] sm:$0xff] %v2729_v13  ;;  %v2730_v17 = vsel %vm1706_vm2, %v682_v4, %v2218_v11  ;;  %vm1708_vm4 = vcmp.gt.f32.partialorder %v1196_v15, 0.0  ;;  %v2220_v19 = vmul.f32 0.1, %v684_v14  ;;  %v1197_v20 = vld [vmem:[%s3822_s18 + $0xe28] sm:$0xff]  ;;  %v686_v21 = vld [vmem:[%s3815_s20 + $0xe30] sm:$0xff] }
 0x200   : > { %v2731_v18 = vsel %vm1707_vm3, %v683_v9, %v2219_v12  ;;  %v1198_v22 = vld [vmem:[%s3822_s18 + $0xe30] sm:$0xff]  ;;  %3242 = vst [vmem:[%s3838_s21 + $0xe10] sm:$0xff] %v2730_v17  ;;  %vm1709_vm5 = vcmp.gt.f32.partialorder %v1197_v20, 0.0  ;;  %v2221_v23 = vmul.f32 0.1, %v685_v16  ;;  %v687_v26 = vld [vmem:[%s3815_s20 + $0xe38] sm:$0xff] }
 0x201   : > { %3243 = vst [vmem:[%s3838_s21 + $0xe18] sm:$0xff] %v2731_v18  ;;  %vm1710_vm6 = vcmp.gt.f32.partialorder %v1198_v22, 0.0  ;;  %v2222_v24 = vmul.f32 0.1, %v686_v21  ;;  %v2732_v25 = vsel %vm1708_vm4, %v684_v14, %v2220_v19  ;;  %v1199_v27 = vld [vmem:[%s3822_s18 + $0xe38] sm:$0xff]  ;;  %v688_v28 = vld [vmem:[%s3815_s20 + $0xe40] sm:$0xff] }
 0x202   : > { %3244 = vst [vmem:[%s3838_s21 + $0xe20] sm:$0xff] %v2732_v25  ;;  %v2733_v29 = vsel %vm1709_vm5, %v685_v16, %v2221_v23  ;;  %vm1711_vm7 = vcmp.gt.f32.partialorder %v1199_v27, 0.0  ;;  %v2223_v31 = vmul.f32 0.1, %v687_v26  ;;  %v1200_v32 = vld [vmem:[%s3822_s18 + $0xe40] sm:$0xff]  ;;  %v689_v33 = vld [vmem:[%s3815_s20 + $0xe48] sm:$0xff] }
 0x203   : > { %v2734_v30 = vsel %vm1710_vm6, %v686_v21, %v2222_v24  ;;  %v1201_v34 = vld [vmem:[%s3822_s18 + $0xe48] sm:$0xff]  ;;  %3245 = vst [vmem:[%s3838_s21 + $0xe28] sm:$0xff] %v2733_v29  ;;  %vm1712_vm8 = vcmp.gt.f32.partialorder %v1200_v32, 0.0  ;;  %v2224_v35 = vmul.f32 0.1, %v688_v28  ;;  %v690_v38 = vld [vmem:[%s3815_s20 + $0xe50] sm:$0xff] }
 0x204   : > { %3246 = vst [vmem:[%s3838_s21 + $0xe30] sm:$0xff] %v2734_v30  ;;  %vm1713_vm9 = vcmp.gt.f32.partialorder %v1201_v34, 0.0  ;;  %v2225_v36 = vmul.f32 0.1, %v689_v33  ;;  %v2735_v37 = vsel %vm1711_vm7, %v687_v26, %v2223_v31  ;;  %v1202_v39 = vld [vmem:[%s3822_s18 + $0xe50] sm:$0xff]  ;;  %v691_v40 = vld [vmem:[%s3815_s20 + $0xe58] sm:$0xff] }
 0x205   : > { %3247 = vst [vmem:[%s3838_s21 + $0xe38] sm:$0xff] %v2735_v37  ;;  %v2736_v41 = vsel %vm1712_vm8, %v688_v28, %v2224_v35  ;;  %vm1714_vm10 = vcmp.gt.f32.partialorder %v1202_v39, 0.0  ;;  %v2226_v43 = vmul.f32 0.1, %v690_v38  ;;  %v1203_v44 = vld [vmem:[%s3822_s18 + $0xe58] sm:$0xff]  ;;  %v692_v45 = vld [vmem:[%s3815_s20 + $0xe60] sm:$0xff] }
 0x206   : > { %v2737_v42 = vsel %vm1713_vm9, %v689_v33, %v2225_v36  ;;  %v1204_v46 = vld [vmem:[%s3822_s18 + $0xe60] sm:$0xff]  ;;  %3248 = vst [vmem:[%s3838_s21 + $0xe40] sm:$0xff] %v2736_v41  ;;  %vm1715_vm11 = vcmp.gt.f32.partialorder %v1203_v44, 0.0  ;;  %v2227_v47 = vmul.f32 0.1, %v691_v40  ;;  %v693_v50 = vld [vmem:[%s3815_s20 + $0xe68] sm:$0xff] }
 0x207   : > { %3249 = vst [vmem:[%s3838_s21 + $0xe48] sm:$0xff] %v2737_v42  ;;  %vm1716_vm12 = vcmp.gt.f32.partialorder %v1204_v46, 0.0  ;;  %v2228_v48 = vmul.f32 0.1, %v692_v45  ;;  %v2738_v49 = vsel %vm1714_vm10, %v690_v38, %v2226_v43  ;;  %v1205_v51 = vld [vmem:[%s3822_s18 + $0xe68] sm:$0xff]  ;;  %v694_v52 = vld [vmem:[%s3815_s20 + $0xe70] sm:$0xff] }
 0x208   : > { %3250 = vst [vmem:[%s3838_s21 + $0xe50] sm:$0xff] %v2738_v49  ;;  %v2739_v53 = vsel %vm1715_vm11, %v691_v40, %v2227_v47  ;;  %vm1717_vm13 = vcmp.gt.f32.partialorder %v1205_v51, 0.0  ;;  %v2229_v55 = vmul.f32 0.1, %v693_v50  ;;  %v1206_v56 = vld [vmem:[%s3822_s18 + $0xe70] sm:$0xff]  ;;  %v695_v57 = vld [vmem:[%s3815_s20 + $0xe78] sm:$0xff] }
 0x209   : > { %v2740_v54 = vsel %vm1716_vm12, %v692_v45, %v2228_v48  ;;  %v1207_v58 = vld [vmem:[%s3822_s18 + $0xe78] sm:$0xff]  ;;  %3251 = vst [vmem:[%s3838_s21 + $0xe58] sm:$0xff] %v2739_v53  ;;  %vm1718_vm14 = vcmp.gt.f32.partialorder %v1206_v56, 0.0  ;;  %v2230_v59 = vmul.f32 0.1, %v694_v52  ;;  %v696_v62 = vld [vmem:[%s3815_s20 + $0xe80] sm:$0xff] }
 0x20a   : > { %3252 = vst [vmem:[%s3838_s21 + $0xe60] sm:$0xff] %v2740_v54  ;;  %vm1719_vm15 = vcmp.gt.f32.partialorder %v1207_v58, 0.0  ;;  %v2231_v60 = vmul.f32 0.1, %v695_v57  ;;  %v2741_v61 = vsel %vm1717_vm13, %v693_v50, %v2229_v55  ;;  %v1208_v63 = vld [vmem:[%s3822_s18 + $0xe80] sm:$0xff]  ;;  %v697_v0 = vld [vmem:[%s3815_s20 + $0xe88] sm:$0xff] }
 0x20b   : > { %3253 = vst [vmem:[%s3838_s21 + $0xe68] sm:$0xff] %v2741_v61  ;;  %v2742_v1 = vsel %vm1718_vm14, %v694_v52, %v2230_v59  ;;  %vm1720_vm0 = vcmp.gt.f32.partialorder %v1208_v63, 0.0  ;;  %v2232_v3 = vmul.f32 0.1, %v696_v62  ;;  %v1209_v4 = vld [vmem:[%s3822_s18 + $0xe88] sm:$0xff]  ;;  %v698_v5 = vld [vmem:[%s3815_s20 + $0xe90] sm:$0xff] }
 0x20c   : > { %v2743_v2 = vsel %vm1719_vm15, %v695_v57, %v2231_v60  ;;  %v1210_v6 = vld [vmem:[%s3822_s18 + $0xe90] sm:$0xff]  ;;  %3254 = vst [vmem:[%s3838_s21 + $0xe70] sm:$0xff] %v2742_v1  ;;  %vm1721_vm1 = vcmp.gt.f32.partialorder %v1209_v4, 0.0  ;;  %v2233_v7 = vmul.f32 0.1, %v697_v0  ;;  %v699_v10 = vld [vmem:[%s3815_s20 + $0xe98] sm:$0xff] }
 0x20d   : > { %3255 = vst [vmem:[%s3838_s21 + $0xe78] sm:$0xff] %v2743_v2  ;;  %vm1722_vm2 = vcmp.gt.f32.partialorder %v1210_v6, 0.0  ;;  %v2234_v8 = vmul.f32 0.1, %v698_v5  ;;  %v2744_v9 = vsel %vm1720_vm0, %v696_v62, %v2232_v3  ;;  %v1211_v11 = vld [vmem:[%s3822_s18 + $0xe98] sm:$0xff]  ;;  %v700_v12 = vld [vmem:[%s3815_s20 + $0xea0] sm:$0xff] }
 0x20e   : > { %3256 = vst [vmem:[%s3838_s21 + $0xe80] sm:$0xff] %v2744_v9  ;;  %v2745_v13 = vsel %vm1721_vm1, %v697_v0, %v2233_v7  ;;  %vm1723_vm3 = vcmp.gt.f32.partialorder %v1211_v11, 0.0  ;;  %v2235_v15 = vmul.f32 0.1, %v699_v10  ;;  %v1212_v16 = vld [vmem:[%s3822_s18 + $0xea0] sm:$0xff]  ;;  %v701_v17 = vld [vmem:[%s3815_s20 + $0xea8] sm:$0xff] }
 0x20f   : > { %v2746_v14 = vsel %vm1722_vm2, %v698_v5, %v2234_v8  ;;  %v1213_v18 = vld [vmem:[%s3822_s18 + $0xea8] sm:$0xff]  ;;  %3257 = vst [vmem:[%s3838_s21 + $0xe88] sm:$0xff] %v2745_v13  ;;  %vm1724_vm4 = vcmp.gt.f32.partialorder %v1212_v16, 0.0  ;;  %v2236_v19 = vmul.f32 0.1, %v700_v12  ;;  %v702_v22 = vld [vmem:[%s3815_s20 + $0xeb0] sm:$0xff] }
 0x210   : > { %3258 = vst [vmem:[%s3838_s21 + $0xe90] sm:$0xff] %v2746_v14  ;;  %vm1725_vm5 = vcmp.gt.f32.partialorder %v1213_v18, 0.0  ;;  %v2237_v20 = vmul.f32 0.1, %v701_v17  ;;  %v2747_v21 = vsel %vm1723_vm3, %v699_v10, %v2235_v15  ;;  %v1214_v23 = vld [vmem:[%s3822_s18 + $0xeb0] sm:$0xff]  ;;  %v703_v24 = vld [vmem:[%s3815_s20 + $0xeb8] sm:$0xff] }
 0x211   : > { %3259 = vst [vmem:[%s3838_s21 + $0xe98] sm:$0xff] %v2747_v21  ;;  %v2748_v25 = vsel %vm1724_vm4, %v700_v12, %v2236_v19  ;;  %vm1726_vm6 = vcmp.gt.f32.partialorder %v1214_v23, 0.0  ;;  %v2238_v27 = vmul.f32 0.1, %v702_v22  ;;  %v1215_v28 = vld [vmem:[%s3822_s18 + $0xeb8] sm:$0xff]  ;;  %v704_v29 = vld [vmem:[%s3815_s20 + $0xec0] sm:$0xff] }
 0x212   : > { %v2749_v26 = vsel %vm1725_vm5, %v701_v17, %v2237_v20  ;;  %v1216_v30 = vld [vmem:[%s3822_s18 + $0xec0] sm:$0xff]  ;;  %3260 = vst [vmem:[%s3838_s21 + $0xea0] sm:$0xff] %v2748_v25  ;;  %vm1727_vm7 = vcmp.gt.f32.partialorder %v1215_v28, 0.0  ;;  %v2239_v31 = vmul.f32 0.1, %v703_v24  ;;  %v705_v34 = vld [vmem:[%s3815_s20 + $0xec8] sm:$0xff] }
 0x213   : > { %3261 = vst [vmem:[%s3838_s21 + $0xea8] sm:$0xff] %v2749_v26  ;;  %vm1728_vm8 = vcmp.gt.f32.partialorder %v1216_v30, 0.0  ;;  %v2240_v32 = vmul.f32 0.1, %v704_v29  ;;  %v2750_v33 = vsel %vm1726_vm6, %v702_v22, %v2238_v27  ;;  %v1217_v35 = vld [vmem:[%s3822_s18 + $0xec8] sm:$0xff]  ;;  %v706_v36 = vld [vmem:[%s3815_s20 + $0xed0] sm:$0xff] }
 0x214   : > { %3262 = vst [vmem:[%s3838_s21 + $0xeb0] sm:$0xff] %v2750_v33  ;;  %v2751_v37 = vsel %vm1727_vm7, %v703_v24, %v2239_v31  ;;  %vm1729_vm9 = vcmp.gt.f32.partialorder %v1217_v35, 0.0  ;;  %v2241_v39 = vmul.f32 0.1, %v705_v34  ;;  %v1218_v40 = vld [vmem:[%s3822_s18 + $0xed0] sm:$0xff]  ;;  %v707_v41 = vld [vmem:[%s3815_s20 + $0xed8] sm:$0xff] }
 0x215   : > { %v2752_v38 = vsel %vm1728_vm8, %v704_v29, %v2240_v32  ;;  %v1219_v42 = vld [vmem:[%s3822_s18 + $0xed8] sm:$0xff]  ;;  %3263 = vst [vmem:[%s3838_s21 + $0xeb8] sm:$0xff] %v2751_v37  ;;  %vm1730_vm10 = vcmp.gt.f32.partialorder %v1218_v40, 0.0  ;;  %v2242_v43 = vmul.f32 0.1, %v706_v36  ;;  %v708_v46 = vld [vmem:[%s3815_s20 + $0xee0] sm:$0xff] }
 0x216   : > { %3264 = vst [vmem:[%s3838_s21 + $0xec0] sm:$0xff] %v2752_v38  ;;  %vm1731_vm11 = vcmp.gt.f32.partialorder %v1219_v42, 0.0  ;;  %v2243_v44 = vmul.f32 0.1, %v707_v41  ;;  %v2753_v45 = vsel %vm1729_vm9, %v705_v34, %v2241_v39  ;;  %v1220_v47 = vld [vmem:[%s3822_s18 + $0xee0] sm:$0xff]  ;;  %v709_v48 = vld [vmem:[%s3815_s20 + $0xee8] sm:$0xff] }
 0x217   : > { %3265 = vst [vmem:[%s3838_s21 + $0xec8] sm:$0xff] %v2753_v45  ;;  %v2754_v49 = vsel %vm1730_vm10, %v706_v36, %v2242_v43  ;;  %vm1732_vm12 = vcmp.gt.f32.partialorder %v1220_v47, 0.0  ;;  %v2244_v51 = vmul.f32 0.1, %v708_v46  ;;  %v1221_v52 = vld [vmem:[%s3822_s18 + $0xee8] sm:$0xff]  ;;  %v710_v53 = vld [vmem:[%s3815_s20 + $0xef0] sm:$0xff] }
 0x218   : > { %v2755_v50 = vsel %vm1731_vm11, %v707_v41, %v2243_v44  ;;  %v1222_v54 = vld [vmem:[%s3822_s18 + $0xef0] sm:$0xff]  ;;  %3266 = vst [vmem:[%s3838_s21 + $0xed0] sm:$0xff] %v2754_v49  ;;  %vm1733_vm13 = vcmp.gt.f32.partialorder %v1221_v52, 0.0  ;;  %v2245_v55 = vmul.f32 0.1, %v709_v48  ;;  %v711_v58 = vld [vmem:[%s3815_s20 + $0xef8] sm:$0xff] }
 0x219   : > { %3267 = vst [vmem:[%s3838_s21 + $0xed8] sm:$0xff] %v2755_v50  ;;  %vm1734_vm14 = vcmp.gt.f32.partialorder %v1222_v54, 0.0  ;;  %v2246_v56 = vmul.f32 0.1, %v710_v53  ;;  %v2756_v57 = vsel %vm1732_vm12, %v708_v46, %v2244_v51  ;;  %v1223_v59 = vld [vmem:[%s3822_s18 + $0xef8] sm:$0xff]  ;;  %v712_v60 = vld [vmem:[%s3815_s20 + $0xf00] sm:$0xff] }
 0x21a   : > { %3268 = vst [vmem:[%s3838_s21 + $0xee0] sm:$0xff] %v2756_v57  ;;  %v2757_v61 = vsel %vm1733_vm13, %v709_v48, %v2245_v55  ;;  %vm1735_vm15 = vcmp.gt.f32.partialorder %v1223_v59, 0.0  ;;  %v2247_v63 = vmul.f32 0.1, %v711_v58  ;;  %v1224_v0 = vld [vmem:[%s3822_s18 + $0xf00] sm:$0xff]  ;;  %v713_v1 = vld [vmem:[%s3815_s20 + $0xf08] sm:$0xff] }
 0x21b   : > { %v2758_v62 = vsel %vm1734_vm14, %v710_v53, %v2246_v56  ;;  %v1225_v2 = vld [vmem:[%s3822_s18 + $0xf08] sm:$0xff]  ;;  %3269 = vst [vmem:[%s3838_s21 + $0xee8] sm:$0xff] %v2757_v61  ;;  %vm1736_vm0 = vcmp.gt.f32.partialorder %v1224_v0, 0.0  ;;  %v2248_v3 = vmul.f32 0.1, %v712_v60  ;;  %v714_v6 = vld [vmem:[%s3815_s20 + $0xf10] sm:$0xff] }
 0x21c   : > { %3270 = vst [vmem:[%s3838_s21 + $0xef0] sm:$0xff] %v2758_v62  ;;  %vm1737_vm1 = vcmp.gt.f32.partialorder %v1225_v2, 0.0  ;;  %v2249_v4 = vmul.f32 0.1, %v713_v1  ;;  %v2759_v5 = vsel %vm1735_vm15, %v711_v58, %v2247_v63  ;;  %v1226_v7 = vld [vmem:[%s3822_s18 + $0xf10] sm:$0xff]  ;;  %v715_v8 = vld [vmem:[%s3815_s20 + $0xf18] sm:$0xff] }
 0x21d   : > { %3271 = vst [vmem:[%s3838_s21 + $0xef8] sm:$0xff] %v2759_v5  ;;  %v2760_v9 = vsel %vm1736_vm0, %v712_v60, %v2248_v3  ;;  %vm1738_vm2 = vcmp.gt.f32.partialorder %v1226_v7, 0.0  ;;  %v2250_v11 = vmul.f32 0.1, %v714_v6  ;;  %v1227_v12 = vld [vmem:[%s3822_s18 + $0xf18] sm:$0xff]  ;;  %v716_v13 = vld [vmem:[%s3815_s20 + $0xf20] sm:$0xff] }
 0x21e   : > { %v2761_v10 = vsel %vm1737_vm1, %v713_v1, %v2249_v4  ;;  %v1228_v14 = vld [vmem:[%s3822_s18 + $0xf20] sm:$0xff]  ;;  %3272 = vst [vmem:[%s3838_s21 + $0xf00] sm:$0xff] %v2760_v9  ;;  %vm1739_vm3 = vcmp.gt.f32.partialorder %v1227_v12, 0.0  ;;  %v2251_v15 = vmul.f32 0.1, %v715_v8  ;;  %v717_v18 = vld [vmem:[%s3815_s20 + $0xf28] sm:$0xff] }
 0x21f   : > { %3273 = vst [vmem:[%s3838_s21 + $0xf08] sm:$0xff] %v2761_v10  ;;  %vm1740_vm4 = vcmp.gt.f32.partialorder %v1228_v14, 0.0  ;;  %v2252_v16 = vmul.f32 0.1, %v716_v13  ;;  %v2762_v17 = vsel %vm1738_vm2, %v714_v6, %v2250_v11  ;;  %v1229_v19 = vld [vmem:[%s3822_s18 + $0xf28] sm:$0xff]  ;;  %v718_v20 = vld [vmem:[%s3815_s20 + $0xf30] sm:$0xff] }
 0x220   : > { %3274 = vst [vmem:[%s3838_s21 + $0xf10] sm:$0xff] %v2762_v17  ;;  %v2763_v21 = vsel %vm1739_vm3, %v715_v8, %v2251_v15  ;;  %vm1741_vm5 = vcmp.gt.f32.partialorder %v1229_v19, 0.0  ;;  %v2253_v23 = vmul.f32 0.1, %v717_v18  ;;  %v1230_v24 = vld [vmem:[%s3822_s18 + $0xf30] sm:$0xff]  ;;  %v719_v25 = vld [vmem:[%s3815_s20 + $0xf38] sm:$0xff] }
 0x221   : > { %v2764_v22 = vsel %vm1740_vm4, %v716_v13, %v2252_v16  ;;  %v1231_v26 = vld [vmem:[%s3822_s18 + $0xf38] sm:$0xff]  ;;  %3275 = vst [vmem:[%s3838_s21 + $0xf18] sm:$0xff] %v2763_v21  ;;  %vm1742_vm6 = vcmp.gt.f32.partialorder %v1230_v24, 0.0  ;;  %v2254_v27 = vmul.f32 0.1, %v718_v20  ;;  %v720_v30 = vld [vmem:[%s3815_s20 + $0xf40] sm:$0xff] }
 0x222   : > { %3276 = vst [vmem:[%s3838_s21 + $0xf20] sm:$0xff] %v2764_v22  ;;  %vm1743_vm7 = vcmp.gt.f32.partialorder %v1231_v26, 0.0  ;;  %v2255_v28 = vmul.f32 0.1, %v719_v25  ;;  %v2765_v29 = vsel %vm1741_vm5, %v717_v18, %v2253_v23  ;;  %v1232_v31 = vld [vmem:[%s3822_s18 + $0xf40] sm:$0xff]  ;;  %v721_v32 = vld [vmem:[%s3815_s20 + $0xf48] sm:$0xff] }
 0x223   : > { %3277 = vst [vmem:[%s3838_s21 + $0xf28] sm:$0xff] %v2765_v29  ;;  %v2766_v33 = vsel %vm1742_vm6, %v718_v20, %v2254_v27  ;;  %vm1744_vm8 = vcmp.gt.f32.partialorder %v1232_v31, 0.0  ;;  %v2256_v35 = vmul.f32 0.1, %v720_v30  ;;  %v1233_v36 = vld [vmem:[%s3822_s18 + $0xf48] sm:$0xff]  ;;  %v722_v37 = vld [vmem:[%s3815_s20 + $0xf50] sm:$0xff] }
 0x224   : > { %v2767_v34 = vsel %vm1743_vm7, %v719_v25, %v2255_v28  ;;  %v1234_v38 = vld [vmem:[%s3822_s18 + $0xf50] sm:$0xff]  ;;  %3278 = vst [vmem:[%s3838_s21 + $0xf30] sm:$0xff] %v2766_v33  ;;  %vm1745_vm9 = vcmp.gt.f32.partialorder %v1233_v36, 0.0  ;;  %v2257_v39 = vmul.f32 0.1, %v721_v32  ;;  %v723_v42 = vld [vmem:[%s3815_s20 + $0xf58] sm:$0xff] }
 0x225   : > { %3279 = vst [vmem:[%s3838_s21 + $0xf38] sm:$0xff] %v2767_v34  ;;  %vm1746_vm10 = vcmp.gt.f32.partialorder %v1234_v38, 0.0  ;;  %v2258_v40 = vmul.f32 0.1, %v722_v37  ;;  %v2768_v41 = vsel %vm1744_vm8, %v720_v30, %v2256_v35  ;;  %v1235_v43 = vld [vmem:[%s3822_s18 + $0xf58] sm:$0xff]  ;;  %v724_v44 = vld [vmem:[%s3815_s20 + $0xf60] sm:$0xff] }
 0x226   : > { %3280 = vst [vmem:[%s3838_s21 + $0xf40] sm:$0xff] %v2768_v41  ;;  %v2769_v45 = vsel %vm1745_vm9, %v721_v32, %v2257_v39  ;;  %vm1747_vm11 = vcmp.gt.f32.partialorder %v1235_v43, 0.0  ;;  %v2259_v47 = vmul.f32 0.1, %v723_v42  ;;  %v1236_v48 = vld [vmem:[%s3822_s18 + $0xf60] sm:$0xff]  ;;  %v725_v49 = vld [vmem:[%s3815_s20 + $0xf68] sm:$0xff] }
 0x227   : > { %v2770_v46 = vsel %vm1746_vm10, %v722_v37, %v2258_v40  ;;  %v1237_v50 = vld [vmem:[%s3822_s18 + $0xf68] sm:$0xff]  ;;  %3281 = vst [vmem:[%s3838_s21 + $0xf48] sm:$0xff] %v2769_v45  ;;  %vm1748_vm12 = vcmp.gt.f32.partialorder %v1236_v48, 0.0  ;;  %v2260_v51 = vmul.f32 0.1, %v724_v44  ;;  %v726_v54 = vld [vmem:[%s3815_s20 + $0xf70] sm:$0xff] }
 0x228   : > { %3282 = vst [vmem:[%s3838_s21 + $0xf50] sm:$0xff] %v2770_v46  ;;  %vm1749_vm13 = vcmp.gt.f32.partialorder %v1237_v50, 0.0  ;;  %v2261_v52 = vmul.f32 0.1, %v725_v49  ;;  %v2771_v53 = vsel %vm1747_vm11, %v723_v42, %v2259_v47  ;;  %v1238_v55 = vld [vmem:[%s3822_s18 + $0xf70] sm:$0xff]  ;;  %v727_v56 = vld [vmem:[%s3815_s20 + $0xf78] sm:$0xff] }
 0x229   : > { %3283 = vst [vmem:[%s3838_s21 + $0xf58] sm:$0xff] %v2771_v53  ;;  %v2772_v57 = vsel %vm1748_vm12, %v724_v44, %v2260_v51  ;;  %vm1750_vm14 = vcmp.gt.f32.partialorder %v1238_v55, 0.0  ;;  %v2262_v59 = vmul.f32 0.1, %v726_v54  ;;  %v1239_v60 = vld [vmem:[%s3822_s18 + $0xf78] sm:$0xff]  ;;  %v728_v61 = vld [vmem:[%s3815_s20 + $0xf80] sm:$0xff] }
 0x22a   : > { %v2773_v58 = vsel %vm1749_vm13, %v725_v49, %v2261_v52  ;;  %v1240_v62 = vld [vmem:[%s3822_s18 + $0xf80] sm:$0xff]  ;;  %3284 = vst [vmem:[%s3838_s21 + $0xf60] sm:$0xff] %v2772_v57  ;;  %vm1751_vm15 = vcmp.gt.f32.partialorder %v1239_v60, 0.0  ;;  %v2263_v63 = vmul.f32 0.1, %v727_v56  ;;  %v729_v2 = vld [vmem:[%s3815_s20 + $0xf88] sm:$0xff] }
 0x22b   : > { %3285 = vst [vmem:[%s3838_s21 + $0xf68] sm:$0xff] %v2773_v58  ;;  %vm1752_vm0 = vcmp.gt.f32.partialorder %v1240_v62, 0.0  ;;  %v2264_v0 = vmul.f32 0.1, %v728_v61  ;;  %v2774_v1 = vsel %vm1750_vm14, %v726_v54, %v2262_v59  ;;  %v1241_v3 = vld [vmem:[%s3822_s18 + $0xf88] sm:$0xff]  ;;  %v730_v4 = vld [vmem:[%s3815_s20 + $0xf90] sm:$0xff] }
 0x22c   : > { %3286 = vst [vmem:[%s3838_s21 + $0xf70] sm:$0xff] %v2774_v1  ;;  %v2775_v5 = vsel %vm1751_vm15, %v727_v56, %v2263_v63  ;;  %vm1753_vm1 = vcmp.gt.f32.partialorder %v1241_v3, 0.0  ;;  %v2265_v7 = vmul.f32 0.1, %v729_v2  ;;  %v1242_v8 = vld [vmem:[%s3822_s18 + $0xf90] sm:$0xff]  ;;  %v731_v9 = vld [vmem:[%s3815_s20 + $0xf98] sm:$0xff] }
 0x22d   : > { %v2776_v6 = vsel %vm1752_vm0, %v728_v61, %v2264_v0  ;;  %v1243_v10 = vld [vmem:[%s3822_s18 + $0xf98] sm:$0xff]  ;;  %3287 = vst [vmem:[%s3838_s21 + $0xf78] sm:$0xff] %v2775_v5  ;;  %vm1754_vm2 = vcmp.gt.f32.partialorder %v1242_v8, 0.0  ;;  %v2266_v11 = vmul.f32 0.1, %v730_v4  ;;  %v732_v14 = vld [vmem:[%s3815_s20 + $0xfa0] sm:$0xff] }
 0x22e   : > { %3288 = vst [vmem:[%s3838_s21 + $0xf80] sm:$0xff] %v2776_v6  ;;  %vm1755_vm3 = vcmp.gt.f32.partialorder %v1243_v10, 0.0  ;;  %v2267_v12 = vmul.f32 0.1, %v731_v9  ;;  %v2777_v13 = vsel %vm1753_vm1, %v729_v2, %v2265_v7  ;;  %v1244_v15 = vld [vmem:[%s3822_s18 + $0xfa0] sm:$0xff]  ;;  %v733_v16 = vld [vmem:[%s3815_s20 + $0xfa8] sm:$0xff] }
 0x22f   : > { %3289 = vst [vmem:[%s3838_s21 + $0xf88] sm:$0xff] %v2777_v13  ;;  %v2778_v17 = vsel %vm1754_vm2, %v730_v4, %v2266_v11  ;;  %vm1756_vm4 = vcmp.gt.f32.partialorder %v1244_v15, 0.0  ;;  %v2268_v19 = vmul.f32 0.1, %v732_v14  ;;  %v1245_v20 = vld [vmem:[%s3822_s18 + $0xfa8] sm:$0xff]  ;;  %v734_v21 = vld [vmem:[%s3815_s20 + $0xfb0] sm:$0xff] }
 0x230   : > { %v2779_v18 = vsel %vm1755_vm3, %v731_v9, %v2267_v12  ;;  %v1246_v22 = vld [vmem:[%s3822_s18 + $0xfb0] sm:$0xff]  ;;  %3290 = vst [vmem:[%s3838_s21 + $0xf90] sm:$0xff] %v2778_v17  ;;  %vm1757_vm5 = vcmp.gt.f32.partialorder %v1245_v20, 0.0  ;;  %v2269_v23 = vmul.f32 0.1, %v733_v16  ;;  %v735_v26 = vld [vmem:[%s3815_s20 + $0xfb8] sm:$0xff] }
 0x231   : > { %3291 = vst [vmem:[%s3838_s21 + $0xf98] sm:$0xff] %v2779_v18  ;;  %vm1758_vm6 = vcmp.gt.f32.partialorder %v1246_v22, 0.0  ;;  %v2270_v24 = vmul.f32 0.1, %v734_v21  ;;  %v2780_v25 = vsel %vm1756_vm4, %v732_v14, %v2268_v19  ;;  %v1247_v27 = vld [vmem:[%s3822_s18 + $0xfb8] sm:$0xff]  ;;  %v736_v28 = vld [vmem:[%s3815_s20 + $0xfc0] sm:$0xff] }
 0x232   : > { %3292 = vst [vmem:[%s3838_s21 + $0xfa0] sm:$0xff] %v2780_v25  ;;  %v2781_v29 = vsel %vm1757_vm5, %v733_v16, %v2269_v23  ;;  %vm1759_vm7 = vcmp.gt.f32.partialorder %v1247_v27, 0.0  ;;  %v2271_v31 = vmul.f32 0.1, %v735_v26  ;;  %v1248_v32 = vld [vmem:[%s3822_s18 + $0xfc0] sm:$0xff]  ;;  %v737_v33 = vld [vmem:[%s3815_s20 + $0xfc8] sm:$0xff] }
 0x233   : > { %v2782_v30 = vsel %vm1758_vm6, %v734_v21, %v2270_v24  ;;  %v1249_v34 = vld [vmem:[%s3822_s18 + $0xfc8] sm:$0xff]  ;;  %3293 = vst [vmem:[%s3838_s21 + $0xfa8] sm:$0xff] %v2781_v29  ;;  %vm1760_vm8 = vcmp.gt.f32.partialorder %v1248_v32, 0.0  ;;  %v2272_v35 = vmul.f32 0.1, %v736_v28  ;;  %v738_v38 = vld [vmem:[%s3815_s20 + $0xfd0] sm:$0xff] }
 0x234   : > { %3294 = vst [vmem:[%s3838_s21 + $0xfb0] sm:$0xff] %v2782_v30  ;;  %vm1761_vm9 = vcmp.gt.f32.partialorder %v1249_v34, 0.0  ;;  %v2273_v36 = vmul.f32 0.1, %v737_v33  ;;  %v2783_v37 = vsel %vm1759_vm7, %v735_v26, %v2271_v31  ;;  %v1250_v39 = vld [vmem:[%s3822_s18 + $0xfd0] sm:$0xff]  ;;  %v739_v40 = vld [vmem:[%s3815_s20 + $0xfd8] sm:$0xff] }
 0x235   : > { %3295 = vst [vmem:[%s3838_s21 + $0xfb8] sm:$0xff] %v2783_v37  ;;  %v2784_v41 = vsel %vm1760_vm8, %v736_v28, %v2272_v35  ;;  %vm1762_vm10 = vcmp.gt.f32.partialorder %v1250_v39, 0.0  ;;  %v2274_v43 = vmul.f32 0.1, %v738_v38  ;;  %v1251_v44 = vld [vmem:[%s3822_s18 + $0xfd8] sm:$0xff]  ;;  %v740_v45 = vld [vmem:[%s3815_s20 + $0xfe0] sm:$0xff] }
 0x236   : > { %v2785_v42 = vsel %vm1761_vm9, %v737_v33, %v2273_v36  ;;  %v1252_v46 = vld [vmem:[%s3822_s18 + $0xfe0] sm:$0xff]  ;;  %3296 = vst [vmem:[%s3838_s21 + $0xfc0] sm:$0xff] %v2784_v41  ;;  %vm1763_vm11 = vcmp.gt.f32.partialorder %v1251_v44, 0.0  ;;  %v2275_v47 = vmul.f32 0.1, %v739_v40  ;;  %v741_v50 = vld [vmem:[%s3815_s20 + $0xfe8] sm:$0xff] }
 0x237   : > { %3297 = vst [vmem:[%s3838_s21 + $0xfc8] sm:$0xff] %v2785_v42  ;;  %vm1764_vm12 = vcmp.gt.f32.partialorder %v1252_v46, 0.0  ;;  %v2276_v48 = vmul.f32 0.1, %v740_v45  ;;  %v2786_v49 = vsel %vm1762_vm10, %v738_v38, %v2274_v43  ;;  %v1253_v51 = vld [vmem:[%s3822_s18 + $0xfe8] sm:$0xff]  ;;  %v742_v52 = vld [vmem:[%s3815_s20 + $0xff0] sm:$0xff] }
 0x238   : > { %3298 = vst [vmem:[%s3838_s21 + $0xfd0] sm:$0xff] %v2786_v49  ;;  %v2787_v53 = vsel %vm1763_vm11, %v739_v40, %v2275_v47  ;;  %vm1765_vm13 = vcmp.gt.f32.partialorder %v1253_v51, 0.0  ;;  %v2277_v55 = vmul.f32 0.1, %v741_v50  ;;  %v1254_v56 = vld [vmem:[%s3822_s18 + $0xff0] sm:$0xff]  ;;  %v743_v57 = vld [vmem:[%s3815_s20 + $0xff8] sm:$0xff] }
 0x239   : > { %v2788_v54 = vsel %vm1764_vm12, %v740_v45, %v2276_v48  ;;  %v1255_v58 = vld [vmem:[%s3822_s18 + $0xff8] sm:$0xff]  ;;  %3299 = vst [vmem:[%s3838_s21 + $0xfd8] sm:$0xff] %v2787_v53  ;;  %vm1766_vm14 = vcmp.gt.f32.partialorder %v1254_v56, 0.0  ;;  %v2278_v59 = vmul.f32 0.1, %v742_v52  ;;  %s3679_s12 = smov [#allocation7]  }
 0x23a   : > { %3300 = vst [vmem:[%s3838_s21 + $0xfe0] sm:$0xff] %v2788_v54  ;;  %vm1767_vm15 = vcmp.gt.f32.partialorder %v1255_v58, 0.0  ;;  %v2279_v60 = vmul.f32 0.1, %v743_v57  ;;  %v2789_v61 = vsel %vm1765_vm13, %v741_v50, %v2277_v55  ;;  %s3593_s16 = sshll.u32 %s3679_s12, 4  ;;  %s3594_s16 = int_to_ptr.vmem [resolvable:$false] %s3593_s16 }
 0x23b   : > { %3301 = vst [vmem:[%s3838_s21 + $0xfe8] sm:$0xff] %v2789_v61  ;;  %v2790_v62 = vsel %vm1766_vm14, %v742_v52, %v2278_v59  ;;  %s3595_s30 = scalar_lea.vmem %s3594_s16, 131072  ;;  %p3596_p5 = scmp.lt.s32.totalorder %s5372_s28, %s3594_s16 }
 0x23c   : > { %v2791_v63 = vsel %vm1767_vm15, %v743_v57, %v2279_v60  ;;  %3302 = vst [vmem:[%s3838_s21 + $0xff0] sm:$0xff] %v2790_v62  ;;  %p3597_p6 = scmp.lt.s32.totalorder %s3595_s30, %s3589_s15 }
 0x23d   : > { %3303 = vst [vmem:[%s3838_s21 + $0xff8] sm:$0xff] %v2791_v63 }
 0x23e   : > { %p3598_p4 = por %p3597_p6, %p3596_p5 }
 0x240   : > { %p3599_p7 = pnand %p3598_p4, %p3592_p2 }
 0x242   : > { %3602 = shalt.err (!%p3599_p7)
}
 0x243   : > { %s3603_s4 = scalar_lea.hbm %s5370_s7, 65536  ;;  %s3607_s6 = scalar_lea.hbm %s5425_s2, 131072 }
 0x244   : > { %p3604_p10 = scmp.ne.s32.totalorder %s5370_s7, %s3603_s4  ;;  %p3608_p3 = scmp.lt.s32.totalorder %s5370_s7, %s5425_s2 }
 0x245   : > { %p3609_p8 = scmp.lt.s32.totalorder %s3607_s6, %s3603_s4 }
 0x246   : > { %p3605_p1 = pnand %p3604_p10, %p3748_p9 }
 0x247   : > { %p3610_p0 = por %p3609_p8, %p3608_p3 }
 0x248   : > { %p3606_p13 = pneg %p3605_p1 }
 0x24a   : > { %p3611_p2 = pnand %p3610_p0, %p3606_p13 }
 0x24c   : > { %3614 = shalt.err (!%p3611_p2)
}
 0x24d   : > { %s3680_s18 = smov 1024   ;;  %s3681_s21 = smov 64  }
 0x24e   : > { %3466 = dma.vmem_to_hbm [thread:$0]  (%p3748_p9), %s5372_s28, 65536, %s5370_s7, %s3305_s8, %s3680_s18, %s3680_s18, %s3681_s21  }
 0x24f PF: > { %s3336_s19 = sand.u32 1, %s3653_s9   ;;  %p3476_p5 = pnand %p3437_p12, %p3755_p11 }
 0x250   : > { %s3337_s29 = scalar_lea.sflag [#allocation4], %s3336_s19 }
 0x251   : > { %p3477_p6 = pneg %p3476_p5 }
 0x253   : > { %3648 = dma.done.wait (%p3477_p6), %s3337_s29, 65536  }
 0x254   : > { %3650 = vsyncadd (%p3477_p6), %s3337_s29, 4294901760  ;;  %s21_s14 = sadd.s32 1, %s3673_s14   ;;  %s5432_s9 = smov %s3657_s10 }
 0x255   : > { %p18_p4 = scmp.ge.s32.totalorder %s21_s14, 4   ;;  %s5433_s10 = smov %s3661_s11 }
 0x256   : > { %s5434_s11 = smov %s3753_s23  ;;  %s5435_s12 = smov %s3669_s13 }
 0x257   : > { %s5436_s13 = smov %s5438_s17  ;;  %20 = sbr.rel (!%p18_p4) target bundleno = 8 (0x8), region = 86 }
 0x25c   :  { %3342 = vsyncpa [#allocation3], 1 }
 0x25d   :  { %3344 = vsyncpa [#allocation3 + $0x1], 1 }
 0x25e   :  { %3345 = vsyncpa [#allocation6], 1 }
 0x25f   :  { %3347 = vsyncpa [#allocation6 + $0x1], 1 }
 0x260   :  { %3348 = vsyncpa [#allocation4], 1 }
 0x261   :  { %3350 = vsyncpa [#allocation4 + $0x1], 1 }

</bundles_post_ra>
